<compile_context>
chip_gen: v7x
topology: tpu7x:2x2x1
jax: 0.10.0
libtpu: 0.0.40
codegen_flags: <defaults>
</compile_context>

<pallas_src>
import functools

import jax
import jax.numpy as jnp
from jax.experimental import pallas as pl
from jax.experimental.pallas import tpu as pltpu


def _round_up(x, m):
    return (x + m - 1) // m * m


# ----------------------------------------------------------------------------
# Pallas kernels
# ----------------------------------------------------------------------------
def _conv_bn_kernel(a_ref, b_ref, y_ref, stat_ref, acc_ref):
    """Tiled matmul (bf16 in, f32 acc) fused with per-channel sum / sumsq stats.

    grid = (num_m, num_k); both axes "arbitrary" because stats accumulate
    across the M axis in a grid-resident (8, Np) output block.
    """
    i = pl.program_id(0)
    k = pl.program_id(1)
    nk = pl.num_programs(1)

    @pl.when((i == 0) & (k == 0))
    def _():
        stat_ref[...] = jnp.zeros_like(stat_ref)

    @pl.when(k == 0)
    def _():
        acc_ref[...] = jnp.zeros_like(acc_ref)

    acc_ref[...] += jnp.dot(a_ref[...], b_ref[...],
                            preferred_element_type=jnp.float32)

    @pl.when(k == nk - 1)
    def _():
        y = acc_ref[...]
        y_ref[...] = y
        ssum = jnp.sum(y, axis=0, keepdims=True)          # (1, Np)
        ssq = jnp.sum(y * y, axis=0, keepdims=True)       # (1, Np)
        row = jax.lax.broadcasted_iota(jnp.int32, stat_ref.shape, 0)
        upd = jnp.where(row == 0, ssum, jnp.where(row == 1, ssq, 0.0))
        stat_ref[...] += upd


def _matmul_bias_kernel(a_ref, b_ref, bias_ref, o_ref, acc_ref):
    """Tiled matmul + bias (used only for the final conv with folded Linear)."""
    k = pl.program_id(1)

    @pl.when(k == 0)
    def _():
        acc_ref[...] = jnp.zeros_like(acc_ref)

    acc_ref[...] += jnp.dot(a_ref[...], b_ref[...],
                            preferred_element_type=jnp.float32)

    @pl.when(k == pl.num_programs(1) - 1)
    def _():
        o_ref[...] = acc_ref[...] + bias_ref[...]


def _affine_lrelu_kernel(x_ref, scale_ref, shift_ref, o_ref, *, slope):
    y = x_ref[...] * scale_ref[...] + shift_ref[...]
    o_ref[...] = jnp.where(y >= 0.0, y, slope * y)


# ----------------------------------------------------------------------------
# Pallas wrappers
# ----------------------------------------------------------------------------
def _mk_tiles(M, Kp):
    tk = min(512, Kp)
    nk = Kp // tk
    tm = min(256, _round_up(M, 8))
    Mp = _round_up(M, tm)
    nm = Mp // tm
    return tm, nm, Mp, tk, nk


def _pad_cast_a(a, Mp, Kp):
    M, K = a.shape
    a16 = a.astype(jnp.bfloat16)
    if (Mp, Kp) != (M, K):
        a16 = jnp.zeros((Mp, Kp), jnp.bfloat16).at[:M, :K].set(a16)
    return a16


def pallas_conv_bn(a, w_bf16):
    """[M,K] @ [Kp,Np] with fused per-column sum / sumsq (BatchNorm stats)."""
    M, _ = a.shape
    Kp, Np = w_bf16.shape
    tm, nm, Mp, tk, nk = _mk_tiles(M, Kp)
    a16 = _pad_cast_a(a, Mp, Kp)
    y, stats = pl.pallas_call(
        _conv_bn_kernel,
        out_shape=(jax.ShapeDtypeStruct((Mp, Np), jnp.float32),
                   jax.ShapeDtypeStruct((8, Np), jnp.float32)),
        grid=(nm, nk),
        in_specs=[
            pl.BlockSpec((tm, tk), lambda i, k: (i, k)),
            pl.BlockSpec((tk, Np), lambda i, k: (k, 0)),
        ],
        out_specs=(
            pl.BlockSpec((tm, Np), lambda i, k: (i, 0)),
            pl.BlockSpec((8, Np), lambda i, k: (0, 0)),
        ),
        scratch_shapes=[pltpu.VMEM((tm, Np), jnp.float32)],
        compiler_params=pltpu.CompilerParams(
            dimension_semantics=("arbitrary", "arbitrary")),
    )(a16, w_bf16)
    return y, stats


def pallas_matmul_bias(a, w_bf16, bias):
    """[M,K] @ [Kp,Np] + bias[1,Np] (final conv, Linear folded in)."""
    M, _ = a.shape
    Kp, Np = w_bf16.shape
    tm, nm, Mp, tk, nk = _mk_tiles(M, Kp)
    a16 = _pad_cast_a(a, Mp, Kp)
    return pl.pallas_call(
        _matmul_bias_kernel,
        out_shape=jax.ShapeDtypeStruct((Mp, Np), jnp.float32),
        grid=(nm, nk),
        in_specs=[
            pl.BlockSpec((tm, tk), lambda i, k: (i, k)),
            pl.BlockSpec((tk, Np), lambda i, k: (k, 0)),
            pl.BlockSpec((1, Np), lambda i, k: (0, 0)),
        ],
        out_specs=pl.BlockSpec((tm, Np), lambda i, k: (i, 0)),
        scratch_shapes=[pltpu.VMEM((tm, Np), jnp.float32)],
        compiler_params=pltpu.CompilerParams(
            dimension_semantics=("parallel", "arbitrary")),
    )(a16, w_bf16, bias)


def pallas_affine_lrelu(x, scale, shift, slope):
    """y = leaky_relu(x * scale + shift), tiled over rows (f32 throughout)."""
    M, Np = x.shape                      # M is a multiple of 8, Np of 128
    tm = 256 if M % 256 == 0 else M
    nm = M // tm
    return pl.pallas_call(
        functools.partial(_affine_lrelu_kernel, slope=slope),
        out_shape=jax.ShapeDtypeStruct((M, Np), jnp.float32),
        grid=(nm,),
        in_specs=[
            pl.BlockSpec((tm, Np), lambda i: (i, 0)),
            pl.BlockSpec((1, Np), lambda i: (0, 0)),
            pl.BlockSpec((1, Np), lambda i: (0, 0)),
        ],
        out_specs=pl.BlockSpec((tm, Np), lambda i: (i, 0)),
        compiler_params=pltpu.CompilerParams(dimension_semantics=("parallel",)),
    )(x, scale, shift)


# ----------------------------------------------------------------------------
# Conv plumbing (im2col is XLA-side glue; all heavy compute is in Pallas)
# ----------------------------------------------------------------------------
def _im2col(x_nhwc, ksize, stride, padding):
    n, h, w, c = x_nhwc.shape
    x_pad = jnp.pad(x_nhwc, ((0, 0), (padding, padding), (padding, padding), (0, 0)))
    ho = (h + 2 * padding - ksize) // stride + 1
    wo = (w + 2 * padding - ksize) // stride + 1
    cols = []
    for kh in range(ksize):
        for kw in range(ksize):
            cols.append(
                x_pad[:, kh:kh + stride * ho:stride, kw:kw + stride * wo:stride, :]
            )
    cols = jnp.stack(cols, axis=3)                       # [N, Ho, Wo, k*k, C]
    cols = cols.reshape(n * ho * wo, ksize * ksize * c)  # [M, K]
    return cols, (n, ho, wo)


# ----------------------------------------------------------------------------
# Parameters (deterministic synthetic init matching weights_init semantics)
# ----------------------------------------------------------------------------
def init_params(key, n_c, n_fmps):
    chans = [n_c, n_fmps, n_fmps * 2, n_fmps * 4, n_fmps * 8, 1]
    params = {"conv_w": [], "conv_b": [], "bn_g": [], "bn_b": []}
    for i in range(5):
        cin, cout = chans[i], chans[i + 1]
        key, k1, k2 = jax.random.split(key, 3)
        # Conv weight ~ N(0, 0.02) per weights_init
        params["conv_w"].append(
            0.02 * jax.random.normal(k1, (cout, cin, 4, 4), jnp.float32))
        # Conv bias: PyTorch default uniform(-1/sqrt(fan_in), 1/sqrt(fan_in))
        bound = 1.0 / jnp.sqrt(jnp.float32(cin * 16))
        params["conv_b"].append(
            jax.random.uniform(k2, (cout,), jnp.float32, -bound, bound))
        if i < 4:
            key, k3 = jax.random.split(key)
            # BatchNorm weight ~ N(1, 0.02), bias = 0 per weights_init
            params["bn_g"].append(
                1.0 + 0.02 * jax.random.normal(k3, (cout,), jnp.float32))
            params["bn_b"].append(jnp.zeros((cout,), jnp.float32))
    key, k4, k5 = jax.random.split(key, 3)
    # Linear(1,1): default PyTorch init (uniform, bound = 1/sqrt(1) = 1)
    params["lin_w"] = jax.random.uniform(k4, (1, 1), jnp.float32, -1.0, 1.0)
    params["lin_b"] = jax.random.uniform(k5, (1,), jnp.float32, -1.0, 1.0)
    return params


def prepare_params(params, n_c):
    """One-time weight preprocessing: transpose, channel-pad, bf16-cast, fold Linear.

    Activations are carried channel-padded to 128 between layers, so the weight
    matrices of layers 1..4 get zero rows for the padded input channels.
    Conv biases of the BN layers are dropped (cancelled by the batch mean).
    """
    prep = {"w": [], "gamma": [], "beta": []}
    c_in_eff = n_c
    for i in range(5):
        w = params["conv_w"][i]                     # (cout, cin, kh, kw)
        cout, cin, kh, kw = w.shape
        wt = jnp.transpose(w, (2, 3, 1, 0))         # (kh, kw, cin, cout)
        if c_in_eff > cin:                          # zero rows for padded channels
            wt = jnp.pad(wt, ((0, 0), (0, 0), (0, c_in_eff - cin), (0, 0)))
        K = kh * kw * c_in_eff
        wmat = wt.reshape(K, cout)
        Np = _round_up(cout, 128)
        Kp0 = _round_up(K, 128)
        tk = min(512, Kp0)
        Kp = _round_up(Kp0, tk)
        if i == 4:
            # fold Linear(1,1): out = conv(x) * lin_w + (conv_b * lin_w + lin_b)
            wmat = wmat * params["lin_w"][0, 0]
        w_pad = jnp.zeros((Kp, Np), jnp.float32).at[:K, :cout].set(wmat)
        prep["w"].append(w_pad.astype(jnp.bfloat16))
        if i < 4:
            g = jnp.zeros((1, Np), jnp.float32).at[0, :cout].set(params["bn_g"][i])
            b = jnp.zeros((1, Np), jnp.float32).at[0, :cout].set(params["bn_b"][i])
            prep["gamma"].append(g)
            prep["beta"].append(b)
            c_in_eff = Np                           # carry padded channels
        else:
            bias = params["conv_b"][i] * params["lin_w"][0, 0] + params["lin_b"]
            prep["b4"] = jnp.zeros((1, Np), jnp.float32).at[0, :cout].set(bias)
    return prep


# ----------------------------------------------------------------------------
# Forward pass
# ----------------------------------------------------------------------------
def discriminator_forward(prep, x_nchw):
    x = jnp.transpose(x_nchw, (0, 2, 3, 1)).astype(jnp.float32)   # NCHW -> NHWC
    eps = 1e-5
    for i in range(4):
        cols, (n, ho, wo) = _im2col(x, 4, 2, 1)
        M = cols.shape[0]                                         # static
        y2d, stats = pallas_conv_bn(cols, prep["w"][i])           # fused matmul+stats
        mean = stats[0:1, :] / M
        var = jnp.maximum(stats[1:2, :] / M - mean * mean, 0.0)   # clamp (fp cancel)
        inv_std = jax.lax.rsqrt(var + eps)
        scale = prep["gamma"][i] * inv_std
        shift = prep["beta"][i] - mean * scale
        y2d = pallas_affine_lrelu(y2d, scale, shift, 0.2)
        x = y2d[:M].reshape(n, ho, wo, y2d.shape[1])              # channel-padded NHWC
    # final conv: 4x4, stride 1, padding 0 -> spatial 1x1, 1 channel (+ folded Linear)
    cols, (n, ho, wo) = _im2col(x, 4, 1, 0)
    M = cols.shape[0]
    y = pallas_matmul_bias(cols, prep["w"][4], prep["b4"])
    return y[:M, :1].reshape(-1, 1, 1, 1)                         # .view(-1, 1, 1, 1)


if __name__ == "__main__":
    n_c, n_fmps = 3, 8
    batch, spatial = 2, 64  # 64 -> 32 -> 16 -> 8 -> 4 -> 1 (DCGAN discriminator)

    key = jax.random.PRNGKey(0)
    key, kx = jax.random.split(key)
    x = jax.random.normal(kx, (batch, n_c, spatial, spatial), jnp.float32)
    params = init_params(key, n_c, n_fmps)
    prep = prepare_params(params, n_c)           # one-time weight preprocessing

    fwd = jax.jit(discriminator_forward)
    out = fwd(prep, x)
    out = jax.block_until_ready(out)

    assert out.shape == (batch, 1, 1, 1), out.shape
    assert jnp.all(jnp.isfinite(out))
    print("KERNEL_OK")
</pallas_src>

<mosaic_0001>
module attributes {stable_mosaic.version = 11 : i64} {
  func.func @_conv_bn_kernel(%arg0: i32, %arg1: i32, %arg2: memref<256x128xbf16, #tpu.memory_space<vmem>>, %arg3: memref<128x128xbf16, #tpu.memory_space<vmem>>, %arg4: memref<256x128xf32, #tpu.memory_space<vmem>>, %arg5: memref<8x128xf32, #tpu.memory_space<vmem>>, %arg6: memref<256x128xf32, #tpu.memory_space<vmem>>) attributes {dimension_semantics = [#tpu.dimension_semantics<arbitrary>, #tpu.dimension_semantics<arbitrary>], iteration_bounds = array<i64: 8, 1>, scalar_prefetch = 0 : i64, scratch_operands = 1 : i64, tpu.core_type = #tpu.core_type<tc>, window_params = [{transform_indices = @transform_0, window_bounds = array<i64: 256, 128>}, {transform_indices = @transform_1, window_bounds = array<i64: 128, 128>}, {transform_indices = @transform_2, window_bounds = array<i64: 256, 128>}, {pipeline_mode = #tpu.pipeline_mode<synchronous>, transform_indices = @transform_3, window_bounds = array<i64: 8, 128>}]} {
    %c0_i32 = arith.constant 0 : i32
    %0 = arith.cmpi eq, %arg0, %c0_i32 : i32
    %c0_i32_0 = arith.constant 0 : i32
    %1 = arith.cmpi eq, %arg1, %c0_i32_0 : i32
    %2 = arith.andi %0, %1 : i1
    %3 = arith.extui %2 : i1 to i32
    %c0_i32_1 = arith.constant 0 : i32
    %4 = arith.cmpi ne, %3, %c0_i32_1 : i32
    scf.if %4 {
      %cst_13 = arith.constant 0.000000e+00 : f32
      %17 = vector.broadcast %cst_13 : f32 to vector<8x128xf32>
      %c0_14 = arith.constant 0 : index
      %c0_15 = arith.constant 0 : index
      %18 = vector.load %arg5[%c0_14, %c0_15] : memref<8x128xf32, #tpu.memory_space<vmem>>, vector<8x128xf32>
      tpu.vector_store %arg5[%c0_14, %c0_15], %17 {strides = array<i32>} : memref<8x128xf32, #tpu.memory_space<vmem>>, vector<8x128xf32>,
    } else {
    }
    %c0_i32_2 = arith.constant 0 : i32
    %5 = arith.cmpi eq, %arg1, %c0_i32_2 : i32
    %6 = arith.extui %5 : i1 to i32
    %c0_i32_3 = arith.constant 0 : i32
    %7 = arith.cmpi ne, %6, %c0_i32_3 : i32
    scf.if %7 {
      %cst_13 = arith.constant 0.000000e+00 : f32
      %17 = vector.broadcast %cst_13 : f32 to vector<256x128xf32>
      %c0_14 = arith.constant 0 : index
      %c0_15 = arith.constant 0 : index
      %18 = vector.load %arg6[%c0_14, %c0_15] : memref<256x128xf32, #tpu.memory_space<vmem>>, vector<256x128xf32>
      tpu.vector_store %arg6[%c0_14, %c0_15], %17 {strides = array<i32>} : memref<256x128xf32, #tpu.memory_space<vmem>>, vector<256x128xf32>,
    } else {
    }
    %c0 = arith.constant 0 : index
    %c0_4 = arith.constant 0 : index
    %8 = vector.load %arg6[%c0, %c0_4] : memref<256x128xf32, #tpu.memory_space<vmem>>, vector<256x128xf32>
    %c0_5 = arith.constant 0 : index
    %c0_6 = arith.constant 0 : index
    %9 = vector.load %arg2[%c0_5, %c0_6] : memref<256x128xbf16, #tpu.memory_space<vmem>>, vector<256x128xbf16>
    %c0_7 = arith.constant 0 : index
    %c0_8 = arith.constant 0 : index
    %10 = vector.load %arg3[%c0_7, %c0_8] : memref<128x128xbf16, #tpu.memory_space<vmem>>, vector<128x128xbf16>
    %cst = arith.constant dense<0.000000e+00> : vector<256x128xf32>
    %11 = tpu.matmul %9, %10, %cst {dimension_numbers = #tpu.dot_dimension_numbers<[1], [0], [0], [1], [0, 0, 1, 1], [], []>} : vector<256x128xbf16>, vector<128x128xbf16>, vector<256x128xf32> -> vector<256x128xf32>
    %12 = arith.addf %8, %11 : vector<256x128xf32>
    %c0_9 = arith.constant 0 : index
    %c0_10 = arith.constant 0 : index
    %13 = vector.load %arg6[%c0_9, %c0_10] : memref<256x128xf32, #tpu.memory_space<vmem>>, vector<256x128xf32>
    tpu.vector_store %arg6[%c0_9, %c0_10], %12 {strides = array<i32>} : memref<256x128xf32, #tpu.memory_space<vmem>>, vector<256x128xf32>,
    %c0_i32_11 = arith.constant 0 : i32
    %14 = arith.cmpi eq, %arg1, %c0_i32_11 : i32
    %15 = arith.extui %14 : i1 to i32
    %c0_i32_12 = arith.constant 0 : i32
    %16 = arith.cmpi ne, %15, %c0_i32_12 : i32
    scf.if %16 {
      %c0_13 = arith.constant 0 : index
      %c0_14 = arith.constant 0 : index
      %17 = vector.load %arg6[%c0_13, %c0_14] : memref<256x128xf32, #tpu.memory_space<vmem>>, vector<256x128xf32>
      %c0_15 = arith.constant 0 : index
      %c0_16 = arith.constant 0 : index
      %18 = vector.load %arg4[%c0_15, %c0_16] : memref<256x128xf32, #tpu.memory_space<vmem>>, vector<256x128xf32>
      tpu.vector_store %arg4[%c0_15, %c0_16], %17 {strides = array<i32>} : memref<256x128xf32, #tpu.memory_space<vmem>>, vector<256x128xf32>,
      %cst_17 = arith.constant dense<0.000000e+00> : vector<128xf32>
      %19 = vector.multi_reduction <add>, %17, %cst_17 [0] : vector<256x128xf32> to vector<128xf32>
      %20 = vector.shape_cast %19 : vector<128xf32> to vector<1x128xf32>
      %21 = arith.mulf %17, %17 : vector<256x128xf32>
      %cst_18 = arith.constant dense<0.000000e+00> : vector<128xf32>
      %22 = vector.multi_reduction <add>, %21, %cst_18 [0] : vector<256x128xf32> to vector<128xf32>
      %23 = vector.shape_cast %22 : vector<128xf32> to vector<1x128xf32>
      %24 = tpu.iota {dimensions = array<i32: 0>} : vector<8x128xi32>
      %c0_i32_19 = arith.constant 0 : i32
      %25 = vector.broadcast %c0_i32_19 : i32 to vector<8x128xi32>
      %26 = arith.cmpi eq, %24, %25 : vector<8x128xi32>
      %c1_i32 = arith.constant 1 : i32
      %27 = vector.broadcast %c1_i32 : i32 to vector<8x128xi32>
      %28 = arith.cmpi eq, %24, %27 : vector<8x128xi32>
      %cst_20 = arith.constant 0.000000e+00 : f32
      %29 = vector.shape_cast %23 : vector<1x128xf32> to vector<1x128xf32>
      %30 = vector.broadcast %29 : vector<1x128xf32> to vector<8x128xf32>
      %31 = vector.broadcast %cst_20 : f32 to vector<8x128xf32>
      %32 = arith.select %28, %30, %31 : vector<8x128xi1>, vector<8x128xf32>
      %33 = vector.shape_cast %20 : vector<1x128xf32> to vector<1x128xf32>
      %34 = vector.broadcast %33 : vector<1x128xf32> to vector<8x128xf32>
      %35 = arith.select %26, %34, %32 : vector<8x128xi1>, vector<8x128xf32>
      %c0_21 = arith.constant 0 : index
      %c0_22 = arith.constant 0 : index
      %36 = vector.load %arg5[%c0_21, %c0_22] : memref<8x128xf32, #tpu.memory_space<vmem>>, vector<8x128xf32>
      %37 = arith.addf %36, %35 : vector<8x128xf32>
      %c0_23 = arith.constant 0 : index
      %c0_24 = arith.constant 0 : index
      %38 = vector.load %arg5[%c0_23, %c0_24] : memref<8x128xf32, #tpu.memory_space<vmem>>, vector<8x128xf32>
      tpu.vector_store %arg5[%c0_23, %c0_24], %37 {strides = array<i32>} : memref<8x128xf32, #tpu.memory_space<vmem>>, vector<8x128xf32>,
    } else {
    }
    return
  }
  func.func @transform_0(%arg0: i32, %arg1: i32) -> (i32, i32) {
    %c0_i32 = arith.constant 0 : i32
    return %arg0, %arg1 : i32, i32
  }
  func.func @transform_1(%arg0: i32, %arg1: i32) -> (i32, i32) {
    %c0_i32 = arith.constant 0 : i32
    %c0_i32_0 = arith.constant 0 : i32
    return %arg1, %c0_i32 : i32, i32
  }
  func.func @transform_2(%arg0: i32, %arg1: i32) -> (i32, i32) {
    %c0_i32 = arith.constant 0 : i32
    %c0_i32_0 = arith.constant 0 : i32
    return %arg0, %c0_i32 : i32, i32
  }
  func.func @transform_3(%arg0: i32, %arg1: i32) -> (i32, i32) {
    %c0_i32 = arith.constant 0 : i32
    %c0_i32_0 = arith.constant 0 : i32
    %c0_i32_1 = arith.constant 0 : i32
    return %c0_i32, %c0_i32_0 : i32, i32
  }
}

module attributes {stable_mosaic.version = 11 : i64} {
  func.func @_affine_lrelu_kernel(%arg0: i32, %arg1: memref<256x128xf32, #tpu.memory_space<vmem>>, %arg2: memref<1x128xf32, #tpu.memory_space<vmem>>, %arg3: memref<1x128xf32, #tpu.memory_space<vmem>>, %arg4: memref<256x128xf32, #tpu.memory_space<vmem>>) attributes {dimension_semantics = [#tpu.dimension_semantics<parallel>], iteration_bounds = array<i64: 8>, scalar_prefetch = 0 : i64, scratch_operands = 0 : i64, tpu.core_type = #tpu.core_type<tc>, window_params = [{transform_indices = @transform_0, window_bounds = array<i64: 256, 128>}, {pipeline_mode = #tpu.pipeline_mode<synchronous>, transform_indices = @transform_1, window_bounds = array<i64: 1, 128>}, {pipeline_mode = #tpu.pipeline_mode<synchronous>, transform_indices = @transform_2, window_bounds = array<i64: 1, 128>}, {transform_indices = @transform_3, window_bounds = array<i64: 256, 128>}]} {
    %c0 = arith.constant 0 : index
    %c0_0 = arith.constant 0 : index
    %0 = vector.load %arg1[%c0, %c0_0] : memref<256x128xf32, #tpu.memory_space<vmem>>, vector<256x128xf32>
    %c0_1 = arith.constant 0 : index
    %c0_2 = arith.constant 0 : index
    %1 = vector.load %arg2[%c0_1, %c0_2] : memref<1x128xf32, #tpu.memory_space<vmem>>, vector<1x128xf32>
    %2 = vector.broadcast %1 : vector<1x128xf32> to vector<256x128xf32>
    %3 = arith.mulf %0, %2 : vector<256x128xf32>
    %c0_3 = arith.constant 0 : index
    %c0_4 = arith.constant 0 : index
    %4 = vector.load %arg3[%c0_3, %c0_4] : memref<1x128xf32, #tpu.memory_space<vmem>>, vector<1x128xf32>
    %5 = vector.broadcast %4 : vector<1x128xf32> to vector<256x128xf32>
    %6 = arith.addf %3, %5 : vector<256x128xf32>
    %cst = arith.constant 0.000000e+00 : f32
    %7 = vector.broadcast %cst : f32 to vector<256x128xf32>
    %8 = arith.cmpf oge, %6, %7 : vector<256x128xf32>
    %cst_5 = arith.constant 2.000000e-01 : f32
    %9 = vector.broadcast %cst_5 : f32 to vector<256x128xf32>
    %10 = arith.mulf %9, %6 : vector<256x128xf32>
    %11 = arith.select %8, %6, %10 : vector<256x128xi1>, vector<256x128xf32>
    %c0_6 = arith.constant 0 : index
    %c0_7 = arith.constant 0 : index
    %12 = vector.load %arg4[%c0_6, %c0_7] : memref<256x128xf32, #tpu.memory_space<vmem>>, vector<256x128xf32>
    tpu.vector_store %arg4[%c0_6, %c0_7], %11 {strides = array<i32>} : memref<256x128xf32, #tpu.memory_space<vmem>>, vector<256x128xf32>,
    return
  }
  func.func @transform_0(%arg0: i32) -> (i32, i32) {
    %c0_i32 = arith.constant 0 : i32
    %c0_i32_0 = arith.constant 0 : i32
    return %arg0, %c0_i32 : i32, i32
  }
  func.func @transform_1(%arg0: i32) -> (i32, i32) {
    %c0_i32 = arith.constant 0 : i32
    %c0_i32_0 = arith.constant 0 : i32
    %c0_i32_1 = arith.constant 0 : i32
    return %c0_i32, %c0_i32_0 : i32, i32
  }
  func.func @transform_2(%arg0: i32) -> (i32, i32) {
    %c0_i32 = arith.constant 0 : i32
    %c0_i32_0 = arith.constant 0 : i32
    %c0_i32_1 = arith.constant 0 : i32
    return %c0_i32, %c0_i32_0 : i32, i32
  }
  func.func @transform_3(%arg0: i32) -> (i32, i32) {
    %c0_i32 = arith.constant 0 : i32
    %c0_i32_0 = arith.constant 0 : i32
    return %arg0, %c0_i32 : i32, i32
  }
}

module attributes {stable_mosaic.version = 11 : i64} {
  func.func @_conv_bn_kernel(%arg0: i32, %arg1: i32, %arg2: memref<256x512xbf16, #tpu.memory_space<vmem>>, %arg3: memref<512x128xbf16, #tpu.memory_space<vmem>>, %arg4: memref<256x128xf32, #tpu.memory_space<vmem>>, %arg5: memref<8x128xf32, #tpu.memory_space<vmem>>, %arg6: memref<256x128xf32, #tpu.memory_space<vmem>>) attributes {dimension_semantics = [#tpu.dimension_semantics<arbitrary>, #tpu.dimension_semantics<arbitrary>], iteration_bounds = array<i64: 2, 4>, scalar_prefetch = 0 : i64, scratch_operands = 1 : i64, tpu.core_type = #tpu.core_type<tc>, window_params = [{transform_indices = @transform_0, window_bounds = array<i64: 256, 512>}, {transform_indices = @transform_1, window_bounds = array<i64: 512, 128>}, {transform_indices = @transform_2, window_bounds = array<i64: 256, 128>}, {pipeline_mode = #tpu.pipeline_mode<synchronous>, transform_indices = @transform_3, window_bounds = array<i64: 8, 128>}]} {
    %c0_i32 = arith.constant 0 : i32
    %0 = arith.cmpi eq, %arg0, %c0_i32 : i32
    %c0_i32_0 = arith.constant 0 : i32
    %1 = arith.cmpi eq, %arg1, %c0_i32_0 : i32
    %2 = arith.andi %0, %1 : i1
    %3 = arith.extui %2 : i1 to i32
    %c0_i32_1 = arith.constant 0 : i32
    %4 = arith.cmpi ne, %3, %c0_i32_1 : i32
    scf.if %4 {
      %cst_12 = arith.constant 0.000000e+00 : f32
      %17 = vector.broadcast %cst_12 : f32 to vector<8x128xf32>
      %c0_13 = arith.constant 0 : index
      %c0_14 = arith.constant 0 : index
      %18 = vector.load %arg5[%c0_13, %c0_14] : memref<8x128xf32, #tpu.memory_space<vmem>>, vector<8x128xf32>
      tpu.vector_store %arg5[%c0_13, %c0_14], %17 {strides = array<i32>} : memref<8x128xf32, #tpu.memory_space<vmem>>, vector<8x128xf32>,
    } else {
    }
    %c0_i32_2 = arith.constant 0 : i32
    %5 = arith.cmpi eq, %arg1, %c0_i32_2 : i32
    %6 = arith.extui %5 : i1 to i32
    %c0_i32_3 = arith.constant 0 : i32
    %7 = arith.cmpi ne, %6, %c0_i32_3 : i32
    scf.if %7 {
      %cst_12 = arith.constant 0.000000e+00 : f32
      %17 = vector.broadcast %cst_12 : f32 to vector<256x128xf32>
      %c0_13 = arith.constant 0 : index
      %c0_14 = arith.constant 0 : index
      %18 = vector.load %arg6[%c0_13, %c0_14] : memref<256x128xf32, #tpu.memory_space<vmem>>, vector<256x128xf32>
      tpu.vector_store %arg6[%c0_13, %c0_14], %17 {strides = array<i32>} : memref<256x128xf32, #tpu.memory_space<vmem>>, vector<256x128xf32>,
    } else {
    }
    %c0 = arith.constant 0 : index
    %c0_4 = arith.constant 0 : index
    %8 = vector.load %arg6[%c0, %c0_4] : memref<256x128xf32, #tpu.memory_space<vmem>>, vector<256x128xf32>
    %c0_5 = arith.constant 0 : index
    %c0_6 = arith.constant 0 : index
    %9 = vector.load %arg2[%c0_5, %c0_6] : memref<256x512xbf16, #tpu.memory_space<vmem>>, vector<256x512xbf16>
    %c0_7 = arith.constant 0 : index
    %c0_8 = arith.constant 0 : index
    %10 = vector.load %arg3[%c0_7, %c0_8] : memref<512x128xbf16, #tpu.memory_space<vmem>>, vector<512x128xbf16>
    %cst = arith.constant dense<0.000000e+00> : vector<256x128xf32>
    %11 = tpu.matmul %9, %10, %cst {dimension_numbers = #tpu.dot_dimension_numbers<[1], [0], [0], [1], [0, 0, 1, 1], [], []>} : vector<256x512xbf16>, vector<512x128xbf16>, vector<256x128xf32> -> vector<256x128xf32>
    %12 = arith.addf %8, %11 : vector<256x128xf32>
    %c0_9 = arith.constant 0 : index
    %c0_10 = arith.constant 0 : index
    %13 = vector.load %arg6[%c0_9, %c0_10] : memref<256x128xf32, #tpu.memory_space<vmem>>, vector<256x128xf32>
    tpu.vector_store %arg6[%c0_9, %c0_10], %12 {strides = array<i32>} : memref<256x128xf32, #tpu.memory_space<vmem>>, vector<256x128xf32>,
    %c3_i32 = arith.constant 3 : i32
    %14 = arith.cmpi eq, %arg1, %c3_i32 : i32
    %15 = arith.extui %14 : i1 to i32
    %c0_i32_11 = arith.constant 0 : i32
    %16 = arith.cmpi ne, %15, %c0_i32_11 : i32
    scf.if %16 {
      %c0_12 = arith.constant 0 : index
      %c0_13 = arith.constant 0 : index
      %17 = vector.load %arg6[%c0_12, %c0_13] : memref<256x128xf32, #tpu.memory_space<vmem>>, vector<256x128xf32>
      %c0_14 = arith.constant 0 : index
      %c0_15 = arith.constant 0 : index
      %18 = vector.load %arg4[%c0_14, %c0_15] : memref<256x128xf32, #tpu.memory_space<vmem>>, vector<256x128xf32>
      tpu.vector_store %arg4[%c0_14, %c0_15], %17 {strides = array<i32>} : memref<256x128xf32, #tpu.memory_space<vmem>>, vector<256x128xf32>,
      %cst_16 = arith.constant dense<0.000000e+00> : vector<128xf32>
      %19 = vector.multi_reduction <add>, %17, %cst_16 [0] : vector<256x128xf32> to vector<128xf32>
      %20 = vector.shape_cast %19 : vector<128xf32> to vector<1x128xf32>
      %21 = arith.mulf %17, %17 : vector<256x128xf32>
      %cst_17 = arith.constant dense<0.000000e+00> : vector<128xf32>
      %22 = vector.multi_reduction <add>, %21, %cst_17 [0] : vector<256x128xf32> to vector<128xf32>
      %23 = vector.shape_cast %22 : vector<128xf32> to vector<1x128xf32>
      %24 = tpu.iota {dimensions = array<i32: 0>} : vector<8x128xi32>
      %c0_i32_18 = arith.constant 0 : i32
      %25 = vector.broadcast %c0_i32_18 : i32 to vector<8x128xi32>
      %26 = arith.cmpi eq, %24, %25 : vector<8x128xi32>
      %c1_i32 = arith.constant 1 : i32
      %27 = vector.broadcast %c1_i32 : i32 to vector<8x128xi32>
      %28 = arith.cmpi eq, %24, %27 : vector<8x128xi32>
      %cst_19 = arith.constant 0.000000e+00 : f32
      %29 = vector.shape_cast %23 : vector<1x128xf32> to vector<1x128xf32>
      %30 = vector.broadcast %29 : vector<1x128xf32> to vector<8x128xf32>
      %31 = vector.broadcast %cst_19 : f32 to vector<8x128xf32>
      %32 = arith.select %28, %30, %31 : vector<8x128xi1>, vector<8x128xf32>
      %33 = vector.shape_cast %20 : vector<1x128xf32> to vector<1x128xf32>
      %34 = vector.broadcast %33 : vector<1x128xf32> to vector<8x128xf32>
      %35 = arith.select %26, %34, %32 : vector<8x128xi1>, vector<8x128xf32>
      %c0_20 = arith.constant 0 : index
      %c0_21 = arith.constant 0 : index
      %36 = vector.load %arg5[%c0_20, %c0_21] : memref<8x128xf32, #tpu.memory_space<vmem>>, vector<8x128xf32>
      %37 = arith.addf %36, %35 : vector<8x128xf32>
      %c0_22 = arith.constant 0 : index
      %c0_23 = arith.constant 0 : index
      %38 = vector.load %arg5[%c0_22, %c0_23] : memref<8x128xf32, #tpu.memory_space<vmem>>, vector<8x128xf32>
      tpu.vector_store %arg5[%c0_22, %c0_23], %37 {strides = array<i32>} : memref<8x128xf32, #tpu.memory_space<vmem>>, vector<8x128xf32>,
    } else {
    }
    return
  }
  func.func @transform_0(%arg0: i32, %arg1: i32) -> (i32, i32) {
    %c0_i32 = arith.constant 0 : i32
    return %arg0, %arg1 : i32, i32
  }
  func.func @transform_1(%arg0: i32, %arg1: i32) -> (i32, i32) {
    %c0_i32 = arith.constant 0 : i32
    %c0_i32_0 = arith.constant 0 : i32
    return %arg1, %c0_i32 : i32, i32
  }
  func.func @transform_2(%arg0: i32, %arg1: i32) -> (i32, i32) {
    %c0_i32 = arith.constant 0 : i32
    %c0_i32_0 = arith.constant 0 : i32
    return %arg0, %c0_i32 : i32, i32
  }
  func.func @transform_3(%arg0: i32, %arg1: i32) -> (i32, i32) {
    %c0_i32 = arith.constant 0 : i32
    %c0_i32_0 = arith.constant 0 : i32
    %c0_i32_1 = arith.constant 0 : i32
    return %c0_i32, %c0_i32_0 : i32, i32
  }
}

module attributes {stable_mosaic.version = 11 : i64} {
  func.func @_affine_lrelu_kernel(%arg0: i32, %arg1: memref<256x128xf32, #tpu.memory_space<vmem>>, %arg2: memref<1x128xf32, #tpu.memory_space<vmem>>, %arg3: memref<1x128xf32, #tpu.memory_space<vmem>>, %arg4: memref<256x128xf32, #tpu.memory_space<vmem>>) attributes {dimension_semantics = [#tpu.dimension_semantics<parallel>], iteration_bounds = array<i64: 2>, scalar_prefetch = 0 : i64, scratch_operands = 0 : i64, tpu.core_type = #tpu.core_type<tc>, window_params = [{transform_indices = @transform_0, window_bounds = array<i64: 256, 128>}, {pipeline_mode = #tpu.pipeline_mode<synchronous>, transform_indices = @transform_1, window_bounds = array<i64: 1, 128>}, {pipeline_mode = #tpu.pipeline_mode<synchronous>, transform_indices = @transform_2, window_bounds = array<i64: 1, 128>}, {transform_indices = @transform_3, window_bounds = array<i64: 256, 128>}]} {
    %c0 = arith.constant 0 : index
    %c0_0 = arith.constant 0 : index
    %0 = vector.load %arg1[%c0, %c0_0] : memref<256x128xf32, #tpu.memory_space<vmem>>, vector<256x128xf32>
    %c0_1 = arith.constant 0 : index
    %c0_2 = arith.constant 0 : index
    %1 = vector.load %arg2[%c0_1, %c0_2] : memref<1x128xf32, #tpu.memory_space<vmem>>, vector<1x128xf32>
    %2 = vector.broadcast %1 : vector<1x128xf32> to vector<256x128xf32>
    %3 = arith.mulf %0, %2 : vector<256x128xf32>
    %c0_3 = arith.constant 0 : index
    %c0_4 = arith.constant 0 : index
    %4 = vector.load %arg3[%c0_3, %c0_4] : memref<1x128xf32, #tpu.memory_space<vmem>>, vector<1x128xf32>
    %5 = vector.broadcast %4 : vector<1x128xf32> to vector<256x128xf32>
    %6 = arith.addf %3, %5 : vector<256x128xf32>
    %cst = arith.constant 0.000000e+00 : f32
    %7 = vector.broadcast %cst : f32 to vector<256x128xf32>
    %8 = arith.cmpf oge, %6, %7 : vector<256x128xf32>
    %cst_5 = arith.constant 2.000000e-01 : f32
    %9 = vector.broadcast %cst_5 : f32 to vector<256x128xf32>
    %10 = arith.mulf %9, %6 : vector<256x128xf32>
    %11 = arith.select %8, %6, %10 : vector<256x128xi1>, vector<256x128xf32>
    %c0_6 = arith.constant 0 : index
    %c0_7 = arith.constant 0 : index
    %12 = vector.load %arg4[%c0_6, %c0_7] : memref<256x128xf32, #tpu.memory_space<vmem>>, vector<256x128xf32>
    tpu.vector_store %arg4[%c0_6, %c0_7], %11 {strides = array<i32>} : memref<256x128xf32, #tpu.memory_space<vmem>>, vector<256x128xf32>,
    return
  }
  func.func @transform_0(%arg0: i32) -> (i32, i32) {
    %c0_i32 = arith.constant 0 : i32
    %c0_i32_0 = arith.constant 0 : i32
    return %arg0, %c0_i32 : i32, i32
  }
  func.func @transform_1(%arg0: i32) -> (i32, i32) {
    %c0_i32 = arith.constant 0 : i32
    %c0_i32_0 = arith.constant 0 : i32
    %c0_i32_1 = arith.constant 0 : i32
    return %c0_i32, %c0_i32_0 : i32, i32
  }
  func.func @transform_2(%arg0: i32) -> (i32, i32) {
    %c0_i32 = arith.constant 0 : i32
    %c0_i32_0 = arith.constant 0 : i32
    %c0_i32_1 = arith.constant 0 : i32
    return %c0_i32, %c0_i32_0 : i32, i32
  }
  func.func @transform_3(%arg0: i32) -> (i32, i32) {
    %c0_i32 = arith.constant 0 : i32
    %c0_i32_0 = arith.constant 0 : i32
    return %arg0, %c0_i32 : i32, i32
  }
}

module attributes {stable_mosaic.version = 11 : i64} {
  func.func @_affine_lrelu_kernel(%arg0: i32, %arg1: memref<128x128xf32, #tpu.memory_space<vmem>>, %arg2: memref<1x128xf32, #tpu.memory_space<vmem>>, %arg3: memref<1x128xf32, #tpu.memory_space<vmem>>, %arg4: memref<128x128xf32, #tpu.memory_space<vmem>>) attributes {dimension_semantics = [#tpu.dimension_semantics<parallel>], iteration_bounds = array<i64: 1>, scalar_prefetch = 0 : i64, scratch_operands = 0 : i64, tpu.core_type = #tpu.core_type<tc>, window_params = [{transform_indices = @transform_0, window_bounds = array<i64: 128, 128>}, {pipeline_mode = #tpu.pipeline_mode<synchronous>, transform_indices = @transform_1, window_bounds = array<i64: 1, 128>}, {pipeline_mode = #tpu.pipeline_mode<synchronous>, transform_indices = @transform_2, window_bounds = array<i64: 1, 128>}, {transform_indices = @transform_3, window_bounds = array<i64: 128, 128>}]} {
    %c0 = arith.constant 0 : index
    %c0_0 = arith.constant 0 : index
    %0 = vector.load %arg1[%c0, %c0_0] : memref<128x128xf32, #tpu.memory_space<vmem>>, vector<128x128xf32>
    %c0_1 = arith.constant 0 : index
    %c0_2 = arith.constant 0 : index
    %1 = vector.load %arg2[%c0_1, %c0_2] : memref<1x128xf32, #tpu.memory_space<vmem>>, vector<1x128xf32>
    %2 = vector.broadcast %1 : vector<1x128xf32> to vector<128x128xf32>
    %3 = arith.mulf %0, %2 : vector<128x128xf32>
    %c0_3 = arith.constant 0 : index
    %c0_4 = arith.constant 0 : index
    %4 = vector.load %arg3[%c0_3, %c0_4] : memref<1x128xf32, #tpu.memory_space<vmem>>, vector<1x128xf32>
    %5 = vector.broadcast %4 : vector<1x128xf32> to vector<128x128xf32>
    %6 = arith.addf %3, %5 : vector<128x128xf32>
    %cst = arith.constant 0.000000e+00 : f32
    %7 = vector.broadcast %cst : f32 to vector<128x128xf32>
    %8 = arith.cmpf oge, %6, %7 : vector<128x128xf32>
    %cst_5 = arith.constant 2.000000e-01 : f32
    %9 = vector.broadcast %cst_5 : f32 to vector<128x128xf32>
    %10 = arith.mulf %9, %6 : vector<128x128xf32>
    %11 = arith.select %8, %6, %10 : vector<128x128xi1>, vector<128x128xf32>
    %c0_6 = arith.constant 0 : index
    %c0_7 = arith.constant 0 : index
    %12 = vector.load %arg4[%c0_6, %c0_7] : memref<128x128xf32, #tpu.memory_space<vmem>>, vector<128x128xf32>
    tpu.vector_store %arg4[%c0_6, %c0_7], %11 {strides = array<i32>} : memref<128x128xf32, #tpu.memory_space<vmem>>, vector<128x128xf32>,
    return
  }
  func.func @transform_0(%arg0: i32) -> (i32, i32) {
    %c0_i32 = arith.constant 0 : i32
    %c0_i32_0 = arith.constant 0 : i32
    return %arg0, %c0_i32 : i32, i32
  }
  func.func @transform_1(%arg0: i32) -> (i32, i32) {
    %c0_i32 = arith.constant 0 : i32
    %c0_i32_0 = arith.constant 0 : i32
    %c0_i32_1 = arith.constant 0 : i32
    return %c0_i32, %c0_i32_0 : i32, i32
  }
  func.func @transform_2(%arg0: i32) -> (i32, i32) {
    %c0_i32 = arith.constant 0 : i32
    %c0_i32_0 = arith.constant 0 : i32
    %c0_i32_1 = arith.constant 0 : i32
    return %c0_i32, %c0_i32_0 : i32, i32
  }
  func.func @transform_3(%arg0: i32) -> (i32, i32) {
    %c0_i32 = arith.constant 0 : i32
    %c0_i32_0 = arith.constant 0 : i32
    return %arg0, %c0_i32 : i32, i32
  }
}

module attributes {stable_mosaic.version = 11 : i64} {
  func.func @_conv_bn_kernel(%arg0: i32, %arg1: i32, %arg2: memref<128x512xbf16, #tpu.memory_space<vmem>>, %arg3: memref<512x128xbf16, #tpu.memory_space<vmem>>, %arg4: memref<128x128xf32, #tpu.memory_space<vmem>>, %arg5: memref<8x128xf32, #tpu.memory_space<vmem>>, %arg6: memref<128x128xf32, #tpu.memory_space<vmem>>) attributes {dimension_semantics = [#tpu.dimension_semantics<arbitrary>, #tpu.dimension_semantics<arbitrary>], iteration_bounds = array<i64: 1, 4>, scalar_prefetch = 0 : i64, scratch_operands = 1 : i64, tpu.core_type = #tpu.core_type<tc>, window_params = [{transform_indices = @transform_0, window_bounds = array<i64: 128, 512>}, {transform_indices = @transform_1, window_bounds = array<i64: 512, 128>}, {transform_indices = @transform_2, window_bounds = array<i64: 128, 128>}, {pipeline_mode = #tpu.pipeline_mode<synchronous>, transform_indices = @transform_3, window_bounds = array<i64: 8, 128>}]} {
    %c0_i32 = arith.constant 0 : i32
    %0 = arith.cmpi eq, %arg0, %c0_i32 : i32
    %c0_i32_0 = arith.constant 0 : i32
    %1 = arith.cmpi eq, %arg1, %c0_i32_0 : i32
    %2 = arith.andi %0, %1 : i1
    %3 = arith.extui %2 : i1 to i32
    %c0_i32_1 = arith.constant 0 : i32
    %4 = arith.cmpi ne, %3, %c0_i32_1 : i32
    scf.if %4 {
      %cst_12 = arith.constant 0.000000e+00 : f32
      %17 = vector.broadcast %cst_12 : f32 to vector<8x128xf32>
      %c0_13 = arith.constant 0 : index
      %c0_14 = arith.constant 0 : index
      %18 = vector.load %arg5[%c0_13, %c0_14] : memref<8x128xf32, #tpu.memory_space<vmem>>, vector<8x128xf32>
      tpu.vector_store %arg5[%c0_13, %c0_14], %17 {strides = array<i32>} : memref<8x128xf32, #tpu.memory_space<vmem>>, vector<8x128xf32>,
    } else {
    }
    %c0_i32_2 = arith.constant 0 : i32
    %5 = arith.cmpi eq, %arg1, %c0_i32_2 : i32
    %6 = arith.extui %5 : i1 to i32
    %c0_i32_3 = arith.constant 0 : i32
    %7 = arith.cmpi ne, %6, %c0_i32_3 : i32
    scf.if %7 {
      %cst_12 = arith.constant 0.000000e+00 : f32
      %17 = vector.broadcast %cst_12 : f32 to vector<128x128xf32>
      %c0_13 = arith.constant 0 : index
      %c0_14 = arith.constant 0 : index
      %18 = vector.load %arg6[%c0_13, %c0_14] : memref<128x128xf32, #tpu.memory_space<vmem>>, vector<128x128xf32>
      tpu.vector_store %arg6[%c0_13, %c0_14], %17 {strides = array<i32>} : memref<128x128xf32, #tpu.memory_space<vmem>>, vector<128x128xf32>,
    } else {
    }
    %c0 = arith.constant 0 : index
    %c0_4 = arith.constant 0 : index
    %8 = vector.load %arg6[%c0, %c0_4] : memref<128x128xf32, #tpu.memory_space<vmem>>, vector<128x128xf32>
    %c0_5 = arith.constant 0 : index
    %c0_6 = arith.constant 0 : index
    %9 = vector.load %arg2[%c0_5, %c0_6] : memref<128x512xbf16, #tpu.memory_space<vmem>>, vector<128x512xbf16>
    %c0_7 = arith.constant 0 : index
    %c0_8 = arith.constant 0 : index
    %10 = vector.load %arg3[%c0_7, %c0_8] : memref<512x128xbf16, #tpu.memory_space<vmem>>, vector<512x128xbf16>
    %cst = arith.constant dense<0.000000e+00> : vector<128x128xf32>
    %11 = tpu.matmul %9, %10, %cst {dimension_numbers = #tpu.dot_dimension_numbers<[1], [0], [0], [1], [0, 0, 1, 1], [], []>} : vector<128x512xbf16>, vector<512x128xbf16>, vector<128x128xf32> -> vector<128x128xf32>
    %12 = arith.addf %8, %11 : vector<128x128xf32>
    %c0_9 = arith.constant 0 : index
    %c0_10 = arith.constant 0 : index
    %13 = vector.load %arg6[%c0_9, %c0_10] : memref<128x128xf32, #tpu.memory_space<vmem>>, vector<128x128xf32>
    tpu.vector_store %arg6[%c0_9, %c0_10], %12 {strides = array<i32>} : memref<128x128xf32, #tpu.memory_space<vmem>>, vector<128x128xf32>,
    %c3_i32 = arith.constant 3 : i32
    %14 = arith.cmpi eq, %arg1, %c3_i32 : i32
    %15 = arith.extui %14 : i1 to i32
    %c0_i32_11 = arith.constant 0 : i32
    %16 = arith.cmpi ne, %15, %c0_i32_11 : i32
    scf.if %16 {
      %c0_12 = arith.constant 0 : index
      %c0_13 = arith.constant 0 : index
      %17 = vector.load %arg6[%c0_12, %c0_13] : memref<128x128xf32, #tpu.memory_space<vmem>>, vector<128x128xf32>
      %c0_14 = arith.constant 0 : index
      %c0_15 = arith.constant 0 : index
      %18 = vector.load %arg4[%c0_14, %c0_15] : memref<128x128xf32, #tpu.memory_space<vmem>>, vector<128x128xf32>
      tpu.vector_store %arg4[%c0_14, %c0_15], %17 {strides = array<i32>} : memref<128x128xf32, #tpu.memory_space<vmem>>, vector<128x128xf32>,
      %cst_16 = arith.constant dense<0.000000e+00> : vector<128xf32>
      %19 = vector.multi_reduction <add>, %17, %cst_16 [0] : vector<128x128xf32> to vector<128xf32>
      %20 = vector.shape_cast %19 : vector<128xf32> to vector<1x128xf32>
      %21 = arith.mulf %17, %17 : vector<128x128xf32>
      %cst_17 = arith.constant dense<0.000000e+00> : vector<128xf32>
      %22 = vector.multi_reduction <add>, %21, %cst_17 [0] : vector<128x128xf32> to vector<128xf32>
      %23 = vector.shape_cast %22 : vector<128xf32> to vector<1x128xf32>
      %24 = tpu.iota {dimensions = array<i32: 0>} : vector<8x128xi32>
      %c0_i32_18 = arith.constant 0 : i32
      %25 = vector.broadcast %c0_i32_18 : i32 to vector<8x128xi32>
      %26 = arith.cmpi eq, %24, %25 : vector<8x128xi32>
      %c1_i32 = arith.constant 1 : i32
      %27 = vector.broadcast %c1_i32 : i32 to vector<8x128xi32>
      %28 = arith.cmpi eq, %24, %27 : vector<8x128xi32>
      %cst_19 = arith.constant 0.000000e+00 : f32
      %29 = vector.shape_cast %23 : vector<1x128xf32> to vector<1x128xf32>
      %30 = vector.broadcast %29 : vector<1x128xf32> to vector<8x128xf32>
      %31 = vector.broadcast %cst_19 : f32 to vector<8x128xf32>
      %32 = arith.select %28, %30, %31 : vector<8x128xi1>, vector<8x128xf32>
      %33 = vector.shape_cast %20 : vector<1x128xf32> to vector<1x128xf32>
      %34 = vector.broadcast %33 : vector<1x128xf32> to vector<8x128xf32>
      %35 = arith.select %26, %34, %32 : vector<8x128xi1>, vector<8x128xf32>
      %c0_20 = arith.constant 0 : index
      %c0_21 = arith.constant 0 : index
      %36 = vector.load %arg5[%c0_20, %c0_21] : memref<8x128xf32, #tpu.memory_space<vmem>>, vector<8x128xf32>
      %37 = arith.addf %36, %35 : vector<8x128xf32>
      %c0_22 = arith.constant 0 : index
      %c0_23 = arith.constant 0 : index
      %38 = vector.load %arg5[%c0_22, %c0_23] : memref<8x128xf32, #tpu.memory_space<vmem>>, vector<8x128xf32>
      tpu.vector_store %arg5[%c0_22, %c0_23], %37 {strides = array<i32>} : memref<8x128xf32, #tpu.memory_space<vmem>>, vector<8x128xf32>,
    } else {
    }
    return
  }
  func.func @transform_0(%arg0: i32, %arg1: i32) -> (i32, i32) {
    %c0_i32 = arith.constant 0 : i32
    return %arg0, %arg1 : i32, i32
  }
  func.func @transform_1(%arg0: i32, %arg1: i32) -> (i32, i32) {
    %c0_i32 = arith.constant 0 : i32
    %c0_i32_0 = arith.constant 0 : i32
    return %arg1, %c0_i32 : i32, i32
  }
  func.func @transform_2(%arg0: i32, %arg1: i32) -> (i32, i32) {
    %c0_i32 = arith.constant 0 : i32
    %c0_i32_0 = arith.constant 0 : i32
    return %arg0, %c0_i32 : i32, i32
  }
  func.func @transform_3(%arg0: i32, %arg1: i32) -> (i32, i32) {
    %c0_i32 = arith.constant 0 : i32
    %c0_i32_0 = arith.constant 0 : i32
    %c0_i32_1 = arith.constant 0 : i32
    return %c0_i32, %c0_i32_0 : i32, i32
  }
}

module attributes {stable_mosaic.version = 11 : i64} {
  func.func @_conv_bn_kernel(%arg0: i32, %arg1: i32, %arg2: memref<32x512xbf16, #tpu.memory_space<vmem>>, %arg3: memref<512x128xbf16, #tpu.memory_space<vmem>>, %arg4: memref<32x128xf32, #tpu.memory_space<vmem>>, %arg5: memref<8x128xf32, #tpu.memory_space<vmem>>, %arg6: memref<32x128xf32, #tpu.memory_space<vmem>>) attributes {dimension_semantics = [#tpu.dimension_semantics<arbitrary>, #tpu.dimension_semantics<arbitrary>], iteration_bounds = array<i64: 1, 4>, scalar_prefetch = 0 : i64, scratch_operands = 1 : i64, tpu.core_type = #tpu.core_type<tc>, window_params = [{transform_indices = @transform_0, window_bounds = array<i64: 32, 512>}, {transform_indices = @transform_1, window_bounds = array<i64: 512, 128>}, {transform_indices = @transform_2, window_bounds = array<i64: 32, 128>}, {pipeline_mode = #tpu.pipeline_mode<synchronous>, transform_indices = @transform_3, window_bounds = array<i64: 8, 128>}]} {
    %c0_i32 = arith.constant 0 : i32
    %0 = arith.cmpi eq, %arg0, %c0_i32 : i32
    %c0_i32_0 = arith.constant 0 : i32
    %1 = arith.cmpi eq, %arg1, %c0_i32_0 : i32
    %2 = arith.andi %0, %1 : i1
    %3 = arith.extui %2 : i1 to i32
    %c0_i32_1 = arith.constant 0 : i32
    %4 = arith.cmpi ne, %3, %c0_i32_1 : i32
    scf.if %4 {
      %cst_12 = arith.constant 0.000000e+00 : f32
      %17 = vector.broadcast %cst_12 : f32 to vector<8x128xf32>
      %c0_13 = arith.constant 0 : index
      %c0_14 = arith.constant 0 : index
      %18 = vector.load %arg5[%c0_13, %c0_14] : memref<8x128xf32, #tpu.memory_space<vmem>>, vector<8x128xf32>
      tpu.vector_store %arg5[%c0_13, %c0_14], %17 {strides = array<i32>} : memref<8x128xf32, #tpu.memory_space<vmem>>, vector<8x128xf32>,
    } else {
    }
    %c0_i32_2 = arith.constant 0 : i32
    %5 = arith.cmpi eq, %arg1, %c0_i32_2 : i32
    %6 = arith.extui %5 : i1 to i32
    %c0_i32_3 = arith.constant 0 : i32
    %7 = arith.cmpi ne, %6, %c0_i32_3 : i32
    scf.if %7 {
      %cst_12 = arith.constant 0.000000e+00 : f32
      %17 = vector.broadcast %cst_12 : f32 to vector<32x128xf32>
      %c0_13 = arith.constant 0 : index
      %c0_14 = arith.constant 0 : index
      %18 = vector.load %arg6[%c0_13, %c0_14] : memref<32x128xf32, #tpu.memory_space<vmem>>, vector<32x128xf32>
      tpu.vector_store %arg6[%c0_13, %c0_14], %17 {strides = array<i32>} : memref<32x128xf32, #tpu.memory_space<vmem>>, vector<32x128xf32>,
    } else {
    }
    %c0 = arith.constant 0 : index
    %c0_4 = arith.constant 0 : index
    %8 = vector.load %arg6[%c0, %c0_4] : memref<32x128xf32, #tpu.memory_space<vmem>>, vector<32x128xf32>
    %c0_5 = arith.constant 0 : index
    %c0_6 = arith.constant 0 : index
    %9 = vector.load %arg2[%c0_5, %c0_6] : memref<32x512xbf16, #tpu.memory_space<vmem>>, vector<32x512xbf16>
    %c0_7 = arith.constant 0 : index
    %c0_8 = arith.constant 0 : index
    %10 = vector.load %arg3[%c0_7, %c0_8] : memref<512x128xbf16, #tpu.memory_space<vmem>>, vector<512x128xbf16>
    %cst = arith.constant dense<0.000000e+00> : vector<32x128xf32>
    %11 = tpu.matmul %9, %10, %cst {dimension_numbers = #tpu.dot_dimension_numbers<[1], [0], [0], [1], [0, 0, 1, 1], [], []>} : vector<32x512xbf16>, vector<512x128xbf16>, vector<32x128xf32> -> vector<32x128xf32>
    %12 = arith.addf %8, %11 : vector<32x128xf32>
    %c0_9 = arith.constant 0 : index
    %c0_10 = arith.constant 0 : index
    %13 = vector.load %arg6[%c0_9, %c0_10] : memref<32x128xf32, #tpu.memory_space<vmem>>, vector<32x128xf32>
    tpu.vector_store %arg6[%c0_9, %c0_10], %12 {strides = array<i32>} : memref<32x128xf32, #tpu.memory_space<vmem>>, vector<32x128xf32>,
    %c3_i32 = arith.constant 3 : i32
    %14 = arith.cmpi eq, %arg1, %c3_i32 : i32
    %15 = arith.extui %14 : i1 to i32
    %c0_i32_11 = arith.constant 0 : i32
    %16 = arith.cmpi ne, %15, %c0_i32_11 : i32
    scf.if %16 {
      %c0_12 = arith.constant 0 : index
      %c0_13 = arith.constant 0 : index
      %17 = vector.load %arg6[%c0_12, %c0_13] : memref<32x128xf32, #tpu.memory_space<vmem>>, vector<32x128xf32>
      %c0_14 = arith.constant 0 : index
      %c0_15 = arith.constant 0 : index
      %18 = vector.load %arg4[%c0_14, %c0_15] : memref<32x128xf32, #tpu.memory_space<vmem>>, vector<32x128xf32>
      tpu.vector_store %arg4[%c0_14, %c0_15], %17 {strides = array<i32>} : memref<32x128xf32, #tpu.memory_space<vmem>>, vector<32x128xf32>,
      %cst_16 = arith.constant dense<0.000000e+00> : vector<128xf32>
      %19 = vector.multi_reduction <add>, %17, %cst_16 [0] : vector<32x128xf32> to vector<128xf32>
      %20 = vector.shape_cast %19 : vector<128xf32> to vector<1x128xf32>
      %21 = arith.mulf %17, %17 : vector<32x128xf32>
      %cst_17 = arith.constant dense<0.000000e+00> : vector<128xf32>
      %22 = vector.multi_reduction <add>, %21, %cst_17 [0] : vector<32x128xf32> to vector<128xf32>
      %23 = vector.shape_cast %22 : vector<128xf32> to vector<1x128xf32>
      %24 = tpu.iota {dimensions = array<i32: 0>} : vector<8x128xi32>
      %c0_i32_18 = arith.constant 0 : i32
      %25 = vector.broadcast %c0_i32_18 : i32 to vector<8x128xi32>
      %26 = arith.cmpi eq, %24, %25 : vector<8x128xi32>
      %c1_i32 = arith.constant 1 : i32
      %27 = vector.broadcast %c1_i32 : i32 to vector<8x128xi32>
      %28 = arith.cmpi eq, %24, %27 : vector<8x128xi32>
      %cst_19 = arith.constant 0.000000e+00 : f32
      %29 = vector.shape_cast %23 : vector<1x128xf32> to vector<1x128xf32>
      %30 = vector.broadcast %29 : vector<1x128xf32> to vector<8x128xf32>
      %31 = vector.broadcast %cst_19 : f32 to vector<8x128xf32>
      %32 = arith.select %28, %30, %31 : vector<8x128xi1>, vector<8x128xf32>
      %33 = vector.shape_cast %20 : vector<1x128xf32> to vector<1x128xf32>
      %34 = vector.broadcast %33 : vector<1x128xf32> to vector<8x128xf32>
      %35 = arith.select %26, %34, %32 : vector<8x128xi1>, vector<8x128xf32>
      %c0_20 = arith.constant 0 : index
      %c0_21 = arith.constant 0 : index
      %36 = vector.load %arg5[%c0_20, %c0_21] : memref<8x128xf32, #tpu.memory_space<vmem>>, vector<8x128xf32>
      %37 = arith.addf %36, %35 : vector<8x128xf32>
      %c0_22 = arith.constant 0 : index
      %c0_23 = arith.constant 0 : index
      %38 = vector.load %arg5[%c0_22, %c0_23] : memref<8x128xf32, #tpu.memory_space<vmem>>, vector<8x128xf32>
      tpu.vector_store %arg5[%c0_22, %c0_23], %37 {strides = array<i32>} : memref<8x128xf32, #tpu.memory_space<vmem>>, vector<8x128xf32>,
    } else {
    }
    return
  }
  func.func @transform_0(%arg0: i32, %arg1: i32) -> (i32, i32) {
    %c0_i32 = arith.constant 0 : i32
    return %arg0, %arg1 : i32, i32
  }
  func.func @transform_1(%arg0: i32, %arg1: i32) -> (i32, i32) {
    %c0_i32 = arith.constant 0 : i32
    %c0_i32_0 = arith.constant 0 : i32
    return %arg1, %c0_i32 : i32, i32
  }
  func.func @transform_2(%arg0: i32, %arg1: i32) -> (i32, i32) {
    %c0_i32 = arith.constant 0 : i32
    %c0_i32_0 = arith.constant 0 : i32
    return %arg0, %c0_i32 : i32, i32
  }
  func.func @transform_3(%arg0: i32, %arg1: i32) -> (i32, i32) {
    %c0_i32 = arith.constant 0 : i32
    %c0_i32_0 = arith.constant 0 : i32
    %c0_i32_1 = arith.constant 0 : i32
    return %c0_i32, %c0_i32_0 : i32, i32
  }
}

module attributes {stable_mosaic.version = 11 : i64} {
  func.func @_affine_lrelu_kernel(%arg0: i32, %arg1: memref<32x128xf32, #tpu.memory_space<vmem>>, %arg2: memref<1x128xf32, #tpu.memory_space<vmem>>, %arg3: memref<1x128xf32, #tpu.memory_space<vmem>>, %arg4: memref<32x128xf32, #tpu.memory_space<vmem>>) attributes {dimension_semantics = [#tpu.dimension_semantics<parallel>], iteration_bounds = array<i64: 1>, scalar_prefetch = 0 : i64, scratch_operands = 0 : i64, tpu.core_type = #tpu.core_type<tc>, window_params = [{transform_indices = @transform_0, window_bounds = array<i64: 32, 128>}, {pipeline_mode = #tpu.pipeline_mode<synchronous>, transform_indices = @transform_1, window_bounds = array<i64: 1, 128>}, {pipeline_mode = #tpu.pipeline_mode<synchronous>, transform_indices = @transform_2, window_bounds = array<i64: 1, 128>}, {transform_indices = @transform_3, window_bounds = array<i64: 32, 128>}]} {
    %c0 = arith.constant 0 : index
    %c0_0 = arith.constant 0 : index
    %0 = vector.load %arg1[%c0, %c0_0] : memref<32x128xf32, #tpu.memory_space<vmem>>, vector<32x128xf32>
    %c0_1 = arith.constant 0 : index
    %c0_2 = arith.constant 0 : index
    %1 = vector.load %arg2[%c0_1, %c0_2] : memref<1x128xf32, #tpu.memory_space<vmem>>, vector<1x128xf32>
    %2 = vector.broadcast %1 : vector<1x128xf32> to vector<32x128xf32>
    %3 = arith.mulf %0, %2 : vector<32x128xf32>
    %c0_3 = arith.constant 0 : index
    %c0_4 = arith.constant 0 : index
    %4 = vector.load %arg3[%c0_3, %c0_4] : memref<1x128xf32, #tpu.memory_space<vmem>>, vector<1x128xf32>
    %5 = vector.broadcast %4 : vector<1x128xf32> to vector<32x128xf32>
    %6 = arith.addf %3, %5 : vector<32x128xf32>
    %cst = arith.constant 0.000000e+00 : f32
    %7 = vector.broadcast %cst : f32 to vector<32x128xf32>
    %8 = arith.cmpf oge, %6, %7 : vector<32x128xf32>
    %cst_5 = arith.constant 2.000000e-01 : f32
    %9 = vector.broadcast %cst_5 : f32 to vector<32x128xf32>
    %10 = arith.mulf %9, %6 : vector<32x128xf32>
    %11 = arith.select %8, %6, %10 : vector<32x128xi1>, vector<32x128xf32>
    %c0_6 = arith.constant 0 : index
    %c0_7 = arith.constant 0 : index
    %12 = vector.load %arg4[%c0_6, %c0_7] : memref<32x128xf32, #tpu.memory_space<vmem>>, vector<32x128xf32>
    tpu.vector_store %arg4[%c0_6, %c0_7], %11 {strides = array<i32>} : memref<32x128xf32, #tpu.memory_space<vmem>>, vector<32x128xf32>,
    return
  }
  func.func @transform_0(%arg0: i32) -> (i32, i32) {
    %c0_i32 = arith.constant 0 : i32
    %c0_i32_0 = arith.constant 0 : i32
    return %arg0, %c0_i32 : i32, i32
  }
  func.func @transform_1(%arg0: i32) -> (i32, i32) {
    %c0_i32 = arith.constant 0 : i32
    %c0_i32_0 = arith.constant 0 : i32
    %c0_i32_1 = arith.constant 0 : i32
    return %c0_i32, %c0_i32_0 : i32, i32
  }
  func.func @transform_2(%arg0: i32) -> (i32, i32) {
    %c0_i32 = arith.constant 0 : i32
    %c0_i32_0 = arith.constant 0 : i32
    %c0_i32_1 = arith.constant 0 : i32
    return %c0_i32, %c0_i32_0 : i32, i32
  }
  func.func @transform_3(%arg0: i32) -> (i32, i32) {
    %c0_i32 = arith.constant 0 : i32
    %c0_i32_0 = arith.constant 0 : i32
    return %arg0, %c0_i32 : i32, i32
  }
}

module attributes {stable_mosaic.version = 11 : i64} {
  func.func @_matmul_bias_kernel(%arg0: i32, %arg1: i32, %arg2: memref<8x512xbf16, #tpu.memory_space<vmem>>, %arg3: memref<512x128xbf16, #tpu.memory_space<vmem>>, %arg4: memref<1x128xf32, #tpu.memory_space<vmem>>, %arg5: memref<8x128xf32, #tpu.memory_space<vmem>>, %arg6: memref<8x128xf32, #tpu.memory_space<vmem>>) attributes {dimension_semantics = [#tpu.dimension_semantics<parallel>, #tpu.dimension_semantics<arbitrary>], iteration_bounds = array<i64: 1, 4>, scalar_prefetch = 0 : i64, scratch_operands = 1 : i64, tpu.core_type = #tpu.core_type<tc>, window_params = [{transform_indices = @transform_0, window_bounds = array<i64: 8, 512>}, {transform_indices = @transform_1, window_bounds = array<i64: 512, 128>}, {pipeline_mode = #tpu.pipeline_mode<synchronous>, transform_indices = @transform_2, window_bounds = array<i64: 1, 128>}, {transform_indices = @transform_3, window_bounds = array<i64: 8, 128>}]} {
    %c0_i32 = arith.constant 0 : i32
    %0 = arith.cmpi eq, %arg1, %c0_i32 : i32
    %1 = arith.extui %0 : i1 to i32
    %c0_i32_0 = arith.constant 0 : i32
    %2 = arith.cmpi ne, %1, %c0_i32_0 : i32
    scf.if %2 {
      %cst_9 = arith.constant 0.000000e+00 : f32
      %12 = vector.broadcast %cst_9 : f32 to vector<8x128xf32>
      %c0_10 = arith.constant 0 : index
      %c0_11 = arith.constant 0 : index
      %13 = vector.load %arg6[%c0_10, %c0_11] : memref<8x128xf32, #tpu.memory_space<vmem>>, vector<8x128xf32>
      tpu.vector_store %arg6[%c0_10, %c0_11], %12 {strides = array<i32>} : memref<8x128xf32, #tpu.memory_space<vmem>>, vector<8x128xf32>,
    } else {
    }
    %c0 = arith.constant 0 : index
    %c0_1 = arith.constant 0 : index
    %3 = vector.load %arg6[%c0, %c0_1] : memref<8x128xf32, #tpu.memory_space<vmem>>, vector<8x128xf32>
    %c0_2 = arith.constant 0 : index
    %c0_3 = arith.constant 0 : index
    %4 = vector.load %arg2[%c0_2, %c0_3] : memref<8x512xbf16, #tpu.memory_space<vmem>>, vector<8x512xbf16>
    %c0_4 = arith.constant 0 : index
    %c0_5 = arith.constant 0 : index
    %5 = vector.load %arg3[%c0_4, %c0_5] : memref<512x128xbf16, #tpu.memory_space<vmem>>, vector<512x128xbf16>
    %cst = arith.constant dense<0.000000e+00> : vector<8x128xf32>
    %6 = tpu.matmul %4, %5, %cst {dimension_numbers = #tpu.dot_dimension_numbers<[1], [0], [0], [1], [0, 0, 1, 1], [], []>} : vector<8x512xbf16>, vector<512x128xbf16>, vector<8x128xf32> -> vector<8x128xf32>
    %7 = arith.addf %3, %6 : vector<8x128xf32>
    %c0_6 = arith.constant 0 : index
    %c0_7 = arith.constant 0 : index
    %8 = vector.load %arg6[%c0_6, %c0_7] : memref<8x128xf32, #tpu.memory_space<vmem>>, vector<8x128xf32>
    tpu.vector_store %arg6[%c0_6, %c0_7], %7 {strides = array<i32>} : memref<8x128xf32, #tpu.memory_space<vmem>>, vector<8x128xf32>,
    %c3_i32 = arith.constant 3 : i32
    %9 = arith.cmpi eq, %arg1, %c3_i32 : i32
    %10 = arith.extui %9 : i1 to i32
    %c0_i32_8 = arith.constant 0 : i32
    %11 = arith.cmpi ne, %10, %c0_i32_8 : i32
    scf.if %11 {
      %c0_9 = arith.constant 0 : index
      %c0_10 = arith.constant 0 : index
      %12 = vector.load %arg6[%c0_9, %c0_10] : memref<8x128xf32, #tpu.memory_space<vmem>>, vector<8x128xf32>
      %c0_11 = arith.constant 0 : index
      %c0_12 = arith.constant 0 : index
      %13 = vector.load %arg4[%c0_11, %c0_12] : memref<1x128xf32, #tpu.memory_space<vmem>>, vector<1x128xf32>
      %14 = vector.broadcast %13 : vector<1x128xf32> to vector<8x128xf32>
      %15 = arith.addf %12, %14 : vector<8x128xf32>
      %c0_13 = arith.constant 0 : index
      %c0_14 = arith.constant 0 : index
      %16 = vector.load %arg5[%c0_13, %c0_14] : memref<8x128xf32, #tpu.memory_space<vmem>>, vector<8x128xf32>
      tpu.vector_store %arg5[%c0_13, %c0_14], %15 {strides = array<i32>} : memref<8x128xf32, #tpu.memory_space<vmem>>, vector<8x128xf32>,
    } else {
    }
    return
  }
  func.func @transform_0(%arg0: i32, %arg1: i32) -> (i32, i32) {
    %c0_i32 = arith.constant 0 : i32
    return %arg0, %arg1 : i32, i32
  }
  func.func @transform_1(%arg0: i32, %arg1: i32) -> (i32, i32) {
    %c0_i32 = arith.constant 0 : i32
    %c0_i32_0 = arith.constant 0 : i32
    return %arg1, %c0_i32 : i32, i32
  }
  func.func @transform_2(%arg0: i32, %arg1: i32) -> (i32, i32) {
    %c0_i32 = arith.constant 0 : i32
    %c0_i32_0 = arith.constant 0 : i32
    %c0_i32_1 = arith.constant 0 : i32
    return %c0_i32, %c0_i32_0 : i32, i32
  }
  func.func @transform_3(%arg0: i32, %arg1: i32) -> (i32, i32) {
    %c0_i32 = arith.constant 0 : i32
    %c0_i32_0 = arith.constant 0 : i32
    return %arg0, %c0_i32 : i32, i32
  }
}

</mosaic_0001>

<bundles_post_ra>
// kernel: discriminator_forward.10
= control target key start
LH: loop header
LB: loop body
LE: loop exit
PB: predicated region body
PF: predicated region fallthrough
CT: control target
= control target key end

     0   :  { %s517_s12 = smov 0   ;;  %s679_s0 = inlined_call_operand.vmem [shape: f32[2048,128], index: 0, kind: input, shape index: {}]   ;;  %s680_s1 = inlined_call_operand.vmem [shape: f32[1,128], index: 1, kind: input, shape index: {}]   ;;  %s681_s2 = inlined_call_operand.vmem [shape: f32[1,128], index: 2, kind: input, shape index: {}]   ;;  %s682_s3 = inlined_call_operand.vmem [shape: f32[2048,128], index: 3, kind: output, shape index: {}]  }
   0x1 LB: > { %s468_s13 = sadd.s32 4294967295, %s495_s12   ;;  %p472_p0 = scmp.ge.s32.totalorder %s495_s12, 1  ;;  %s495_s12 = sphi %s517_s12, %s13_s12  }
   0x2   : > { %p138_p1 = scmp.lt.s32.totalorder %s495_s12, 9 }
   0x4   : > { %p139_p2 = pnand %p472_p0, %p138_p1 }
   0x5   : > { %s473_s14 = sshll.u32 (!%p139_p2), %s468_s13, 5  ;;  %v531_v0 = vld [vmem:[%s680_s1] ss:$0 sm:$0xff] (!%p139_p2) }
   0x6   : > { %142 = sbr.rel (%p139_p2) target bundleno = 62 (0x3e), region = 32  ;;  %p163_p3 = scmp.lt.s32.totalorder (!%p139_p2), %s473_s14, 255  ;;  %v541_v1 = vld [vmem:[%s681_s2] ss:$0 sm:$0xff] (!%p139_p2) }
   0xd   : > { %s684_s14 = smov (!%p163_p3, %s473_s14), 255 }
   0xe   : > { %s474_s15 = sshll.u32 %s684_s14, 3 }
   0xf   : > { %s536_s20 = scalar_lea.vmem %s679_s0, %s474_s15  ;;  %s569_s25 = scalar_lea.vmem %s682_s3, %s474_s15 }
  0x10   : > { %v174_v2 = vld [vmem:[%s536_s20] sm:$0xff]  ;;  %v175_v3 = vld [vmem:[%s536_s20 + $0x8] sm:$0xff]  ;;  %v176_v4 = vld [vmem:[%s536_s20 + $0x10] sm:$0xff] }
  0x11   : > { %v213_v5 = vmul.f32 %v531_v0, %v174_v2  ;;  %v214_v6 = vmul.f32 %v531_v0, %v175_v3  ;;  %v215_v7 = vmul.f32 %v531_v0, %v176_v4  ;;  %v177_v8 = vld [vmem:[%s536_s20 + $0x18] sm:$0xff]  ;;  %v178_v9 = vld [vmem:[%s536_s20 + $0x20] sm:$0xff]  ;;  %v179_v10 = vld [vmem:[%s536_s20 + $0x28] sm:$0xff] }
  0x12   : > { %v216_v11 = vmul.f32 %v531_v0, %v177_v8  ;;  %v217_v12 = vmul.f32 %v531_v0, %v178_v9  ;;  %v218_v13 = vmul.f32 %v531_v0, %v179_v10  ;;  %v180_v14 = vld [vmem:[%s536_s20 + $0x30] sm:$0xff]  ;;  %v181_v15 = vld [vmem:[%s536_s20 + $0x38] sm:$0xff]  ;;  %v182_v24 = vld [vmem:[%s536_s20 + $0x40] sm:$0xff] }
  0x13   : > { %v252_v16 = vadd.f32 %v541_v1, %v213_v5  ;;  %v253_v17 = vadd.f32 %v541_v1, %v214_v6  ;;  %v254_v18 = vadd.f32 %v541_v1, %v215_v7  ;;  %v219_v19 = vmul.f32 %v531_v0, %v180_v14  ;;  %v183_v32 = vld [vmem:[%s536_s20 + $0x48] sm:$0xff]  ;;  %v184_v33 = vld [vmem:[%s536_s20 + $0x50] sm:$0xff]  ;;  %v185_v34 = vld [vmem:[%s536_s20 + $0x58] sm:$0xff] }
  0x14   : > { %v255_v20 = vadd.f32 %v541_v1, %v216_v11  ;;  %v256_v21 = vadd.f32 %v541_v1, %v217_v12  ;;  %v257_v22 = vadd.f32 %v541_v1, %v218_v13  ;;  %v220_v23 = vmul.f32 %v531_v0, %v181_v15  ;;  %v186_v46 = vld [vmem:[%s536_s20 + $0x60] sm:$0xff]  ;;  %v187_v47 = vld [vmem:[%s536_s20 + $0x68] sm:$0xff]  ;;  %v188_v58 = vld [vmem:[%s536_s20 + $0x70] sm:$0xff] }
  0x15   : > { %vm284_vm0 = vcmp.ge.f32.partialorder %v252_v16, 0.0  ;;  %v316_v25 = vmul.f32 0.2, %v252_v16  ;;  %vm285_vm1 = vcmp.ge.f32.partialorder %v253_v17, 0.0  ;;  %v317_v26 = vmul.f32 0.2, %v253_v17 }
  0x16   : > { %vm286_vm2 = vcmp.ge.f32.partialorder %v254_v18, 0.0  ;;  %v318_v27 = vmul.f32 0.2, %v254_v18  ;;  %vm287_vm3 = vcmp.ge.f32.partialorder %v255_v20, 0.0  ;;  %v319_v28 = vmul.f32 0.2, %v255_v20 }
  0x17   : > { %v348_v29 = vsel %vm284_vm0, %v252_v16, %v316_v25  ;;  %v349_v30 = vsel %vm285_vm1, %v253_v17, %v317_v26  ;;  %vm288_vm4 = vcmp.ge.f32.partialorder %v256_v21, 0.0  ;;  %v320_v31 = vmul.f32 0.2, %v256_v21  ;;  %v189_v59 = vld [vmem:[%s536_s20 + $0x78] sm:$0xff]  ;;  %v190_v6 = vld [vmem:[%s536_s20 + $0x80] sm:$0xff]  ;;  %v191_v7 = vld [vmem:[%s536_s20 + $0x88] sm:$0xff] }
  0x18   : > { %380 = vst [vmem:[%s569_s25] sm:$0xff] %v348_v29  ;;  %381 = vst [vmem:[%s569_s25 + $0x8] sm:$0xff] %v349_v30  ;;  %v350_v35 = vsel %vm286_vm2, %v254_v18, %v318_v27  ;;  %v351_v36 = vsel %vm287_vm3, %v255_v20, %v319_v28  ;;  %vm289_vm5 = vcmp.ge.f32.partialorder %v257_v22, 0.0  ;;  %v321_v37 = vmul.f32 0.2, %v257_v22  ;;  %v192_v12 = vld [vmem:[%s536_s20 + $0x90] sm:$0xff]  ;;  %v193_v13 = vld [vmem:[%s536_s20 + $0x98] sm:$0xff] }
  0x19   : > { %382 = vst [vmem:[%s569_s25 + $0x10] sm:$0xff] %v350_v35  ;;  %383 = vst [vmem:[%s569_s25 + $0x18] sm:$0xff] %v351_v36  ;;  %v352_v38 = vsel %vm288_vm4, %v256_v21, %v320_v31  ;;  %v258_v39 = vadd.f32 %v541_v1, %v219_v19  ;;  %v259_v40 = vadd.f32 %v541_v1, %v220_v23  ;;  %v195_v25 = vld [vmem:[%s536_s20 + $0xa8] sm:$0xff]  ;;  %v196_v36 = vld [vmem:[%s536_s20 + $0xb0] sm:$0xff] }
  0x1a   : > { %v221_v41 = vmul.f32 %v531_v0, %v182_v24  ;;  %384 = vst [vmem:[%s569_s25 + $0x20] sm:$0xff] %v352_v38  ;;  %v353_v42 = vsel %vm289_vm5, %v257_v22, %v321_v37  ;;  %v222_v43 = vmul.f32 %v531_v0, %v183_v32  ;;  %v223_v44 = vmul.f32 %v531_v0, %v184_v33  ;;  %v194_v24 = vld [vmem:[%s536_s20 + $0xa0] sm:$0xff]  ;;  %v197_v37 = vld [vmem:[%s536_s20 + $0xb8] sm:$0xff] }
  0x1b   : > { %v224_v45 = vmul.f32 %v531_v0, %v185_v34  ;;  %385 = vst [vmem:[%s569_s25 + $0x28] sm:$0xff] %v353_v42  ;;  %vm290_vm6 = vcmp.ge.f32.partialorder %v258_v39, 0.0  ;;  %v322_v48 = vmul.f32 0.2, %v258_v39  ;;  %vm291_vm7 = vcmp.ge.f32.partialorder %v259_v40, 0.0 }
  0x1c   : > { %v323_v49 = vmul.f32 0.2, %v259_v40  ;;  %v260_v50 = vadd.f32 %v541_v1, %v221_v41  ;;  %v261_v51 = vadd.f32 %v541_v1, %v222_v43  ;;  %v262_v52 = vadd.f32 %v541_v1, %v223_v44 }
  0x1d   : > { %v263_v53 = vadd.f32 %v541_v1, %v224_v45  ;;  %v354_v54 = vsel %vm290_vm6, %v258_v39, %v322_v48  ;;  %v225_v56 = vmul.f32 %v531_v0, %v186_v46  ;;  %v226_v57 = vmul.f32 %v531_v0, %v187_v47  ;;  %v198_v46 = vld [vmem:[%s536_s20 + $0xc0] sm:$0xff]  ;;  %v199_v47 = vld [vmem:[%s536_s20 + $0xc8] sm:$0xff] }
  0x1e   : > { %v355_v55 = vsel %vm291_vm7, %v259_v40, %v323_v49  ;;  %386 = vst [vmem:[%s569_s25 + $0x30] sm:$0xff] %v354_v54  ;;  %vm292_vm8 = vcmp.ge.f32.partialorder %v260_v50, 0.0  ;;  %v324_v60 = vmul.f32 0.2, %v260_v50  ;;  %vm293_vm9 = vcmp.ge.f32.partialorder %v261_v51, 0.0 }
  0x1f   : > { %387 = vst [vmem:[%s569_s25 + $0x38] sm:$0xff] %v355_v55  ;;  %v325_v61 = vmul.f32 0.2, %v261_v51  ;;  %vm294_vm10 = vcmp.ge.f32.partialorder %v262_v52, 0.0  ;;  %v326_v62 = vmul.f32 0.2, %v262_v52  ;;  %v264_v4 = vadd.f32 %v541_v1, %v225_v56 }
  0x20   : > { %vm295_vm11 = vcmp.ge.f32.partialorder %v263_v53, 0.0  ;;  %v327_v63 = vmul.f32 0.2, %v263_v53  ;;  %v356_v2 = vsel %vm292_vm8, %v260_v50, %v324_v60  ;;  %v265_v5 = vadd.f32 %v541_v1, %v226_v57 }
  0x21   : > { %v357_v3 = vsel %vm293_vm9, %v261_v51, %v325_v61  ;;  %388 = vst [vmem:[%s569_s25 + $0x40] sm:$0xff] %v356_v2  ;;  %v358_v8 = vsel %vm294_vm10, %v262_v52, %v326_v62  ;;  %v227_v10 = vmul.f32 %v531_v0, %v188_v58  ;;  %v228_v11 = vmul.f32 %v531_v0, %v189_v59  ;;  %v200_v52 = vld [vmem:[%s536_s20 + $0xd0] sm:$0xff]  ;;  %v202_v2 = vld [vmem:[%s536_s20 + $0xe0] sm:$0xff] }
  0x22   : > { %389 = vst [vmem:[%s569_s25 + $0x48] sm:$0xff] %v357_v3  ;;  %v359_v9 = vsel %vm295_vm11, %v263_v53, %v327_v63  ;;  %390 = vst [vmem:[%s569_s25 + $0x50] sm:$0xff] %v358_v8  ;;  %vm296_vm12 = vcmp.ge.f32.partialorder %v264_v4, 0.0  ;;  %v328_v14 = vmul.f32 0.2, %v264_v4  ;;  %vm297_vm13 = vcmp.ge.f32.partialorder %v265_v5, 0.0 }
  0x23   : > { %391 = vst [vmem:[%s569_s25 + $0x58] sm:$0xff] %v359_v9  ;;  %v329_v15 = vmul.f32 0.2, %v265_v5  ;;  %v266_v16 = vadd.f32 %v541_v1, %v227_v10  ;;  %v267_v17 = vadd.f32 %v541_v1, %v228_v11  ;;  %v229_v18 = vmul.f32 %v531_v0, %v190_v6  ;;  %v201_v53 = vld [vmem:[%s536_s20 + $0xd8] sm:$0xff]  ;;  %v203_v3 = vld [vmem:[%s536_s20 + $0xe8] sm:$0xff] }
  0x24   : > { %v230_v19 = vmul.f32 %v531_v0, %v191_v7  ;;  %v360_v20 = vsel %vm296_vm12, %v264_v4, %v328_v14  ;;  %v231_v22 = vmul.f32 %v531_v0, %v192_v12  ;;  %v232_v23 = vmul.f32 %v531_v0, %v193_v13  ;;  %v204_v14 = vld [vmem:[%s536_s20 + $0xf0] sm:$0xff] }
  0x25   : > { %v361_v21 = vsel %vm297_vm13, %v265_v5, %v329_v15  ;;  %392 = vst [vmem:[%s569_s25 + $0x60] sm:$0xff] %v360_v20  ;;  %vm298_vm14 = vcmp.ge.f32.partialorder %v266_v16, 0.0  ;;  %v330_v26 = vmul.f32 0.2, %v266_v16  ;;  %vm299_vm15 = vcmp.ge.f32.partialorder %v267_v17, 0.0  ;;  %v205_v15 = vld [vmem:[%s536_s20 + $0xf8] sm:$0xff] }
  0x26   : > { %393 = vst [vmem:[%s569_s25 + $0x68] sm:$0xff] %v361_v21  ;;  %v331_v27 = vmul.f32 0.2, %v267_v17  ;;  %v268_v28 = vadd.f32 %v541_v1, %v229_v18  ;;  %v269_v29 = vadd.f32 %v541_v1, %v230_v19  ;;  %v270_v30 = vadd.f32 %v541_v1, %v231_v22 }
  0x27   : > { %v271_v31 = vadd.f32 %v541_v1, %v232_v23  ;;  %v362_v32 = vsel %vm298_vm14, %v266_v16, %v330_v26  ;;  %v233_v34 = vmul.f32 %v531_v0, %v194_v24  ;;  %v234_v35 = vmul.f32 %v531_v0, %v195_v25 }
  0x28   : > { %v363_v33 = vsel %vm299_vm15, %v267_v17, %v331_v27  ;;  %394 = vst [vmem:[%s569_s25 + $0x70] sm:$0xff] %v362_v32  ;;  %vm300_vm0 = vcmp.ge.f32.partialorder %v268_v28, 0.0  ;;  %v332_v38 = vmul.f32 0.2, %v268_v28  ;;  %vm301_vm1 = vcmp.ge.f32.partialorder %v269_v29, 0.0 }
  0x29   : > { %395 = vst [vmem:[%s569_s25 + $0x78] sm:$0xff] %v363_v33  ;;  %v333_v39 = vmul.f32 0.2, %v269_v29  ;;  %vm302_vm2 = vcmp.ge.f32.partialorder %v270_v30, 0.0  ;;  %v334_v40 = vmul.f32 0.2, %v270_v30  ;;  %v272_v44 = vadd.f32 %v541_v1, %v233_v34 }
  0x2a   : > { %vm303_vm3 = vcmp.ge.f32.partialorder %v271_v31, 0.0  ;;  %v335_v41 = vmul.f32 0.2, %v271_v31  ;;  %v364_v42 = vsel %vm300_vm0, %v268_v28, %v332_v38  ;;  %v273_v45 = vadd.f32 %v541_v1, %v234_v35 }
  0x2b   : > { %v365_v43 = vsel %vm301_vm1, %v269_v29, %v333_v39  ;;  %396 = vst [vmem:[%s569_s25 + $0x80] sm:$0xff] %v364_v42  ;;  %v366_v48 = vsel %vm302_vm2, %v270_v30, %v334_v40  ;;  %v235_v50 = vmul.f32 %v531_v0, %v196_v36  ;;  %v236_v51 = vmul.f32 %v531_v0, %v197_v37 }
  0x2c   : > { %397 = vst [vmem:[%s569_s25 + $0x88] sm:$0xff] %v365_v43  ;;  %v367_v49 = vsel %vm303_vm3, %v271_v31, %v335_v41  ;;  %398 = vst [vmem:[%s569_s25 + $0x90] sm:$0xff] %v366_v48  ;;  %vm304_vm4 = vcmp.ge.f32.partialorder %v272_v44, 0.0  ;;  %v336_v54 = vmul.f32 0.2, %v272_v44  ;;  %vm305_vm5 = vcmp.ge.f32.partialorder %v273_v45, 0.0 }
  0x2d   : > { %399 = vst [vmem:[%s569_s25 + $0x98] sm:$0xff] %v367_v49  ;;  %v337_v55 = vmul.f32 0.2, %v273_v45  ;;  %v274_v56 = vadd.f32 %v541_v1, %v235_v50  ;;  %v275_v57 = vadd.f32 %v541_v1, %v236_v51  ;;  %v237_v58 = vmul.f32 %v531_v0, %v198_v46 }
  0x2e   : > { %v238_v59 = vmul.f32 %v531_v0, %v199_v47  ;;  %v368_v60 = vsel %vm304_vm4, %v272_v44, %v336_v54  ;;  %v239_v62 = vmul.f32 %v531_v0, %v200_v52  ;;  %v240_v63 = vmul.f32 %v531_v0, %v201_v53 }
  0x2f   : > { %v369_v61 = vsel %vm305_vm5, %v273_v45, %v337_v55  ;;  %400 = vst [vmem:[%s569_s25 + $0xa0] sm:$0xff] %v368_v60  ;;  %vm306_vm6 = vcmp.ge.f32.partialorder %v274_v56, 0.0  ;;  %v338_v4 = vmul.f32 0.2, %v274_v56  ;;  %vm307_vm7 = vcmp.ge.f32.partialorder %v275_v57, 0.0 }
  0x30   : > { %401 = vst [vmem:[%s569_s25 + $0xa8] sm:$0xff] %v369_v61  ;;  %v339_v5 = vmul.f32 0.2, %v275_v57  ;;  %v276_v6 = vadd.f32 %v541_v1, %v237_v58  ;;  %v277_v7 = vadd.f32 %v541_v1, %v238_v59  ;;  %v278_v8 = vadd.f32 %v541_v1, %v239_v62 }
  0x31   : > { %v279_v9 = vadd.f32 %v541_v1, %v240_v63  ;;  %v370_v10 = vsel %vm306_vm6, %v274_v56, %v338_v4  ;;  %v241_v12 = vmul.f32 %v531_v0, %v202_v2  ;;  %v242_v13 = vmul.f32 %v531_v0, %v203_v3 }
  0x32   : > { %v371_v11 = vsel %vm307_vm7, %v275_v57, %v339_v5  ;;  %402 = vst [vmem:[%s569_s25 + $0xb0] sm:$0xff] %v370_v10  ;;  %vm308_vm8 = vcmp.ge.f32.partialorder %v276_v6, 0.0  ;;  %v340_v16 = vmul.f32 0.2, %v276_v6  ;;  %vm309_vm9 = vcmp.ge.f32.partialorder %v277_v7, 0.0 }
  0x33   : > { %403 = vst [vmem:[%s569_s25 + $0xb8] sm:$0xff] %v371_v11  ;;  %v341_v17 = vmul.f32 0.2, %v277_v7  ;;  %vm310_vm10 = vcmp.ge.f32.partialorder %v278_v8, 0.0  ;;  %v342_v18 = vmul.f32 0.2, %v278_v8  ;;  %v280_v22 = vadd.f32 %v541_v1, %v241_v12 }
  0x34   : > { %vm311_vm11 = vcmp.ge.f32.partialorder %v279_v9, 0.0  ;;  %v343_v19 = vmul.f32 0.2, %v279_v9  ;;  %v372_v20 = vsel %vm308_vm8, %v276_v6, %v340_v16  ;;  %v281_v23 = vadd.f32 %v541_v1, %v242_v13 }
  0x35   : > { %v373_v21 = vsel %vm309_vm9, %v277_v7, %v341_v17  ;;  %404 = vst [vmem:[%s569_s25 + $0xc0] sm:$0xff] %v372_v20  ;;  %v374_v24 = vsel %vm310_vm10, %v278_v8, %v342_v18  ;;  %v243_v26 = vmul.f32 %v531_v0, %v204_v14  ;;  %v244_v27 = vmul.f32 %v531_v0, %v205_v15 }
  0x36   : > { %405 = vst [vmem:[%s569_s25 + $0xc8] sm:$0xff] %v373_v21  ;;  %v375_v25 = vsel %vm311_vm11, %v279_v9, %v343_v19  ;;  %406 = vst [vmem:[%s569_s25 + $0xd0] sm:$0xff] %v374_v24  ;;  %vm312_vm12 = vcmp.ge.f32.partialorder %v280_v22, 0.0  ;;  %v344_v28 = vmul.f32 0.2, %v280_v22  ;;  %vm313_vm13 = vcmp.ge.f32.partialorder %v281_v23, 0.0 }
  0x37   : > { %407 = vst [vmem:[%s569_s25 + $0xd8] sm:$0xff] %v375_v25  ;;  %v345_v29 = vmul.f32 0.2, %v281_v23  ;;  %v282_v30 = vadd.f32 %v541_v1, %v243_v26  ;;  %v283_v31 = vadd.f32 %v541_v1, %v244_v27 }
  0x38   : > { %v376_v32 = vsel %vm312_vm12, %v280_v22, %v344_v28 }
  0x39   : > { %v377_v33 = vsel %vm313_vm13, %v281_v23, %v345_v29  ;;  %408 = vst [vmem:[%s569_s25 + $0xe0] sm:$0xff] %v376_v32  ;;  %vm314_vm14 = vcmp.ge.f32.partialorder %v282_v30, 0.0  ;;  %v346_v34 = vmul.f32 0.2, %v282_v30  ;;  %vm315_vm15 = vcmp.ge.f32.partialorder %v283_v31, 0.0 }
  0x3a   : > { %409 = vst [vmem:[%s569_s25 + $0xe8] sm:$0xff] %v377_v33  ;;  %v347_v0 = vmul.f32 0.2, %v283_v31 }
  0x3b   : > { %v378_v35 = vsel %vm314_vm14, %v282_v30, %v346_v34 }
  0x3c   : > { %v379_v36 = vsel %vm315_vm15, %v283_v31, %v347_v0  ;;  %410 = vst [vmem:[%s569_s25 + $0xf0] sm:$0xff] %v378_v35 }
  0x3d   : > { %411 = vst [vmem:[%s569_s25 + $0xf8] sm:$0xff] %v379_v36 }
  0x3e PF: > { %s13_s12 = sadd.s32 1, %s495_s12  }
  0x3f   : > { %p10_p4 = scmp.ge.s32.totalorder %s13_s12, 10  }
  0x41   :  { %12 = sbr.rel (!%p10_p4) target bundleno = 1 (0x1), region = 62 }

// kernel: discriminator_forward.9
= control target key start
LH: loop header
LB: loop body
LE: loop exit
PB: predicated region body
PF: predicated region fallthrough
CT: control target
= control target key end

     0   :  { %s1200_s12 = smov 0   ;;  %s1202_s13 = smov 0   ;;  %s1396_s0 = inlined_call_operand.vmem [shape: bf16[2048,128], index: 0, kind: input, shape index: {}]   ;;  %s1397_s1 = inlined_call_operand.vmem [shape: bf16[128,128], index: 1, kind: input, shape index: {}]   ;;  %s1398_s2 = inlined_call_operand.vmem [shape: f32[2048,128], index: 2, kind: output, shape index: {0}]   ;;  %s1399_s3 = inlined_call_operand.vmem [shape: f32[8,128], index: 3, kind: output, shape index: {1}]  }
   0x1   :  { %s1204_s14 = smov 0  }
   0x2 LB: > { %s26_s15 = sadd.s32 1, %s1173_s13  ;;  %p985_p0 = scmp.ge.s32.totalorder %s1177_s14, 1  ;;  %s1177_s14 = sphi %s1204_s14, %s14_s14   ;;  %s1173_s13 = sphi %s1202_s13, %s1401_s13   ;;  %s1169_s12 = sphi %s1200_s12, %s1400_s12  }
   0x3   : > { %p28_p1 = scmp.ge.s32.totalorder %s26_s15, 8  ;;  %p164_p2 = scmp.lt.s32.totalorder %s1177_s14, 9 }
   0x5   : > { %s1403_s15 = smov (%p28_p1, %s26_s15), 0  ;;  %p165_p3 = pnand %p985_p0, %p164_p2 }
   0x6   : > { %s986_s16 = sshll.u32 (!%p165_p3), %s1169_s12, 5  ;;  %p218_p4 = scmp.eq.s32.totalorder (!%p165_p3), %s1169_s12, 0 }
   0x7   : > { %168 = sbr.rel (%p165_p3) target bundleno = 350 (0x15e), region = 28  ;;  %p197_p5 = scmp.lt.s32.totalorder (!%p165_p3), %s986_s16, 255 }
   0xe   : > { %s1405_s16 = smov (!%p197_p5, %s986_s16), 255  ;;  %223 = sbr.rel (!%p218_p4) target bundleno = 21 (0x15), region = 32 }
   0xf   : > { %s987_s17 = sshll.u32 %s1405_s16, 2  ;;  %s989_s18 = sshll.u32 %s1405_s16, 3  ;;  %v1179_v0 = vmov (%p218_p4), 0.0  }
  0x10   : > { %s1221_s21 = scalar_lea.vmem %s1396_s0, %s987_s17  ;;  %s1226_s24 = scalar_lea.vmem %s1398_s2, %s989_s18  ;;  %224 = vst [vmem:[%s1399_s3] sm:$0xff] (%p218_p4), %v1179_v0 }
  0x15 PF: > { %v1131_v1 = vld [vmem:[%s1397_s1] sm:$0xff]   ;;  %v1132_v2 = vld [vmem:[%s1397_s1 + $0x8] sm:$0xff]   ;;  %v1133_v3 = vld [vmem:[%s1397_s1 + $0x10] sm:$0xff]  }
  0x16   : > { %1042 = vmatprep.subr.bf16.mxu0 %v1131_v1  ;;  %1090 = vmatprep.subr.bf16.mxu1 %v1131_v1  ;;  %v1134_v4 = vld [vmem:[%s1397_s1 + $0x18] sm:$0xff]   ;;  %v1139_v5 = vld [vmem:[%s1221_s21] sm:$0xff]   ;;  %v1136_v7 = vld [vmem:[%s1397_s1 + $0x28] sm:$0xff]  }
  0x17   : > { %1043 = vmatpush3.bf16.msra.mxu0 %v1131_v1  ;;  %1098 = vmatpush3.bf16.msra.mxu1 %v1131_v1  ;;  %v1135_v6 = vld [vmem:[%s1397_s1 + $0x20] sm:$0xff]   ;;  %v1137_v9 = vld [vmem:[%s1397_s1 + $0x30] sm:$0xff]   ;;  %v1138_v10 = vld [vmem:[%s1397_s1 + $0x38] sm:$0xff]  }
  0x18   : > { %1044 = vmatprep.subr.bf16.mxu0 %v1132_v2  ;;  %1091 = vmatprep.subr.bf16.mxu1 %v1132_v2  ;;  %v1147_v8 = vld [vmem:[%s1221_s21 + $0x40] sm:$0xff]   ;;  %v1140_v11 = vld [vmem:[%s1221_s21 + $0x8] sm:$0xff]   ;;  %v1141_v13 = vld [vmem:[%s1221_s21 + $0x10] sm:$0xff]  }
  0x19   : > { %1058 = vmatprep.mubr.bf16.mxu0 %v1139_v5  ;;  %1074 = vmatprep.mubr.bf16.mxu1 %v1147_v8  ;;  %v1148_v12 = vld [vmem:[%s1221_s21 + $0x48] sm:$0xff]   ;;  %v1149_v14 = vld [vmem:[%s1221_s21 + $0x50] sm:$0xff]   ;;  %v1142_v15 = vld [vmem:[%s1221_s21 + $0x18] sm:$0xff]  }
  0x1a   : > { %v1150_v16 = vld [vmem:[%s1221_s21 + $0x58] sm:$0xff]   ;;  %v1143_v17 = vld [vmem:[%s1221_s21 + $0x20] sm:$0xff]   ;;  %v1144_v19 = vld [vmem:[%s1221_s21 + $0x28] sm:$0xff]  }
  0x1b   : > { %1045 = vmatpush3.bf16.msra.mxu0 %v1132_v2  ;;  %1099 = vmatpush3.bf16.msra.mxu1 %v1132_v2  ;;  %v1151_v18 = vld [vmem:[%s1221_s21 + $0x60] sm:$0xff]   ;;  %v1152_v20 = vld [vmem:[%s1221_s21 + $0x68] sm:$0xff]   ;;  %v1145_v21 = vld [vmem:[%s1221_s21 + $0x30] sm:$0xff]  }
  0x1c   : > { %1046 = vmatprep.subr.bf16.mxu0 %v1133_v3  ;;  %1092 = vmatprep.subr.bf16.mxu1 %v1133_v3  ;;  %v1153_v22 = vld [vmem:[%s1221_s21 + $0x70] sm:$0xff]   ;;  %v1146_v23 = vld [vmem:[%s1221_s21 + $0x38] sm:$0xff]  }
  0x1d   : > { %v1154_v24 = vld [vmem:[%s1221_s21 + $0x78] sm:$0xff]  }
  0x1f   : > { %1047 = vmatpush3.bf16.msra.mxu0 %v1133_v3  ;;  %1100 = vmatpush3.bf16.msra.mxu1 %v1133_v3 }
  0x20   : > { %1048 = vmatprep.subr.bf16.mxu0 %v1134_v4  ;;  %1093 = vmatprep.subr.bf16.mxu1 %v1134_v4 }
  0x23   : > { %1049 = vmatpush3.bf16.msra.mxu0 %v1134_v4  ;;  %1101 = vmatpush3.bf16.msra.mxu1 %v1134_v4 }
  0x24   : > { %1050 = vmatprep.subr.bf16.mxu0 %v1135_v6  ;;  %1094 = vmatprep.subr.bf16.mxu1 %v1135_v6 }
  0x27   : > { %1051 = vmatpush3.bf16.msra.mxu0 %v1135_v6  ;;  %1102 = vmatpush3.bf16.msra.mxu1 %v1135_v6 }
  0x28   : > { %1052 = vmatprep.subr.bf16.mxu0 %v1136_v7  ;;  %1095 = vmatprep.subr.bf16.mxu1 %v1136_v7 }
  0x2b   : > { %1053 = vmatpush3.bf16.msra.mxu0 %v1136_v7  ;;  %1103 = vmatpush3.bf16.msra.mxu1 %v1136_v7 }
  0x2c   : > { %1054 = vmatprep.subr.bf16.mxu0 %v1137_v9  ;;  %1096 = vmatprep.subr.bf16.mxu1 %v1137_v9 }
  0x2f   : > { %1055 = vmatpush3.bf16.msra.mxu0 %v1137_v9  ;;  %1104 = vmatpush3.bf16.msra.mxu1 %v1137_v9 }
  0x30   : > { %1056 = vmatprep.subr.bf16.mxu0 %v1138_v10  ;;  %1097 = vmatprep.subr.bf16.mxu1 %v1138_v10 }
  0x33   : > { %1057 = vmatpush3.bf16.msra.mxu0 %v1138_v10  ;;  %1105 = vmatpush3.bf16.msra.mxu1 %v1138_v10 }
  0x36   : > { %1059 = vmatmul.mubr.bf16.vlgmr.msra.gmra.mrb[0].mxu0 %v1140_v11  ;;  %1075 = vmatmul.mubr.bf16.vlgmr.msra.gmra.mrb[0].mxu1 %v1148_v12 }
  0x37   : > { %1062 = vmatprep.mubr.bf16.mxu0 %v1141_v13  ;;  %1078 = vmatprep.mubr.bf16.mxu1 %v1149_v14 }
  0x3e   : > { %1063 = vmatmul.mubr.bf16.gmra.mrb[4].mxu0 %v1142_v15  ;;  %1079 = vmatmul.mubr.bf16.gmra.mrb[4].mxu1 %v1150_v16 }
  0x3f   : > { %1066 = vmatprep.mubr.bf16.mxu0 %v1143_v17  ;;  %1082 = vmatprep.mubr.bf16.mxu1 %v1151_v18 }
  0x46   : > { %1067 = vmatmul.mubr.bf16.gmra.mrb[8].mxu0 %v1144_v19  ;;  %1083 = vmatmul.mubr.bf16.gmra.mrb[8].mxu1 %v1152_v20 }
  0x47   : > { %1070 = vmatprep.mubr.bf16.mxu0 %v1145_v21  ;;  %1086 = vmatprep.mubr.bf16.mxu1 %v1153_v22 }
  0x4e   : > { %1071 = vmatmul.mubr.bf16.gmra.mrb[12].mxu0 %v1146_v23  ;;  %1087 = vmatmul.mubr.bf16.gmra.mrb[12].mxu1 %v1154_v24 }
 0x109   : > { %v1060_v25 = vpop.f32.mrb[0].mxu0  ;;  %v1271_v26 = vpop.f32.mrb[0].mxu1 }
 0x10a   : > { %746 = vst [vmem:[%s1226_s24 + $0x10] sm:$0xff] %v1060_v25  ;;  %v518_v27 = vpop.f32.mrb[1].mxu0  ;;  %762 = vst [vmem:[%s1226_s24 + $0x90] sm:$0xff] %v1271_v26  ;;  %v1276_v28 = vpop.f32.mrb[1].mxu1  ;;  %v815_v36 = vmul.f32 %v1060_v25, %v1060_v25 }
 0x10b   : > { %744 = vst [vmem:[%s1226_s24] sm:$0xff] %v518_v27  ;;  %v1061_v29 = vpop.f32.mrb[2].mxu0  ;;  %760 = vst [vmem:[%s1226_s24 + $0x80] sm:$0xff] %v1276_v28  ;;  %v1281_v30 = vpop.f32.mrb[2].mxu1  ;;  %v813_v33 = vmul.f32 %v518_v27, %v518_v27 }
 0x10c   : > { %747 = vst [vmem:[%s1226_s24 + $0x18] sm:$0xff] %v1061_v29  ;;  %v521_v31 = vpop.f32.mrb[3].mxu0  ;;  %763 = vst [vmem:[%s1226_s24 + $0x98] sm:$0xff] %v1281_v30  ;;  %v1286_v32 = vpop.f32.mrb[3].mxu1  ;;  %v816_v39 = vmul.f32 %v1061_v29, %v1061_v29 }
 0x10d   : > { %745 = vst [vmem:[%s1226_s24 + $0x8] sm:$0xff] %v521_v31  ;;  %v776_v34 = vadd.f32 %v521_v31, %v518_v27  ;;  %v814_v35 = vmul.f32 %v521_v31, %v521_v31  ;;  %761 = vst [vmem:[%s1226_s24 + $0x88] sm:$0xff] %v1286_v32 }
 0x10f   : > { %v777_v37 = vadd.f32 %v1060_v25, %v776_v34  ;;  %v845_v38 = vadd.f32 %v814_v35, %v813_v33 }
 0x111   : > { %v846_v40 = vadd.f32 %v845_v38, %v815_v36  ;;  %v1064_v41 = vpop.f32.mrb[4].mxu0  ;;  %v778_v42 = vadd.f32 %v1061_v29, %v777_v37  ;;  %v1291_v43 = vpop.f32.mrb[4].mxu1 }
 0x112   : > { %750 = vst [vmem:[%s1226_s24 + $0x30] sm:$0xff] %v1064_v41  ;;  %v534_v44 = vpop.f32.mrb[5].mxu0  ;;  %766 = vst [vmem:[%s1226_s24 + $0xb0] sm:$0xff] %v1291_v43  ;;  %v1296_v45 = vpop.f32.mrb[5].mxu1  ;;  %v819_v56 = vmul.f32 %v1064_v41, %v1064_v41 }
 0x113   : > { %748 = vst [vmem:[%s1226_s24 + $0x20] sm:$0xff] %v534_v44  ;;  %v779_v46 = vadd.f32 %v778_v42, %v534_v44  ;;  %v817_v47 = vmul.f32 %v534_v44, %v534_v44  ;;  %v847_v48 = vadd.f32 %v846_v40, %v816_v39  ;;  %v1065_v49 = vpop.f32.mrb[6].mxu0  ;;  %764 = vst [vmem:[%s1226_s24 + $0xa0] sm:$0xff] %v1296_v45  ;;  %v1301_v50 = vpop.f32.mrb[6].mxu1 }
 0x114   : > { %751 = vst [vmem:[%s1226_s24 + $0x38] sm:$0xff] %v1065_v49  ;;  %v537_v51 = vpop.f32.mrb[7].mxu0  ;;  %767 = vst [vmem:[%s1226_s24 + $0xb8] sm:$0xff] %v1301_v50  ;;  %v1306_v52 = vpop.f32.mrb[7].mxu1  ;;  %v820_v59 = vmul.f32 %v1065_v49, %v1065_v49  ;;  %v829_v42 = vmul.f32 %v1276_v28, %v1276_v28 }
 0x115   : > { %v848_v53 = vadd.f32 %v847_v48, %v817_v47  ;;  %749 = vst [vmem:[%s1226_s24 + $0x28] sm:$0xff] %v537_v51  ;;  %v780_v54 = vadd.f32 %v779_v46, %v537_v51  ;;  %v818_v55 = vmul.f32 %v537_v51, %v537_v51  ;;  %765 = vst [vmem:[%s1226_s24 + $0xa8] sm:$0xff] %v1306_v52 }
 0x116   : > { %v831_v51 = vmul.f32 %v1271_v26, %v1271_v26 }
 0x117   : > { %v781_v57 = vadd.f32 %v1064_v41, %v780_v54  ;;  %v849_v58 = vadd.f32 %v848_v53, %v818_v55  ;;  %v832_v55 = vmul.f32 %v1281_v30, %v1281_v30 }
 0x119   : > { %v850_v60 = vadd.f32 %v849_v58, %v819_v56  ;;  %v1068_v61 = vpop.f32.mrb[8].mxu0  ;;  %v782_v62 = vadd.f32 %v1065_v49, %v781_v57  ;;  %v1311_v63 = vpop.f32.mrb[8].mxu1  ;;  %v830_v49 = vmul.f32 %v1286_v32, %v1286_v32 }
 0x11a   : > { %754 = vst [vmem:[%s1226_s24 + $0x50] sm:$0xff] %v1068_v61  ;;  %v550_v0 = vpop.f32.mrb[9].mxu0  ;;  %770 = vst [vmem:[%s1226_s24 + $0xd0] sm:$0xff] %v1311_v63  ;;  %v1316_v1 = vpop.f32.mrb[9].mxu1  ;;  %v823_v12 = vmul.f32 %v1068_v61, %v1068_v61 }
 0x11b   : > { %752 = vst [vmem:[%s1226_s24 + $0x40] sm:$0xff] %v550_v0  ;;  %v783_v2 = vadd.f32 %v782_v62, %v550_v0  ;;  %v821_v3 = vmul.f32 %v550_v0, %v550_v0  ;;  %v851_v4 = vadd.f32 %v850_v60, %v820_v59  ;;  %v1069_v5 = vpop.f32.mrb[10].mxu0  ;;  %768 = vst [vmem:[%s1226_s24 + $0xc0] sm:$0xff] %v1316_v1  ;;  %v1321_v6 = vpop.f32.mrb[10].mxu1 }
 0x11c   : > { %755 = vst [vmem:[%s1226_s24 + $0x58] sm:$0xff] %v1069_v5  ;;  %v553_v7 = vpop.f32.mrb[11].mxu0  ;;  %771 = vst [vmem:[%s1226_s24 + $0xd8] sm:$0xff] %v1321_v6  ;;  %v1326_v8 = vpop.f32.mrb[11].mxu1  ;;  %v824_v15 = vmul.f32 %v1069_v5, %v1069_v5 }
 0x11d   : > { %v852_v9 = vadd.f32 %v851_v4, %v821_v3  ;;  %753 = vst [vmem:[%s1226_s24 + $0x48] sm:$0xff] %v553_v7  ;;  %v784_v10 = vadd.f32 %v783_v2, %v553_v7  ;;  %v822_v11 = vmul.f32 %v553_v7, %v553_v7  ;;  %769 = vst [vmem:[%s1226_s24 + $0xc8] sm:$0xff] %v1326_v8 }
 0x11f   : > { %v785_v13 = vadd.f32 %v1068_v61, %v784_v10  ;;  %v853_v14 = vadd.f32 %v852_v9, %v822_v11  ;;  %v834_v61 = vmul.f32 %v1306_v52, %v1306_v52  ;;  %v838_v9 = vmul.f32 %v1326_v8, %v1326_v8 }
 0x121   : > { %v854_v16 = vadd.f32 %v853_v14, %v823_v12  ;;  %v1072_v17 = vpop.f32.mrb[12].mxu0  ;;  %v786_v18 = vadd.f32 %v1069_v5, %v785_v13  ;;  %v1331_v19 = vpop.f32.mrb[12].mxu1 }
 0x122   : > { %758 = vst [vmem:[%s1226_s24 + $0x70] sm:$0xff] %v1072_v17  ;;  %v566_v20 = vpop.f32.mrb[13].mxu0  ;;  %774 = vst [vmem:[%s1226_s24 + $0xf0] sm:$0xff] %v1331_v19  ;;  %v630_v21 = vpop.f32.mrb[13].mxu1  ;;  %v827_v36 = vmul.f32 %v1072_v17, %v1072_v17 }
 0x123   : > { %756 = vst [vmem:[%s1226_s24 + $0x60] sm:$0xff] %v566_v20  ;;  %v787_v22 = vadd.f32 %v786_v18, %v566_v20  ;;  %v825_v23 = vmul.f32 %v566_v20, %v566_v20  ;;  %v855_v24 = vadd.f32 %v854_v16, %v824_v15  ;;  %v1073_v25 = vpop.f32.mrb[14].mxu0  ;;  %772 = vst [vmem:[%s1226_s24 + $0xe0] sm:$0xff] %v630_v21  ;;  %v1089_v27 = vpop.f32.mrb[14].mxu1 }
 0x124   : > { %759 = vst [vmem:[%s1226_s24 + $0x78] sm:$0xff] %v1073_v25  ;;  %v569_v29 = vpop.f32.mrb[15].mxu0  ;;  %775 = vst [vmem:[%s1226_s24 + $0xf8] sm:$0xff] %v1089_v27  ;;  %v633_v31 = vpop.f32.mrb[15].mxu1  ;;  %v828_v39 = vmul.f32 %v1073_v25, %v1073_v25 }
 0x125   : > { %v856_v33 = vadd.f32 %v855_v24, %v825_v23  ;;  %757 = vst [vmem:[%s1226_s24 + $0x68] sm:$0xff] %v569_v29  ;;  %v788_v34 = vadd.f32 %v787_v22, %v569_v29  ;;  %v826_v35 = vmul.f32 %v569_v29, %v569_v29  ;;  %773 = vst [vmem:[%s1226_s24 + $0xe8] sm:$0xff] %v633_v31 }
 0x126   : > { %v842_v18 = vmul.f32 %v633_v31, %v633_v31 }
 0x127   : > { %v789_v37 = vadd.f32 %v1072_v17, %v788_v34  ;;  %v857_v38 = vadd.f32 %v856_v33, %v826_v35 }
 0x129   : > { %v858_v40 = vadd.f32 %v857_v38, %v827_v36  ;;  %v790_v41 = vadd.f32 %v1073_v25, %v789_v37 }
 0x12b   : > { %v791_v44 = vadd.f32 %v790_v41, %v1276_v28  ;;  %v859_v46 = vadd.f32 %v858_v40, %v828_v39  ;;  %v833_v28 = vmul.f32 %v1296_v45, %v1296_v45 }
 0x12d   : > { %v860_v47 = vadd.f32 %v859_v46, %v829_v42  ;;  %v792_v48 = vadd.f32 %v791_v44, %v1286_v32 }
 0x12f   : > { %v793_v53 = vadd.f32 %v1271_v26, %v792_v48  ;;  %v861_v54 = vadd.f32 %v860_v47, %v830_v49  ;;  %v835_v26 = vmul.f32 %v1291_v43, %v1291_v43 }
 0x131   : > { %v862_v56 = vadd.f32 %v861_v54, %v831_v51  ;;  %v794_v57 = vadd.f32 %v1281_v30, %v793_v53  ;;  %v836_v30 = vmul.f32 %v1301_v50, %v1301_v50 }
 0x133   : > { %v795_v58 = vadd.f32 %v794_v57, %v1296_v45  ;;  %v863_v59 = vadd.f32 %v862_v56, %v832_v55  ;;  %v837_v45 = vmul.f32 %v1316_v1, %v1316_v1 }
 0x135   : > { %v864_v60 = vadd.f32 %v863_v59, %v833_v28  ;;  %v796_v32 = vadd.f32 %v795_v58, %v1306_v52 }
 0x137   : > { %v797_v62 = vadd.f32 %v1291_v43, %v796_v32  ;;  %v865_v0 = vadd.f32 %v864_v60, %v834_v61  ;;  %v839_v43 = vmul.f32 %v1311_v63, %v1311_v63 }
 0x139   : > { %v866_v2 = vadd.f32 %v865_v0, %v835_v26  ;;  %v798_v3 = vadd.f32 %v1301_v50, %v797_v62  ;;  %v840_v50 = vmul.f32 %v1321_v6, %v1321_v6 }
 0x13b   : > { %v799_v4 = vadd.f32 %v798_v3, %v1316_v1  ;;  %v867_v5 = vadd.f32 %v866_v2, %v836_v30  ;;  %v841_v1 = vmul.f32 %v630_v21, %v630_v21 }
 0x13d   : > { %v868_v7 = vadd.f32 %v867_v5, %v837_v45  ;;  %v800_v52 = vadd.f32 %v799_v4, %v1326_v8  ;;  %v843_v8 = vmul.f32 %v1331_v19, %v1331_v19 }
 0x13f   : > { %v801_v10 = vadd.f32 %v1311_v63, %v800_v52  ;;  %v869_v11 = vadd.f32 %v868_v7, %v838_v9  ;;  %v844_v63 = vmul.f32 %v1089_v27, %v1089_v27 }
 0x141   : > { %v870_v12 = vadd.f32 %v869_v11, %v839_v43  ;;  %v802_v13 = vadd.f32 %v1321_v6, %v801_v10  ;;  %v882_v6 = vlaneseq }
 0x143   : > { %v803_v14 = vadd.f32 %v802_v13, %v630_v21  ;;  %v871_v15 = vadd.f32 %v870_v12, %v840_v50  ;;  %v883_v38 = vshrl.u32 %v882_v6, 7 }
 0x145   : > { %v872_v16 = vadd.f32 %v871_v15, %v841_v1  ;;  %v804_v17 = vadd.f32 %v803_v14, %v633_v31  ;;  %vm885_vm0 = vcmp.eq.s32.totalorder %v883_v38, 1  ;;  %vm884_vm1 = vcmp.eq.s32.totalorder %v883_v38, 0 }
 0x147   : > { %v805_v20 = vadd.f32 %v1331_v19, %v804_v17  ;;  %v873_v22 = vadd.f32 %v872_v16, %v842_v18 }
 0x149   : > { %v806_v23 = vadd.f32 %v1089_v27, %v805_v20  ;;  %v874_v24 = vadd.f32 %v873_v22, %v843_v8  ;;  %v888_v27 = vld [vmem:[%s1399_s3] sm:$0xff] }
 0x14b   : > { %v807_v25 = vrot.slane %v806_v23, 4  ;;  %v875_v29 = vadd.f32 %v874_v24, %v844_v63 }
 0x14d   : > { %v808_v33 = vadd.f32 %v807_v25, %v806_v23  ;;  %v876_v34 = vrot.slane %v875_v29, 4 }
 0x14f   : > { %v809_v35 = vrot.slane %v808_v33, 2  ;;  %v877_v21 = vadd.f32 %v876_v34, %v875_v29 }
 0x151   : > { %v810_v36 = vadd.f32 %v809_v35, %v808_v33  ;;  %v878_v37 = vrot.slane %v877_v21, 2 }
 0x153   : > { %v879_v31 = vadd.f32 %v878_v37, %v877_v21  ;;  %v811_v39 = vrot.slane %v810_v36, 1 }
 0x155   : > { %v880_v40 = vrot.slane %v879_v31, 1  ;;  %v812_v19 = vadd.f32 %v811_v39, %v810_v36 }
 0x157   : > { %v881_v41 = vadd.f32 %v880_v40, %v879_v31 }
 0x159   : > { %v886_v42 = vsel %vm885_vm0, %v881_v41, 0.0 }
 0x15a   : > { %v887_v44 = vsel %vm884_vm1, %v812_v19, %v886_v42 }
 0x15b   : > { %v889_v46 = vadd.f32 %v888_v27, %v887_v44 }
 0x15d   : > { %890 = vst [vmem:[%s1399_s3] sm:$0xff] %v889_v46 }
 0x15e PF: > { %s14_s14 = sadd.s32 1, %s1177_s14   ;;  %s1400_s12 = smov %s1173_s13 }
 0x15f   : > { %p11_p6 = scmp.ge.s32.totalorder %s14_s14, 10   ;;  %s1401_s13 = smov %s1403_s15 }
 0x161   :  { %13 = sbr.rel (!%p11_p6) target bundleno = 2 (0x2), region = 81 }

// kernel: discriminator_forward.11
= control target key start
LH: loop header
LB: loop body
LE: loop exit
PB: predicated region body
PF: predicated region fallthrough
CT: control target
= control target key end

     0   :  { %s2340_s12 = smov 0   ;;  %s2342_s13 = smov 0   ;;  %s2867_s0 = inlined_call_operand.vmem [shape: bf16[512,2048], index: 0, kind: input, shape index: {}]   ;;  %s2868_s1 = inlined_call_operand.vmem [shape: bf16[2048,128], index: 1, kind: input, shape index: {}]   ;;  %s2869_s2 = inlined_call_operand.vmem [shape: f32[512,128], index: 2, kind: output, shape index: {0}]   ;;  %s2870_s3 = inlined_call_operand.vmem [shape: f32[8,128], index: 3, kind: output, shape index: {1}]  }
   0x1   :  { %s2344_s14 = smov 0   ;;  %s2346_s15 = smov 0  }
   0x2   :  { %s2348_s16 = smov 0   ;;  %s2350_s17 = smov 0  }
   0x3   :  { %s2352_s18 = smov 0  }
   0x4 LB: > { %s23_s19 = sadd.s32 1, %s2308_s16  ;;  %s26_s20 = sadd.s32 1, %s2312_s17  ;;  %s2316_s18 = sphi %s2352_s18, %s14_s18   ;;  %s2312_s17 = sphi %s2350_s17, %s2876_s17   ;;  %s2308_s16 = sphi %s2348_s16, %s2875_s16   ;;  %s2304_s15 = sphi %s2346_s15, %s2874_s15   ;;  %s2300_s14 = sphi %s2344_s14, %s2873_s14   ;;  %s2296_s13 = sphi %s2342_s13, %s2872_s13   ;;  %s2292_s12 = sphi %s2340_s12, %s2871_s12  }
   0x5   : > { %p24_p0 = scmp.ge.s32.totalorder %s23_s19, 4  ;;  %p42_p1 = scmp.ne.s32.totalorder %s2296_s13, %s2292_s12 }
   0x6   : > { %p43_p2 = scmp.eq.s32.totalorder %s2316_s18, 0  ;;  %s35_s24 = sadd.s32 1, %s2296_s13 }
   0x7   : > { %s2878_s19 = smov (%p24_p0, %s23_s19), 0  ;;  %s2880_s20 = smov (!%p24_p0, %s26_s20), %s2312_s17 }
   0x8   : > { %p44_p3 = por %p43_p2, %p42_p1  ;;  %p28_p4 = scmp.ge.s32.totalorder %s2880_s20, 2 }
   0x9   : > { %s31_s21 = ssub.s32 %s2308_s16, %s2878_s19  ;;  %p1739_p6 = scmp.ge.s32.totalorder %s2316_s18, 8 }
   0xa   : > { %s2882_s20 = smov (%p28_p4, %s2880_s20), 0 }
   0xb   : > { %s30_s22 = ssub.s32 %s2312_s17, %s2882_s20  ;;  %141 = sbr.rel (%p1739_p6) target bundleno = 57 (0x39), region = 16 }
   0xc   : > { %s32_s23 = sor.u32 %s31_s21, %s30_s22 }
   0xd   : > { %p33_p5 = scmp.eq.s32.totalorder %s32_s23, 0 }
   0xf   : > { %s2391_s25 = scalar_select %p33_p5, %s2296_s13, %s35_s24  }
  0x12   : > { %144 = sbr.rel (!%p44_p3) target bundleno = 57 (0x39), region = 20  ;;  %s146_s26 = sand.u32 (%p44_p3), 1, %s2296_s13  }
  0x13   : > { %s1742_s27 = sshll.u32 (%p44_p3), %s2308_s16, 2  ;;  %s1740_s28 = sshll.u32 (%p44_p3), %s146_s26, 9 }
  0x14   : > { %s1851_s29 = sshll.u32 (%p44_p3), %s2312_s17, 9  ;;  %s2405_s8 = scalar_lea.vmem (%p44_p3), [#allocation3], %s1740_s28 }
  0x15   : > { %s152_s30 = sadd.s32 (%p44_p3), %s1851_s29, %s1742_s27 }
  0x16   : > { %s1744_s4 = sshll.u32 (%p44_p3), %s152_s30, 2 }
  0x17   : > { %s2400_s7 = scalar_lea.vmem (%p44_p3), %s2867_s0, %s1744_s4 }
  0x18   : > { %v167_v0 = vld [vmem:[%s2400_s7] sm:$0xff] (%p44_p3)  ;;  %v169_v1 = vld [vmem:[%s2400_s7 + $0x8] sm:$0xff] (%p44_p3) }
  0x19   : > { %v171_v2 = vld [vmem:[%s2400_s7 + $0x40] sm:$0xff]  ;;  %168 = vst [vmem:[%s2405_s8] sm:$0xff] %v167_v0  ;;  %170 = vst [vmem:[%s2405_s8 + $0x8] sm:$0xff] %v169_v1  ;;  %v173_v3 = vld [vmem:[%s2400_s7 + $0x48] sm:$0xff] }
  0x1a   : > { %172 = vst [vmem:[%s2405_s8 + $0x10] sm:$0xff] %v171_v2  ;;  %v175_v4 = vld [vmem:[%s2400_s7 + $0x80] sm:$0xff]  ;;  %v177_v5 = vld [vmem:[%s2400_s7 + $0x88] sm:$0xff]  ;;  %174 = vst [vmem:[%s2405_s8 + $0x18] sm:$0xff] %v173_v3 }
  0x1b   : > { %176 = vst [vmem:[%s2405_s8 + $0x20] sm:$0xff] %v175_v4  ;;  %178 = vst [vmem:[%s2405_s8 + $0x28] sm:$0xff] %v177_v5  ;;  %v179_v6 = vld [vmem:[%s2400_s7 + $0xc0] sm:$0xff]  ;;  %v181_v7 = vld [vmem:[%s2400_s7 + $0xc8] sm:$0xff] }
  0x1c   : > { %v183_v8 = vld [vmem:[%s2400_s7 + $0x100] sm:$0xff]  ;;  %180 = vst [vmem:[%s2405_s8 + $0x30] sm:$0xff] %v179_v6  ;;  %182 = vst [vmem:[%s2405_s8 + $0x38] sm:$0xff] %v181_v7  ;;  %v185_v9 = vld [vmem:[%s2400_s7 + $0x108] sm:$0xff] }
  0x1d   : > { %184 = vst [vmem:[%s2405_s8 + $0x40] sm:$0xff] %v183_v8  ;;  %v187_v10 = vld [vmem:[%s2400_s7 + $0x140] sm:$0xff]  ;;  %v189_v11 = vld [vmem:[%s2400_s7 + $0x148] sm:$0xff]  ;;  %186 = vst [vmem:[%s2405_s8 + $0x48] sm:$0xff] %v185_v9 }
  0x1e   : > { %188 = vst [vmem:[%s2405_s8 + $0x50] sm:$0xff] %v187_v10  ;;  %190 = vst [vmem:[%s2405_s8 + $0x58] sm:$0xff] %v189_v11  ;;  %v191_v12 = vld [vmem:[%s2400_s7 + $0x180] sm:$0xff]  ;;  %v193_v13 = vld [vmem:[%s2400_s7 + $0x188] sm:$0xff] }
  0x1f   : > { %v195_v14 = vld [vmem:[%s2400_s7 + $0x1c0] sm:$0xff]  ;;  %192 = vst [vmem:[%s2405_s8 + $0x60] sm:$0xff] %v191_v12  ;;  %194 = vst [vmem:[%s2405_s8 + $0x68] sm:$0xff] %v193_v13  ;;  %v197_v15 = vld [vmem:[%s2400_s7 + $0x1c8] sm:$0xff] }
  0x20   : > { %196 = vst [vmem:[%s2405_s8 + $0x70] sm:$0xff] %v195_v14  ;;  %v199_v16 = vld [vmem:[%s2400_s7 + $0x200] sm:$0xff]  ;;  %v201_v17 = vld [vmem:[%s2400_s7 + $0x208] sm:$0xff]  ;;  %198 = vst [vmem:[%s2405_s8 + $0x78] sm:$0xff] %v197_v15 }
  0x21   : > { %200 = vst [vmem:[%s2405_s8 + $0x80] sm:$0xff] %v199_v16  ;;  %202 = vst [vmem:[%s2405_s8 + $0x88] sm:$0xff] %v201_v17  ;;  %v203_v18 = vld [vmem:[%s2400_s7 + $0x240] sm:$0xff]  ;;  %v205_v19 = vld [vmem:[%s2400_s7 + $0x248] sm:$0xff] }
  0x22   : > { %v207_v20 = vld [vmem:[%s2400_s7 + $0x280] sm:$0xff]  ;;  %204 = vst [vmem:[%s2405_s8 + $0x90] sm:$0xff] %v203_v18  ;;  %206 = vst [vmem:[%s2405_s8 + $0x98] sm:$0xff] %v205_v19  ;;  %v209_v21 = vld [vmem:[%s2400_s7 + $0x288] sm:$0xff] }
  0x23   : > { %208 = vst [vmem:[%s2405_s8 + $0xa0] sm:$0xff] %v207_v20  ;;  %v211_v22 = vld [vmem:[%s2400_s7 + $0x2c0] sm:$0xff]  ;;  %v213_v23 = vld [vmem:[%s2400_s7 + $0x2c8] sm:$0xff]  ;;  %210 = vst [vmem:[%s2405_s8 + $0xa8] sm:$0xff] %v209_v21 }
  0x24   : > { %212 = vst [vmem:[%s2405_s8 + $0xb0] sm:$0xff] %v211_v22  ;;  %214 = vst [vmem:[%s2405_s8 + $0xb8] sm:$0xff] %v213_v23  ;;  %v215_v24 = vld [vmem:[%s2400_s7 + $0x300] sm:$0xff]  ;;  %v217_v25 = vld [vmem:[%s2400_s7 + $0x308] sm:$0xff] }
  0x25   : > { %v219_v26 = vld [vmem:[%s2400_s7 + $0x340] sm:$0xff]  ;;  %216 = vst [vmem:[%s2405_s8 + $0xc0] sm:$0xff] %v215_v24  ;;  %218 = vst [vmem:[%s2405_s8 + $0xc8] sm:$0xff] %v217_v25  ;;  %v221_v27 = vld [vmem:[%s2400_s7 + $0x348] sm:$0xff] }
  0x26   : > { %220 = vst [vmem:[%s2405_s8 + $0xd0] sm:$0xff] %v219_v26  ;;  %v223_v28 = vld [vmem:[%s2400_s7 + $0x380] sm:$0xff]  ;;  %v225_v29 = vld [vmem:[%s2400_s7 + $0x388] sm:$0xff]  ;;  %222 = vst [vmem:[%s2405_s8 + $0xd8] sm:$0xff] %v221_v27 }
  0x27   : > { %224 = vst [vmem:[%s2405_s8 + $0xe0] sm:$0xff] %v223_v28  ;;  %226 = vst [vmem:[%s2405_s8 + $0xe8] sm:$0xff] %v225_v29  ;;  %v227_v30 = vld [vmem:[%s2400_s7 + $0x3c0] sm:$0xff]  ;;  %v229_v31 = vld [vmem:[%s2400_s7 + $0x3c8] sm:$0xff] }
  0x28   : > { %v231_v32 = vld [vmem:[%s2400_s7 + $0x400] sm:$0xff]  ;;  %228 = vst [vmem:[%s2405_s8 + $0xf0] sm:$0xff] %v227_v30  ;;  %230 = vst [vmem:[%s2405_s8 + $0xf8] sm:$0xff] %v229_v31  ;;  %v233_v33 = vld [vmem:[%s2400_s7 + $0x408] sm:$0xff] }
  0x29   : > { %232 = vst [vmem:[%s2405_s8 + $0x100] sm:$0xff] %v231_v32  ;;  %v235_v34 = vld [vmem:[%s2400_s7 + $0x440] sm:$0xff]  ;;  %v237_v35 = vld [vmem:[%s2400_s7 + $0x448] sm:$0xff]  ;;  %234 = vst [vmem:[%s2405_s8 + $0x108] sm:$0xff] %v233_v33 }
  0x2a   : > { %236 = vst [vmem:[%s2405_s8 + $0x110] sm:$0xff] %v235_v34  ;;  %238 = vst [vmem:[%s2405_s8 + $0x118] sm:$0xff] %v237_v35  ;;  %v239_v36 = vld [vmem:[%s2400_s7 + $0x480] sm:$0xff]  ;;  %v241_v37 = vld [vmem:[%s2400_s7 + $0x488] sm:$0xff] }
  0x2b   : > { %v243_v38 = vld [vmem:[%s2400_s7 + $0x4c0] sm:$0xff]  ;;  %240 = vst [vmem:[%s2405_s8 + $0x120] sm:$0xff] %v239_v36  ;;  %242 = vst [vmem:[%s2405_s8 + $0x128] sm:$0xff] %v241_v37  ;;  %v245_v39 = vld [vmem:[%s2400_s7 + $0x4c8] sm:$0xff] }
  0x2c   : > { %244 = vst [vmem:[%s2405_s8 + $0x130] sm:$0xff] %v243_v38  ;;  %v247_v40 = vld [vmem:[%s2400_s7 + $0x500] sm:$0xff]  ;;  %v249_v41 = vld [vmem:[%s2400_s7 + $0x508] sm:$0xff]  ;;  %246 = vst [vmem:[%s2405_s8 + $0x138] sm:$0xff] %v245_v39 }
  0x2d   : > { %248 = vst [vmem:[%s2405_s8 + $0x140] sm:$0xff] %v247_v40  ;;  %250 = vst [vmem:[%s2405_s8 + $0x148] sm:$0xff] %v249_v41  ;;  %v251_v42 = vld [vmem:[%s2400_s7 + $0x540] sm:$0xff]  ;;  %v253_v43 = vld [vmem:[%s2400_s7 + $0x548] sm:$0xff] }
  0x2e   : > { %v255_v44 = vld [vmem:[%s2400_s7 + $0x580] sm:$0xff]  ;;  %252 = vst [vmem:[%s2405_s8 + $0x150] sm:$0xff] %v251_v42  ;;  %254 = vst [vmem:[%s2405_s8 + $0x158] sm:$0xff] %v253_v43  ;;  %v257_v45 = vld [vmem:[%s2400_s7 + $0x588] sm:$0xff] }
  0x2f   : > { %256 = vst [vmem:[%s2405_s8 + $0x160] sm:$0xff] %v255_v44  ;;  %v259_v46 = vld [vmem:[%s2400_s7 + $0x5c0] sm:$0xff]  ;;  %v261_v47 = vld [vmem:[%s2400_s7 + $0x5c8] sm:$0xff]  ;;  %258 = vst [vmem:[%s2405_s8 + $0x168] sm:$0xff] %v257_v45 }
  0x30   : > { %260 = vst [vmem:[%s2405_s8 + $0x170] sm:$0xff] %v259_v46  ;;  %262 = vst [vmem:[%s2405_s8 + $0x178] sm:$0xff] %v261_v47  ;;  %v263_v48 = vld [vmem:[%s2400_s7 + $0x600] sm:$0xff]  ;;  %v265_v49 = vld [vmem:[%s2400_s7 + $0x608] sm:$0xff] }
  0x31   : > { %v267_v50 = vld [vmem:[%s2400_s7 + $0x640] sm:$0xff]  ;;  %264 = vst [vmem:[%s2405_s8 + $0x180] sm:$0xff] %v263_v48  ;;  %266 = vst [vmem:[%s2405_s8 + $0x188] sm:$0xff] %v265_v49  ;;  %v269_v51 = vld [vmem:[%s2400_s7 + $0x648] sm:$0xff] }
  0x32   : > { %268 = vst [vmem:[%s2405_s8 + $0x190] sm:$0xff] %v267_v50  ;;  %v271_v52 = vld [vmem:[%s2400_s7 + $0x680] sm:$0xff]  ;;  %v273_v53 = vld [vmem:[%s2400_s7 + $0x688] sm:$0xff]  ;;  %270 = vst [vmem:[%s2405_s8 + $0x198] sm:$0xff] %v269_v51 }
  0x33   : > { %272 = vst [vmem:[%s2405_s8 + $0x1a0] sm:$0xff] %v271_v52  ;;  %274 = vst [vmem:[%s2405_s8 + $0x1a8] sm:$0xff] %v273_v53  ;;  %v275_v54 = vld [vmem:[%s2400_s7 + $0x6c0] sm:$0xff]  ;;  %v277_v55 = vld [vmem:[%s2400_s7 + $0x6c8] sm:$0xff] }
  0x34   : > { %v279_v56 = vld [vmem:[%s2400_s7 + $0x700] sm:$0xff]  ;;  %276 = vst [vmem:[%s2405_s8 + $0x1b0] sm:$0xff] %v275_v54  ;;  %278 = vst [vmem:[%s2405_s8 + $0x1b8] sm:$0xff] %v277_v55  ;;  %v281_v57 = vld [vmem:[%s2400_s7 + $0x708] sm:$0xff] }
  0x35   : > { %280 = vst [vmem:[%s2405_s8 + $0x1c0] sm:$0xff] %v279_v56  ;;  %v283_v58 = vld [vmem:[%s2400_s7 + $0x740] sm:$0xff]  ;;  %v285_v59 = vld [vmem:[%s2400_s7 + $0x748] sm:$0xff]  ;;  %282 = vst [vmem:[%s2405_s8 + $0x1c8] sm:$0xff] %v281_v57 }
  0x36   : > { %284 = vst [vmem:[%s2405_s8 + $0x1d0] sm:$0xff] %v283_v58  ;;  %286 = vst [vmem:[%s2405_s8 + $0x1d8] sm:$0xff] %v285_v59  ;;  %v287_v60 = vld [vmem:[%s2400_s7 + $0x780] sm:$0xff]  ;;  %v289_v61 = vld [vmem:[%s2400_s7 + $0x788] sm:$0xff] }
  0x37   : > { %v291_v62 = vld [vmem:[%s2400_s7 + $0x7c0] sm:$0xff]  ;;  %288 = vst [vmem:[%s2405_s8 + $0x1e0] sm:$0xff] %v287_v60  ;;  %290 = vst [vmem:[%s2405_s8 + $0x1e8] sm:$0xff] %v289_v61  ;;  %v293_v63 = vld [vmem:[%s2400_s7 + $0x7c8] sm:$0xff] }
  0x38   : > { %292 = vst [vmem:[%s2405_s8 + $0x1f0] sm:$0xff] %v291_v62  ;;  %294 = vst [vmem:[%s2405_s8 + $0x1f8] sm:$0xff] %v293_v63 }
  0x39 PF: > { %p1745_p7 = scmp.ge.s32.totalorder %s2316_s18, 1  ;;  %p308_p8 = scmp.lt.s32.totalorder %s2316_s18, 9 }
  0x3b   : > { %p309_p9 = pnand %p1745_p7, %p308_p8 }
  0x3c   : > { %s315_s9 = sand.u32 (!%p309_p9), 1, %s2292_s12   ;;  %s1747_s10 = sshll.u32 (!%p309_p9), %s2300_s14, 6 }
  0x3d   : > { %312 = sbr.rel (%p309_p9) target bundleno = 534 (0x216), region = 47  ;;  %s1746_s11 = sshll.u32 (!%p309_p9), %s315_s9, 9 }
  0x3e   : > { %p346_p10 = scmp.lt.s32.totalorder (!%p309_p9), %s1747_s10, 255  ;;  %s1749_s21 = sshll.u32 (!%p309_p9), %s2304_s15, 5 }
  0x3f   : > { %p352_p11 = scmp.lt.s32.totalorder (!%p309_p9), %s1749_s21, 63  ;;  %p358_p12 = scmp.eq.s32.totalorder (!%p309_p9), %s2304_s15, 0 }
  0x40   : > { %p359_p13 = scmp.eq.s32.totalorder (!%p309_p9), %s2300_s14, 0  ;;  %s2549_s30 = scalar_lea.vmem (!%p309_p9), [#allocation3], %s1746_s11 }
  0x42   : > { %p360_p0 = pnand (!%p309_p9), %p359_p13, %p358_p12 }
  0x44   : > { %s2884_s10 = smov (!%p346_p10, %s1747_s10), 255  ;;  %s2886_s21 = smov (!%p352_p11, %s1749_s21), 63 }
  0x45   : > { %s1748_s22 = sshll.u32 %s2884_s10, 2  ;;  %s1750_s27 = sshll.u32 %s2886_s21, 3  ;;  %v2318_v0 = vmov (!%p360_p0), 0.0  }
  0x46   : > { %s2542_s26 = scalar_lea.vmem %s2868_s1, %s1748_s22  ;;  %s2547_s12 = scalar_lea.vmem %s2869_s2, %s1750_s27  ;;  %364 = vst [vmem:[%s2870_s3] sm:$0xff] (!%p360_p0), %v2318_v0 }
  0x47   : > { %363 = sbr.rel (%p360_p0) target bundleno = 78 (0x4e), region = 55 }
  0x4e PF: > { %p1751_p1 = scmp.ne.s32.totalorder %s2300_s14, 0 }
  0x4f   : > { %v2319_v1 = vmov (!%p1751_p1), 0.0  }
  0x50   : > { %367 = sbr.rel (%p1751_p1) target bundleno = 96 (0x60), region = 59  ;;  %368 = vst [vmem:[#allocation2] sm:$0xff] (!%p1751_p1), %v2319_v1  ;;  %369 = vst [vmem:[#allocation2 + $0x8] sm:$0xff] (!%p1751_p1), %v2319_v1 }
  0x51   : > { %370 = vst [vmem:[#allocation2 + $0x10] sm:$0xff] (!%p1751_p1), %v2319_v1  ;;  %371 = vst [vmem:[#allocation2 + $0x18] sm:$0xff] (!%p1751_p1), %v2319_v1 }
  0x52   : > { %372 = vst [vmem:[#allocation2 + $0x20] sm:$0xff] (!%p1751_p1), %v2319_v1  ;;  %373 = vst [vmem:[#allocation2 + $0x28] sm:$0xff] (!%p1751_p1), %v2319_v1 }
  0x53   : > { %374 = vst [vmem:[#allocation2 + $0x30] sm:$0xff] (!%p1751_p1), %v2319_v1  ;;  %375 = vst [vmem:[#allocation2 + $0x38] sm:$0xff] (!%p1751_p1), %v2319_v1 }
  0x54   : > { %376 = vst [vmem:[#allocation2 + $0x40] sm:$0xff] (!%p1751_p1), %v2319_v1  ;;  %377 = vst [vmem:[#allocation2 + $0x48] sm:$0xff] (!%p1751_p1), %v2319_v1 }
  0x55   : > { %378 = vst [vmem:[#allocation2 + $0x50] sm:$0xff] (!%p1751_p1), %v2319_v1  ;;  %379 = vst [vmem:[#allocation2 + $0x58] sm:$0xff] (!%p1751_p1), %v2319_v1 }
  0x56   : > { %380 = vst [vmem:[#allocation2 + $0x60] sm:$0xff] (!%p1751_p1), %v2319_v1  ;;  %381 = vst [vmem:[#allocation2 + $0x68] sm:$0xff] (!%p1751_p1), %v2319_v1 }
  0x57   : > { %382 = vst [vmem:[#allocation2 + $0x70] sm:$0xff] %v2319_v1  ;;  %383 = vst [vmem:[#allocation2 + $0x78] sm:$0xff] %v2319_v1 }
  0x58   : > { %384 = vst [vmem:[#allocation2 + $0x80] sm:$0xff] %v2319_v1  ;;  %385 = vst [vmem:[#allocation2 + $0x88] sm:$0xff] %v2319_v1 }
  0x59   : > { %386 = vst [vmem:[#allocation2 + $0x90] sm:$0xff] %v2319_v1  ;;  %387 = vst [vmem:[#allocation2 + $0x98] sm:$0xff] %v2319_v1 }
  0x5a   : > { %388 = vst [vmem:[#allocation2 + $0xa0] sm:$0xff] %v2319_v1  ;;  %389 = vst [vmem:[#allocation2 + $0xa8] sm:$0xff] %v2319_v1 }
  0x5b   : > { %390 = vst [vmem:[#allocation2 + $0xb0] sm:$0xff] %v2319_v1  ;;  %391 = vst [vmem:[#allocation2 + $0xb8] sm:$0xff] %v2319_v1 }
  0x5c   : > { %392 = vst [vmem:[#allocation2 + $0xc0] sm:$0xff] %v2319_v1  ;;  %393 = vst [vmem:[#allocation2 + $0xc8] sm:$0xff] %v2319_v1 }
  0x5d   : > { %394 = vst [vmem:[#allocation2 + $0xd0] sm:$0xff] %v2319_v1  ;;  %395 = vst [vmem:[#allocation2 + $0xd8] sm:$0xff] %v2319_v1 }
  0x5e   : > { %396 = vst [vmem:[#allocation2 + $0xe0] sm:$0xff] %v2319_v1  ;;  %397 = vst [vmem:[#allocation2 + $0xe8] sm:$0xff] %v2319_v1 }
  0x5f   : > { %398 = vst [vmem:[#allocation2 + $0xf0] sm:$0xff] %v2319_v1  ;;  %399 = vst [vmem:[#allocation2 + $0xf8] sm:$0xff] %v2319_v1 }
  0x60 PF: > { %v2134_v2 = vld [vmem:[%s2542_s26 + $0x40] sm:$0xff]   ;;  %v2138_v6 = vld [vmem:[%s2542_s26 + $0x48] sm:$0xff]   ;;  %v2142_v10 = vld [vmem:[%s2542_s26 + $0x50] sm:$0xff]   ;;  %p1848_p2 = scmp.ne.s32.totalorder %s2300_s14, 3 }
  0x61   : > { %v2135_v3 = vld [vmem:[%s2542_s26 + $0xc0] sm:$0xff]   ;;  %1852 = vmatprep.subr.bf16.mxu0 %v2134_v2  ;;  %v2139_v7 = vld [vmem:[%s2542_s26 + $0xc8] sm:$0xff]   ;;  %v2143_v11 = vld [vmem:[%s2542_s26 + $0xd0] sm:$0xff]  }
  0x62   : > { %v2136_v4 = vld [vmem:[%s2542_s26] sm:$0xff]   ;;  %1964 = vmatprep.subr.bf16.mxu1 %v2135_v3  ;;  %v2140_v8 = vld [vmem:[%s2542_s26 + $0x8] sm:$0xff]   ;;  %v2144_v12 = vld [vmem:[%s2542_s26 + $0x10] sm:$0xff]  }
  0x63   : > { %v2137_v5 = vld [vmem:[%s2542_s26 + $0x80] sm:$0xff]   ;;  %1853 = vmatpush3.bf16.msra.mxu0 %v2136_v4  ;;  %v2141_v9 = vld [vmem:[%s2542_s26 + $0x88] sm:$0xff]   ;;  %v2145_v13 = vld [vmem:[%s2542_s26 + $0x90] sm:$0xff]  }
  0x64   : > { %1965 = vmatpush3.bf16.msra.mxu1 %v2137_v5  ;;  %1854 = vmatprep.subr.bf16.mxu0 %v2138_v6  ;;  %v2146_v14 = vld [vmem:[%s2542_s26 + $0x58] sm:$0xff]   ;;  %v2150_v18 = vld [vmem:[%s2542_s26 + $0x60] sm:$0xff]   ;;  %v2154_v22 = vld [vmem:[%s2542_s26 + $0x68] sm:$0xff]  }
  0x65   : > { %1966 = vmatprep.subr.bf16.mxu1 %v2139_v7  ;;  %v2147_v15 = vld [vmem:[%s2542_s26 + $0xd8] sm:$0xff]   ;;  %v2151_v19 = vld [vmem:[%s2542_s26 + $0xe0] sm:$0xff]   ;;  %v2155_v23 = vld [vmem:[%s2542_s26 + $0xe8] sm:$0xff]  }
  0x66   : > { %v2148_v16 = vld [vmem:[%s2542_s26 + $0x18] sm:$0xff]   ;;  %v2152_v20 = vld [vmem:[%s2542_s26 + $0x20] sm:$0xff]   ;;  %v2156_v24 = vld [vmem:[%s2542_s26 + $0x28] sm:$0xff]  }
  0x67   : > { %1855 = vmatpush3.bf16.msra.mxu0 %v2140_v8  ;;  %v2149_v17 = vld [vmem:[%s2542_s26 + $0x98] sm:$0xff]   ;;  %v2153_v21 = vld [vmem:[%s2542_s26 + $0xa0] sm:$0xff]   ;;  %v2157_v25 = vld [vmem:[%s2542_s26 + $0xa8] sm:$0xff]  }
  0x68   : > { %1967 = vmatpush3.bf16.msra.mxu1 %v2141_v9  ;;  %1856 = vmatprep.subr.bf16.mxu0 %v2142_v10  ;;  %v2158_v26 = vld [vmem:[%s2542_s26 + $0x70] sm:$0xff]   ;;  %v2162_v30 = vld [vmem:[%s2542_s26 + $0x78] sm:$0xff]  }
  0x69   : > { %1968 = vmatprep.subr.bf16.mxu1 %v2143_v11  ;;  %v2159_v27 = vld [vmem:[%s2542_s26 + $0xf0] sm:$0xff]   ;;  %v2163_v31 = vld [vmem:[%s2542_s26 + $0xf8] sm:$0xff]  }
  0x6a   : > { %v2160_v28 = vld [vmem:[%s2542_s26 + $0x30] sm:$0xff]   ;;  %v2164_v32 = vld [vmem:[%s2542_s26 + $0x38] sm:$0xff]  }
  0x6b   : > { %1857 = vmatpush3.bf16.msra.mxu0 %v2144_v12  ;;  %v2161_v29 = vld [vmem:[%s2542_s26 + $0xb0] sm:$0xff]   ;;  %v2165_v33 = vld [vmem:[%s2542_s26 + $0xb8] sm:$0xff]  }
  0x6c   : > { %1969 = vmatpush3.bf16.msra.mxu1 %v2145_v13  ;;  %1858 = vmatprep.subr.bf16.mxu0 %v2146_v14  ;;  %v2166_v34 = vld [vmem:[%s2549_s30] ss:$16 sps:$4 sm:$0xff]   ;;  %v2168_v35 = vld [vmem:[%s2549_s30 + $0x4] ss:$16 sps:$4 sm:$0xff]   ;;  %v2169_v36 = vld [vmem:[%s2549_s30 + $0x8] ss:$16 sps:$4 sm:$0xff]  }
  0x6d   : > { %1970 = vmatprep.subr.bf16.mxu1 %v2147_v15  ;;  %v2171_v37 = vld [vmem:[%s2549_s30 + $0xc] ss:$16 sps:$4 sm:$0xff]   ;;  %1104 = vmatprep.mubr.bf16.mxu0 %v2168_v35  ;;  %v2172_v38 = vld [vmem:[%s2549_s30 + $0x24] ss:$16 sps:$4 sm:$0xff]   ;;  %v2176_v40 = vld [vmem:[%s2549_s30 + $0x20] ss:$16 sps:$4 sm:$0xff]  }
  0x6e   : > { %1265 = vmatprep.mubr.bf16.mxu1 %v2171_v37  ;;  %v2174_v39 = vld [vmem:[%s2549_s30 + $0x2c] ss:$16 sps:$4 sm:$0xff]   ;;  %v2177_v41 = vld [vmem:[%s2549_s30 + $0x28] ss:$16 sps:$4 sm:$0xff]   ;;  %v2178_v42 = vld [vmem:[%s2549_s30 + $0x44] ss:$16 sps:$4 sm:$0xff]  }
  0x6f   : > { %1859 = vmatpush3.bf16.msra.mxu0 %v2148_v16  ;;  %v2180_v43 = vld [vmem:[%s2549_s30 + $0x4c] ss:$16 sps:$4 sm:$0xff]   ;;  %v2182_v44 = vld [vmem:[%s2549_s30 + $0x40] ss:$16 sps:$4 sm:$0xff]   ;;  %v2183_v45 = vld [vmem:[%s2549_s30 + $0x48] ss:$16 sps:$4 sm:$0xff]  }
  0x70   : > { %1971 = vmatpush3.bf16.msra.mxu1 %v2149_v17  ;;  %1860 = vmatprep.subr.bf16.mxu0 %v2150_v18  ;;  %v2184_v46 = vld [vmem:[%s2549_s30 + $0x64] ss:$16 sps:$4 sm:$0xff]   ;;  %v2186_v47 = vld [vmem:[%s2549_s30 + $0x6c] ss:$16 sps:$4 sm:$0xff]   ;;  %v2188_v48 = vld [vmem:[%s2549_s30 + $0x60] ss:$16 sps:$4 sm:$0xff]  }
  0x71   : > { %1972 = vmatprep.subr.bf16.mxu1 %v2151_v19  ;;  %v2189_v49 = vld [vmem:[%s2549_s30 + $0x68] ss:$16 sps:$4 sm:$0xff]   ;;  %v2190_v50 = vld [vmem:[%s2549_s30 + $0x84] ss:$16 sps:$4 sm:$0xff]   ;;  %v2192_v51 = vld [vmem:[%s2549_s30 + $0x8c] ss:$16 sps:$4 sm:$0xff]  }
  0x72   : > { %v2194_v52 = vld [vmem:[%s2549_s30 + $0x80] ss:$16 sps:$4 sm:$0xff]   ;;  %v2195_v53 = vld [vmem:[%s2549_s30 + $0x88] ss:$16 sps:$4 sm:$0xff]   ;;  %v2196_v54 = vld [vmem:[%s2549_s30 + $0xa4] ss:$16 sps:$4 sm:$0xff]  }
  0x73   : > { %1861 = vmatpush3.bf16.msra.mxu0 %v2152_v20  ;;  %v2198_v55 = vld [vmem:[%s2549_s30 + $0xac] ss:$16 sps:$4 sm:$0xff]   ;;  %v2200_v56 = vld [vmem:[%s2549_s30 + $0xa0] ss:$16 sps:$4 sm:$0xff]   ;;  %v2201_v57 = vld [vmem:[%s2549_s30 + $0xa8] ss:$16 sps:$4 sm:$0xff]  }
  0x74   : > { %1973 = vmatpush3.bf16.msra.mxu1 %v2153_v21  ;;  %1862 = vmatprep.subr.bf16.mxu0 %v2154_v22  ;;  %v2202_v58 = vld [vmem:[%s2549_s30 + $0xc4] ss:$16 sps:$4 sm:$0xff]   ;;  %v2204_v59 = vld [vmem:[%s2549_s30 + $0xcc] ss:$16 sps:$4 sm:$0xff]   ;;  %v2206_v60 = vld [vmem:[%s2549_s30 + $0xc0] ss:$16 sps:$4 sm:$0xff]  }
  0x75   : > { %1974 = vmatprep.subr.bf16.mxu1 %v2155_v23  ;;  %v2207_v61 = vld [vmem:[%s2549_s30 + $0xc8] ss:$16 sps:$4 sm:$0xff]   ;;  %v2208_v62 = vld [vmem:[%s2549_s30 + $0xe4] ss:$16 sps:$4 sm:$0xff]   ;;  %v2210_v63 = vld [vmem:[%s2549_s30 + $0xec] ss:$16 sps:$4 sm:$0xff]  }
  0x76   : > { %v2212_v0 = vld [vmem:[%s2549_s30 + $0xe0] ss:$16 sps:$4 sm:$0xff]   ;;  %v2213_v1 = vld [vmem:[%s2549_s30 + $0xe8] ss:$16 sps:$4 sm:$0xff]   ;;  %v2214_v2 = vld [vmem:[%s2549_s30 + $0x104] ss:$16 sps:$4 sm:$0xff]  }
  0x77   : > { %1863 = vmatpush3.bf16.msra.mxu0 %v2156_v24  ;;  %v2216_v3 = vld [vmem:[%s2549_s30 + $0x10c] ss:$16 sps:$4 sm:$0xff]   ;;  %v2218_v4 = vld [vmem:[%s2549_s30 + $0x100] ss:$16 sps:$4 sm:$0xff]   ;;  %v2219_v5 = vld [vmem:[%s2549_s30 + $0x108] ss:$16 sps:$4 sm:$0xff]  }
  0x78   : > { %1975 = vmatpush3.bf16.msra.mxu1 %v2157_v25  ;;  %1864 = vmatprep.subr.bf16.mxu0 %v2158_v26  ;;  %v2220_v6 = vld [vmem:[%s2549_s30 + $0x124] ss:$16 sps:$4 sm:$0xff]   ;;  %v2222_v7 = vld [vmem:[%s2549_s30 + $0x12c] ss:$16 sps:$4 sm:$0xff]   ;;  %v2224_v8 = vld [vmem:[%s2549_s30 + $0x120] ss:$16 sps:$4 sm:$0xff]  }
  0x79   : > { %1976 = vmatprep.subr.bf16.mxu1 %v2159_v27  ;;  %v2225_v9 = vld [vmem:[%s2549_s30 + $0x128] ss:$16 sps:$4 sm:$0xff]   ;;  %v2226_v10 = vld [vmem:[%s2549_s30 + $0x144] ss:$16 sps:$4 sm:$0xff]   ;;  %v2228_v11 = vld [vmem:[%s2549_s30 + $0x14c] ss:$16 sps:$4 sm:$0xff]  }
  0x7a   : > { %v2230_v12 = vld [vmem:[%s2549_s30 + $0x140] ss:$16 sps:$4 sm:$0xff]   ;;  %v2231_v13 = vld [vmem:[%s2549_s30 + $0x148] ss:$16 sps:$4 sm:$0xff]   ;;  %v2232_v14 = vld [vmem:[%s2549_s30 + $0x164] ss:$16 sps:$4 sm:$0xff]  }
  0x7b   : > { %1865 = vmatpush3.bf16.msra.mxu0 %v2160_v28  ;;  %v2234_v15 = vld [vmem:[%s2549_s30 + $0x16c] ss:$16 sps:$4 sm:$0xff]   ;;  %v2236_v16 = vld [vmem:[%s2549_s30 + $0x160] ss:$16 sps:$4 sm:$0xff]   ;;  %v2237_v17 = vld [vmem:[%s2549_s30 + $0x168] ss:$16 sps:$4 sm:$0xff]  }
  0x7c   : > { %1977 = vmatpush3.bf16.msra.mxu1 %v2161_v29  ;;  %1866 = vmatprep.subr.bf16.mxu0 %v2162_v30  ;;  %v2238_v18 = vld [vmem:[%s2549_s30 + $0x184] ss:$16 sps:$4 sm:$0xff]   ;;  %v2240_v19 = vld [vmem:[%s2549_s30 + $0x18c] ss:$16 sps:$4 sm:$0xff]   ;;  %v2242_v20 = vld [vmem:[%s2549_s30 + $0x180] ss:$16 sps:$4 sm:$0xff]  }
  0x7d   : > { %1978 = vmatprep.subr.bf16.mxu1 %v2163_v31  ;;  %v2243_v21 = vld [vmem:[%s2549_s30 + $0x188] ss:$16 sps:$4 sm:$0xff]   ;;  %v2244_v22 = vld [vmem:[%s2549_s30 + $0x1a4] ss:$16 sps:$4 sm:$0xff]   ;;  %v2246_v23 = vld [vmem:[%s2549_s30 + $0x1ac] ss:$16 sps:$4 sm:$0xff]  }
  0x7e   : > { %v2248_v24 = vld [vmem:[%s2549_s30 + $0x1a0] ss:$16 sps:$4 sm:$0xff]   ;;  %v2249_v25 = vld [vmem:[%s2549_s30 + $0x1a8] ss:$16 sps:$4 sm:$0xff]   ;;  %v2250_v26 = vld [vmem:[%s2549_s30 + $0x1c4] ss:$16 sps:$4 sm:$0xff]  }
  0x7f   : > { %1867 = vmatpush3.bf16.msra.mxu0 %v2164_v32  ;;  %v2252_v27 = vld [vmem:[%s2549_s30 + $0x1cc] ss:$16 sps:$4 sm:$0xff]   ;;  %v2254_v28 = vld [vmem:[%s2549_s30 + $0x1c0] ss:$16 sps:$4 sm:$0xff]   ;;  %v2255_v29 = vld [vmem:[%s2549_s30 + $0x1c8] ss:$16 sps:$4 sm:$0xff]  }
  0x80   : > { %1979 = vmatpush3.bf16.msra.mxu1 %v2165_v33  ;;  %v2256_v30 = vld [vmem:[%s2549_s30 + $0x1e4] ss:$16 sps:$4 sm:$0xff]   ;;  %v2258_v31 = vld [vmem:[%s2549_s30 + $0x1ec] ss:$16 sps:$4 sm:$0xff]   ;;  %v2260_v32 = vld [vmem:[%s2549_s30 + $0x1e0] ss:$16 sps:$4 sm:$0xff]  }
  0x81   : > { %v2261_v33 = vld [vmem:[%s2549_s30 + $0x1e8] ss:$16 sps:$4 sm:$0xff]  }
  0x82   : > { %1105 = vmatmul.mubr.bf16.vlgmr.msra.gmra.mrb[0].mxu0 %v2166_v34 }
  0x83   : > { %1266 = vmatmul.mubr.bf16.vlgmr.msra.gmra.mrb[0].mxu1 %v2169_v36  ;;  %1112 = vmatprep.mubr.bf16.mxu0 %v2172_v38 }
  0x84   : > { %1273 = vmatprep.mubr.bf16.mxu1 %v2174_v39 }
  0x8a   : > { %1113 = vmatmul.mubr.bf16.gmra.mrb[4].mxu0 %v2176_v40 }
  0x8b   : > { %1274 = vmatmul.mubr.bf16.gmra.mrb[4].mxu1 %v2177_v41  ;;  %1120 = vmatprep.mubr.bf16.mxu0 %v2178_v42 }
  0x8c   : > { %1281 = vmatprep.mubr.bf16.mxu1 %v2180_v43  ;;  %v400_v43 = vld [vmem:[#allocation2] sm:$0xff] }
  0x92   : > { %1121 = vmatmul.mubr.bf16.gmra.mrb[8].mxu0 %v2182_v44 }
  0x93   : > { %1282 = vmatmul.mubr.bf16.gmra.mrb[8].mxu1 %v2183_v45  ;;  %1128 = vmatprep.mubr.bf16.mxu0 %v2184_v46 }
  0x94   : > { %1289 = vmatprep.mubr.bf16.mxu1 %v2186_v47 }
  0x9a   : > { %1129 = vmatmul.mubr.bf16.gmra.mrb[12].mxu0 %v2188_v48  ;;  %v401_v48 = vld [vmem:[#allocation2 + $0x8] sm:$0xff] }
  0x9b   : > { %1290 = vmatmul.mubr.bf16.gmra.mrb[12].mxu1 %v2189_v49  ;;  %1136 = vmatprep.mubr.bf16.mxu0 %v2190_v50 }
  0x9c   : > { %1297 = vmatprep.mubr.bf16.mxu1 %v2192_v51 }
  0xa2   : > { %1137 = vmatmul.mubr.bf16.gmra.mrb[16].mxu0 %v2194_v52 }
  0xa3   : > { %1298 = vmatmul.mubr.bf16.gmra.mrb[16].mxu1 %v2195_v53  ;;  %1144 = vmatprep.mubr.bf16.mxu0 %v2196_v54 }
  0xa4   : > { %1305 = vmatprep.mubr.bf16.mxu1 %v2198_v55 }
  0xaa   : > { %1145 = vmatmul.mubr.bf16.gmra.mrb[20].mxu0 %v2200_v56 }
  0xab   : > { %1306 = vmatmul.mubr.bf16.gmra.mrb[20].mxu1 %v2201_v57  ;;  %1152 = vmatprep.mubr.bf16.mxu0 %v2202_v58 }
  0xac   : > { %1313 = vmatprep.mubr.bf16.mxu1 %v2204_v59 }
  0xb2   : > { %1153 = vmatmul.mubr.bf16.gmra.mrb[24].mxu0 %v2206_v60 }
  0xb3   : > { %1314 = vmatmul.mubr.bf16.gmra.mrb[24].mxu1 %v2207_v61  ;;  %1160 = vmatprep.mubr.bf16.mxu0 %v2208_v62  ;;  %v402_v61 = vld [vmem:[#allocation2 + $0x10] sm:$0xff] }
  0xb4   : > { %1321 = vmatprep.mubr.bf16.mxu1 %v2210_v63 }
  0xba   : > { %1161 = vmatmul.mubr.bf16.gmra.mrb[28].mxu0 %v2212_v0 }
  0xbb   : > { %1322 = vmatmul.mubr.bf16.gmra.mrb[28].mxu1 %v2213_v1  ;;  %1168 = vmatprep.mubr.bf16.mxu0 %v2214_v2  ;;  %v403_v2 = vld [vmem:[#allocation2 + $0x18] sm:$0xff] }
  0xbc   : > { %1329 = vmatprep.mubr.bf16.mxu1 %v2216_v3 }
  0xc2   : > { %1169 = vmatmul.mubr.bf16.gmra.mrb[32].mxu0 %v2218_v4 }
  0xc3   : > { %1330 = vmatmul.mubr.bf16.gmra.mrb[32].mxu1 %v2219_v5  ;;  %1176 = vmatprep.mubr.bf16.mxu0 %v2220_v6 }
  0xc4   : > { %1337 = vmatprep.mubr.bf16.mxu1 %v2222_v7 }
  0xca   : > { %1177 = vmatmul.mubr.bf16.gmra.mrb[36].mxu0 %v2224_v8 }
  0xcb   : > { %1338 = vmatmul.mubr.bf16.gmra.mrb[36].mxu1 %v2225_v9  ;;  %1184 = vmatprep.mubr.bf16.mxu0 %v2226_v10 }
  0xcc   : > { %1345 = vmatprep.mubr.bf16.mxu1 %v2228_v11 }
  0xd2   : > { %1185 = vmatmul.mubr.bf16.gmra.mrb[40].mxu0 %v2230_v12 }
  0xd3   : > { %1346 = vmatmul.mubr.bf16.gmra.mrb[40].mxu1 %v2231_v13  ;;  %1192 = vmatprep.mubr.bf16.mxu0 %v2232_v14 }
  0xd4   : > { %1353 = vmatprep.mubr.bf16.mxu1 %v2234_v15  ;;  %v404_v15 = vld [vmem:[#allocation2 + $0x20] sm:$0xff] }
  0xda   : > { %1193 = vmatmul.mubr.bf16.gmra.mrb[44].mxu0 %v2236_v16 }
  0xdb   : > { %1354 = vmatmul.mubr.bf16.gmra.mrb[44].mxu1 %v2237_v17  ;;  %1200 = vmatprep.mubr.bf16.mxu0 %v2238_v18 }
  0xdc   : > { %1361 = vmatprep.mubr.bf16.mxu1 %v2240_v19 }
  0xe2   : > { %1201 = vmatmul.mubr.bf16.gmra.mrb[48].mxu0 %v2242_v20  ;;  %v405_v20 = vld [vmem:[#allocation2 + $0x28] sm:$0xff] }
  0xe3   : > { %1362 = vmatmul.mubr.bf16.gmra.mrb[48].mxu1 %v2243_v21  ;;  %1208 = vmatprep.mubr.bf16.mxu0 %v2244_v22 }
  0xe4   : > { %1369 = vmatprep.mubr.bf16.mxu1 %v2246_v23 }
  0xea   : > { %1209 = vmatmul.mubr.bf16.gmra.mrb[52].mxu0 %v2248_v24 }
  0xeb   : > { %1370 = vmatmul.mubr.bf16.gmra.mrb[52].mxu1 %v2249_v25  ;;  %1216 = vmatprep.mubr.bf16.mxu0 %v2250_v26 }
  0xec   : > { %1377 = vmatprep.mubr.bf16.mxu1 %v2252_v27 }
  0xf2   : > { %1217 = vmatmul.mubr.bf16.gmra.mrb[56].mxu0 %v2254_v28 }
  0xf3   : > { %1378 = vmatmul.mubr.bf16.gmra.mrb[56].mxu1 %v2255_v29  ;;  %1224 = vmatprep.mubr.bf16.mxu0 %v2256_v30 }
  0xf4   : > { %1385 = vmatprep.mubr.bf16.mxu1 %v2258_v31 }
  0xfa   : > { %1225 = vmatmul.mubr.bf16.gmra.mrb[60].mxu0 %v2260_v32 }
  0xfb   : > { %1386 = vmatmul.mubr.bf16.gmra.mrb[60].mxu1 %v2261_v33  ;;  %v406_v33 = vld [vmem:[#allocation2 + $0x30] sm:$0xff] }
 0x155   : > { %v1868_v34 = vpop.f32.mrb[0].mxu0 }
 0x156   : > { %v1980_v35 = vpop.f32.mrb[0].mxu1  ;;  %v1869_v36 = vpop.f32.mrb[1].mxu0 }
 0x157   : > { %v1870_v37 = vadd.f32 %v1869_v36, %v1868_v34  ;;  %v1981_v38 = vpop.f32.mrb[1].mxu1  ;;  %v1871_v39 = vpop.f32.mrb[2].mxu0 }
 0x158   : > { %v1982_v40 = vadd.f32 %v1981_v38, %v1980_v35  ;;  %v1983_v41 = vpop.f32.mrb[2].mxu1  ;;  %v1872_v42 = vpop.f32.mrb[3].mxu0  ;;  %v407_v38 = vld [vmem:[#allocation2 + $0x38] sm:$0xff] }
 0x159   : > { %v1873_v44 = vadd.f32 %v1872_v42, %v1871_v39  ;;  %v1984_v45 = vpop.f32.mrb[3].mxu1 }
 0x15a   : > { %v1268_v46 = vadd.f32 %v1982_v40, %v1870_v37  ;;  %v1985_v47 = vadd.f32 %v1984_v45, %v1983_v41 }
 0x15c   : > { %v1394_v49 = vadd.f32 %v1268_v46, %v400_v43  ;;  %v1271_v50 = vadd.f32 %v1985_v47, %v1873_v44 }
 0x15d   : > { %v1874_v51 = vpop.f32.mrb[4].mxu0 }
 0x15e   : > { %1426 = vst [vmem:[#allocation2] sm:$0xff] %v1394_v49  ;;  %v1395_v52 = vadd.f32 %v1271_v50, %v401_v48  ;;  %v1986_v53 = vpop.f32.mrb[4].mxu1  ;;  %v1875_v54 = vpop.f32.mrb[5].mxu0 }
 0x15f   : > { %v1876_v55 = vadd.f32 %v1875_v54, %v1874_v51  ;;  %v1987_v56 = vpop.f32.mrb[5].mxu1  ;;  %v1877_v57 = vpop.f32.mrb[6].mxu0  ;;  %v408_v51 = vld [vmem:[#allocation2 + $0x40] sm:$0xff] }
 0x160   : > { %1427 = vst [vmem:[#allocation2 + $0x8] sm:$0xff] %v1395_v52  ;;  %v1988_v58 = vadd.f32 %v1987_v56, %v1986_v53  ;;  %v1989_v59 = vpop.f32.mrb[6].mxu1  ;;  %v1878_v60 = vpop.f32.mrb[7].mxu0  ;;  %v409_v56 = vld [vmem:[#allocation2 + $0x48] sm:$0xff] }
 0x161   : > { %v1879_v62 = vadd.f32 %v1878_v60, %v1877_v57  ;;  %v1990_v63 = vpop.f32.mrb[7].mxu1 }
 0x162   : > { %v1276_v0 = vadd.f32 %v1988_v58, %v1876_v55  ;;  %v1991_v1 = vadd.f32 %v1990_v63, %v1989_v59 }
 0x164   : > { %v1396_v3 = vadd.f32 %v1276_v0, %v402_v61  ;;  %v1279_v4 = vadd.f32 %v1991_v1, %v1879_v62 }
 0x165   : > { %v1880_v5 = vpop.f32.mrb[8].mxu0 }
 0x166   : > { %1428 = vst [vmem:[#allocation2 + $0x10] sm:$0xff] %v1396_v3  ;;  %v1397_v6 = vadd.f32 %v1279_v4, %v403_v2  ;;  %v1992_v7 = vpop.f32.mrb[8].mxu1  ;;  %v1881_v8 = vpop.f32.mrb[9].mxu0 }
 0x167   : > { %v1882_v9 = vadd.f32 %v1881_v8, %v1880_v5  ;;  %v1993_v10 = vpop.f32.mrb[9].mxu1  ;;  %v1883_v11 = vpop.f32.mrb[10].mxu0  ;;  %v410_v5 = vld [vmem:[#allocation2 + $0x50] sm:$0xff] }
 0x168   : > { %1429 = vst [vmem:[#allocation2 + $0x18] sm:$0xff] %v1397_v6  ;;  %v1994_v12 = vadd.f32 %v1993_v10, %v1992_v7  ;;  %v1995_v13 = vpop.f32.mrb[10].mxu1  ;;  %v1884_v14 = vpop.f32.mrb[11].mxu0  ;;  %v411_v10 = vld [vmem:[#allocation2 + $0x58] sm:$0xff] }
 0x169   : > { %v1885_v16 = vadd.f32 %v1884_v14, %v1883_v11  ;;  %v1996_v17 = vpop.f32.mrb[11].mxu1 }
 0x16a   : > { %v1284_v18 = vadd.f32 %v1994_v12, %v1882_v9  ;;  %v1997_v19 = vadd.f32 %v1996_v17, %v1995_v13 }
 0x16c   : > { %v1398_v21 = vadd.f32 %v1284_v18, %v404_v15  ;;  %v1287_v22 = vadd.f32 %v1997_v19, %v1885_v16 }
 0x16d   : > { %v1886_v23 = vpop.f32.mrb[12].mxu0 }
 0x16e   : > { %1430 = vst [vmem:[#allocation2 + $0x20] sm:$0xff] %v1398_v21  ;;  %v1399_v24 = vadd.f32 %v1287_v22, %v405_v20  ;;  %v1998_v25 = vpop.f32.mrb[12].mxu1  ;;  %v1887_v26 = vpop.f32.mrb[13].mxu0 }
 0x16f   : > { %v1888_v27 = vadd.f32 %v1887_v26, %v1886_v23  ;;  %v1999_v28 = vpop.f32.mrb[13].mxu1  ;;  %v1889_v29 = vpop.f32.mrb[14].mxu0  ;;  %v412_v23 = vld [vmem:[#allocation2 + $0x60] sm:$0xff] }
 0x170   : > { %1431 = vst [vmem:[#allocation2 + $0x28] sm:$0xff] %v1399_v24  ;;  %v2000_v30 = vadd.f32 %v1999_v28, %v1998_v25  ;;  %v2001_v31 = vpop.f32.mrb[14].mxu1  ;;  %v1890_v32 = vpop.f32.mrb[15].mxu0  ;;  %v413_v28 = vld [vmem:[#allocation2 + $0x68] sm:$0xff] }
 0x171   : > { %v1891_v34 = vadd.f32 %v1890_v32, %v1889_v29  ;;  %v2002_v35 = vpop.f32.mrb[15].mxu1 }
 0x172   : > { %v1292_v36 = vadd.f32 %v2000_v30, %v1888_v27  ;;  %v2003_v37 = vadd.f32 %v2002_v35, %v2001_v31 }
 0x174   : > { %v1400_v39 = vadd.f32 %v1292_v36, %v406_v33  ;;  %v1295_v40 = vadd.f32 %v2003_v37, %v1891_v34 }
 0x175   : > { %v1892_v41 = vpop.f32.mrb[16].mxu0 }
 0x176   : > { %1432 = vst [vmem:[#allocation2 + $0x30] sm:$0xff] %v1400_v39  ;;  %v1401_v42 = vadd.f32 %v1295_v40, %v407_v38  ;;  %v2004_v43 = vpop.f32.mrb[16].mxu1  ;;  %v1893_v44 = vpop.f32.mrb[17].mxu0 }
 0x177   : > { %v1894_v45 = vadd.f32 %v1893_v44, %v1892_v41  ;;  %v2005_v46 = vpop.f32.mrb[17].mxu1  ;;  %v1895_v47 = vpop.f32.mrb[18].mxu0  ;;  %v414_v41 = vld [vmem:[#allocation2 + $0x70] sm:$0xff] }
 0x178   : > { %1433 = vst [vmem:[#allocation2 + $0x38] sm:$0xff] %v1401_v42  ;;  %v2006_v48 = vadd.f32 %v2005_v46, %v2004_v43  ;;  %v2007_v49 = vpop.f32.mrb[18].mxu1  ;;  %v1896_v50 = vpop.f32.mrb[19].mxu0  ;;  %v415_v46 = vld [vmem:[#allocation2 + $0x78] sm:$0xff] }
 0x179   : > { %v1897_v52 = vadd.f32 %v1896_v50, %v1895_v47  ;;  %v2008_v53 = vpop.f32.mrb[19].mxu1 }
 0x17a   : > { %v1300_v54 = vadd.f32 %v2006_v48, %v1894_v45  ;;  %v2009_v55 = vadd.f32 %v2008_v53, %v2007_v49 }
 0x17c   : > { %v1402_v57 = vadd.f32 %v1300_v54, %v408_v51  ;;  %v1303_v58 = vadd.f32 %v2009_v55, %v1897_v52 }
 0x17d   : > { %v1898_v59 = vpop.f32.mrb[20].mxu0 }
 0x17e   : > { %1434 = vst [vmem:[#allocation2 + $0x40] sm:$0xff] %v1402_v57  ;;  %v1403_v60 = vadd.f32 %v1303_v58, %v409_v56  ;;  %v2010_v61 = vpop.f32.mrb[20].mxu1  ;;  %v1899_v62 = vpop.f32.mrb[21].mxu0 }
 0x17f   : > { %v1900_v63 = vadd.f32 %v1899_v62, %v1898_v59  ;;  %v2011_v0 = vpop.f32.mrb[21].mxu1  ;;  %v1901_v1 = vpop.f32.mrb[22].mxu0  ;;  %v416_v59 = vld [vmem:[#allocation2 + $0x80] sm:$0xff] }
 0x180   : > { %1435 = vst [vmem:[#allocation2 + $0x48] sm:$0xff] %v1403_v60  ;;  %v2012_v2 = vadd.f32 %v2011_v0, %v2010_v61  ;;  %v2013_v3 = vpop.f32.mrb[22].mxu1  ;;  %v1902_v4 = vpop.f32.mrb[23].mxu0  ;;  %v417_v0 = vld [vmem:[#allocation2 + $0x88] sm:$0xff] }
 0x181   : > { %v1903_v6 = vadd.f32 %v1902_v4, %v1901_v1  ;;  %v2014_v7 = vpop.f32.mrb[23].mxu1 }
 0x182   : > { %v1308_v8 = vadd.f32 %v2012_v2, %v1900_v63  ;;  %v2015_v9 = vadd.f32 %v2014_v7, %v2013_v3 }
 0x184   : > { %v1404_v11 = vadd.f32 %v1308_v8, %v410_v5  ;;  %v1311_v12 = vadd.f32 %v2015_v9, %v1903_v6 }
 0x185   : > { %v1904_v13 = vpop.f32.mrb[24].mxu0 }
 0x186   : > { %1436 = vst [vmem:[#allocation2 + $0x50] sm:$0xff] %v1404_v11  ;;  %v1405_v14 = vadd.f32 %v1311_v12, %v411_v10  ;;  %v2016_v15 = vpop.f32.mrb[24].mxu1  ;;  %v1905_v16 = vpop.f32.mrb[25].mxu0 }
 0x187   : > { %v1906_v17 = vadd.f32 %v1905_v16, %v1904_v13  ;;  %v2017_v18 = vpop.f32.mrb[25].mxu1  ;;  %v1907_v19 = vpop.f32.mrb[26].mxu0  ;;  %v418_v13 = vld [vmem:[#allocation2 + $0x90] sm:$0xff] }
 0x188   : > { %1437 = vst [vmem:[#allocation2 + $0x58] sm:$0xff] %v1405_v14  ;;  %v2018_v20 = vadd.f32 %v2017_v18, %v2016_v15  ;;  %v2019_v21 = vpop.f32.mrb[26].mxu1  ;;  %v1908_v22 = vpop.f32.mrb[27].mxu0  ;;  %v419_v18 = vld [vmem:[#allocation2 + $0x98] sm:$0xff] }
 0x189   : > { %v1909_v24 = vadd.f32 %v1908_v22, %v1907_v19  ;;  %v2020_v25 = vpop.f32.mrb[27].mxu1 }
 0x18a   : > { %v1316_v26 = vadd.f32 %v2018_v20, %v1906_v17  ;;  %v2021_v27 = vadd.f32 %v2020_v25, %v2019_v21 }
 0x18c   : > { %v1406_v29 = vadd.f32 %v1316_v26, %v412_v23  ;;  %v1319_v30 = vadd.f32 %v2021_v27, %v1909_v24 }
 0x18d   : > { %v1910_v31 = vpop.f32.mrb[28].mxu0 }
 0x18e   : > { %1438 = vst [vmem:[#allocation2 + $0x60] sm:$0xff] %v1406_v29  ;;  %v1407_v32 = vadd.f32 %v1319_v30, %v413_v28  ;;  %v2022_v33 = vpop.f32.mrb[28].mxu1  ;;  %v1911_v34 = vpop.f32.mrb[29].mxu0 }
 0x18f   : > { %v1912_v35 = vadd.f32 %v1911_v34, %v1910_v31  ;;  %v2023_v36 = vpop.f32.mrb[29].mxu1  ;;  %v1913_v37 = vpop.f32.mrb[30].mxu0  ;;  %v420_v31 = vld [vmem:[#allocation2 + $0xa0] sm:$0xff] }
 0x190   : > { %1439 = vst [vmem:[#allocation2 + $0x68] sm:$0xff] %v1407_v32  ;;  %v2024_v38 = vadd.f32 %v2023_v36, %v2022_v33  ;;  %v2025_v39 = vpop.f32.mrb[30].mxu1  ;;  %v1914_v40 = vpop.f32.mrb[31].mxu0  ;;  %v421_v36 = vld [vmem:[#allocation2 + $0xa8] sm:$0xff] }
 0x191   : > { %v1915_v42 = vadd.f32 %v1914_v40, %v1913_v37  ;;  %v2026_v43 = vpop.f32.mrb[31].mxu1 }
 0x192   : > { %v1324_v44 = vadd.f32 %v2024_v38, %v1912_v35  ;;  %v2027_v45 = vadd.f32 %v2026_v43, %v2025_v39 }
 0x194   : > { %v1408_v47 = vadd.f32 %v1324_v44, %v414_v41  ;;  %v1327_v48 = vadd.f32 %v2027_v45, %v1915_v42 }
 0x195   : > { %v1916_v49 = vpop.f32.mrb[32].mxu0 }
 0x196   : > { %1440 = vst [vmem:[#allocation2 + $0x70] sm:$0xff] %v1408_v47  ;;  %v1409_v50 = vadd.f32 %v1327_v48, %v415_v46  ;;  %v2028_v51 = vpop.f32.mrb[32].mxu1  ;;  %v1917_v52 = vpop.f32.mrb[33].mxu0 }
 0x197   : > { %v1918_v53 = vadd.f32 %v1917_v52, %v1916_v49  ;;  %v2029_v54 = vpop.f32.mrb[33].mxu1  ;;  %v1919_v55 = vpop.f32.mrb[34].mxu0  ;;  %v422_v49 = vld [vmem:[#allocation2 + $0xb0] sm:$0xff] }
 0x198   : > { %1441 = vst [vmem:[#allocation2 + $0x78] sm:$0xff] %v1409_v50  ;;  %v2030_v56 = vadd.f32 %v2029_v54, %v2028_v51  ;;  %v2031_v57 = vpop.f32.mrb[34].mxu1  ;;  %v1920_v58 = vpop.f32.mrb[35].mxu0  ;;  %v423_v54 = vld [vmem:[#allocation2 + $0xb8] sm:$0xff] }
 0x199   : > { %v1921_v60 = vadd.f32 %v1920_v58, %v1919_v55  ;;  %v2032_v61 = vpop.f32.mrb[35].mxu1 }
 0x19a   : > { %v1332_v62 = vadd.f32 %v2030_v56, %v1918_v53  ;;  %v2033_v63 = vadd.f32 %v2032_v61, %v2031_v57 }
 0x19c   : > { %v1410_v1 = vadd.f32 %v1332_v62, %v416_v59  ;;  %v1335_v2 = vadd.f32 %v2033_v63, %v1921_v60 }
 0x19d   : > { %v1922_v3 = vpop.f32.mrb[36].mxu0 }
 0x19e   : > { %1442 = vst [vmem:[#allocation2 + $0x80] sm:$0xff] %v1410_v1  ;;  %v1411_v4 = vadd.f32 %v1335_v2, %v417_v0  ;;  %v2034_v5 = vpop.f32.mrb[36].mxu1  ;;  %v1923_v6 = vpop.f32.mrb[37].mxu0 }
 0x19f   : > { %v1924_v7 = vadd.f32 %v1923_v6, %v1922_v3  ;;  %v2035_v8 = vpop.f32.mrb[37].mxu1  ;;  %v1925_v9 = vpop.f32.mrb[38].mxu0  ;;  %v424_v3 = vld [vmem:[#allocation2 + $0xc0] sm:$0xff] }
 0x1a0   : > { %1443 = vst [vmem:[#allocation2 + $0x88] sm:$0xff] %v1411_v4  ;;  %v2036_v10 = vadd.f32 %v2035_v8, %v2034_v5  ;;  %v2037_v11 = vpop.f32.mrb[38].mxu1  ;;  %v1926_v12 = vpop.f32.mrb[39].mxu0  ;;  %v425_v8 = vld [vmem:[#allocation2 + $0xc8] sm:$0xff] }
 0x1a1   : > { %v1927_v14 = vadd.f32 %v1926_v12, %v1925_v9  ;;  %v2038_v15 = vpop.f32.mrb[39].mxu1 }
 0x1a2   : > { %v1340_v16 = vadd.f32 %v2036_v10, %v1924_v7  ;;  %v2039_v17 = vadd.f32 %v2038_v15, %v2037_v11 }
 0x1a4   : > { %v1412_v19 = vadd.f32 %v1340_v16, %v418_v13  ;;  %v1343_v20 = vadd.f32 %v2039_v17, %v1927_v14 }
 0x1a5   : > { %v1928_v21 = vpop.f32.mrb[40].mxu0 }
 0x1a6   : > { %1444 = vst [vmem:[#allocation2 + $0x90] sm:$0xff] %v1412_v19  ;;  %v1413_v22 = vadd.f32 %v1343_v20, %v419_v18  ;;  %v2040_v23 = vpop.f32.mrb[40].mxu1  ;;  %v1929_v24 = vpop.f32.mrb[41].mxu0 }
 0x1a7   : > { %v1930_v25 = vadd.f32 %v1929_v24, %v1928_v21  ;;  %v2041_v26 = vpop.f32.mrb[41].mxu1  ;;  %v1931_v27 = vpop.f32.mrb[42].mxu0  ;;  %v426_v21 = vld [vmem:[#allocation2 + $0xd0] sm:$0xff] }
 0x1a8   : > { %1445 = vst [vmem:[#allocation2 + $0x98] sm:$0xff] %v1413_v22  ;;  %v2042_v28 = vadd.f32 %v2041_v26, %v2040_v23  ;;  %v2043_v29 = vpop.f32.mrb[42].mxu1  ;;  %v1932_v30 = vpop.f32.mrb[43].mxu0  ;;  %v427_v26 = vld [vmem:[#allocation2 + $0xd8] sm:$0xff] }
 0x1a9   : > { %v1933_v32 = vadd.f32 %v1932_v30, %v1931_v27  ;;  %v2044_v33 = vpop.f32.mrb[43].mxu1 }
 0x1aa   : > { %v1348_v34 = vadd.f32 %v2042_v28, %v1930_v25  ;;  %v2045_v35 = vadd.f32 %v2044_v33, %v2043_v29 }
 0x1ac   : > { %v1414_v37 = vadd.f32 %v1348_v34, %v420_v31  ;;  %v1351_v38 = vadd.f32 %v2045_v35, %v1933_v32 }
 0x1ad   : > { %v1934_v39 = vpop.f32.mrb[44].mxu0 }
 0x1ae   : > { %1446 = vst [vmem:[#allocation2 + $0xa0] sm:$0xff] %v1414_v37  ;;  %v1415_v40 = vadd.f32 %v1351_v38, %v421_v36  ;;  %v2046_v41 = vpop.f32.mrb[44].mxu1  ;;  %v1935_v42 = vpop.f32.mrb[45].mxu0 }
 0x1af   : > { %v1936_v43 = vadd.f32 %v1935_v42, %v1934_v39  ;;  %v2047_v44 = vpop.f32.mrb[45].mxu1  ;;  %v1937_v45 = vpop.f32.mrb[46].mxu0  ;;  %v428_v39 = vld [vmem:[#allocation2 + $0xe0] sm:$0xff] }
 0x1b0   : > { %1447 = vst [vmem:[#allocation2 + $0xa8] sm:$0xff] %v1415_v40  ;;  %v2048_v46 = vadd.f32 %v2047_v44, %v2046_v41  ;;  %v2049_v47 = vpop.f32.mrb[46].mxu1  ;;  %v1938_v48 = vpop.f32.mrb[47].mxu0  ;;  %v429_v44 = vld [vmem:[#allocation2 + $0xe8] sm:$0xff] }
 0x1b1   : > { %v1939_v50 = vadd.f32 %v1938_v48, %v1937_v45  ;;  %v2050_v51 = vpop.f32.mrb[47].mxu1 }
 0x1b2   : > { %v1356_v52 = vadd.f32 %v2048_v46, %v1936_v43  ;;  %v2051_v53 = vadd.f32 %v2050_v51, %v2049_v47 }
 0x1b4   : > { %v1416_v55 = vadd.f32 %v1356_v52, %v422_v49  ;;  %v1359_v56 = vadd.f32 %v2051_v53, %v1939_v50 }
 0x1b5   : > { %v1940_v57 = vpop.f32.mrb[48].mxu0 }
 0x1b6   : > { %1448 = vst [vmem:[#allocation2 + $0xb0] sm:$0xff] %v1416_v55  ;;  %v1417_v58 = vadd.f32 %v1359_v56, %v423_v54  ;;  %v2052_v59 = vpop.f32.mrb[48].mxu1  ;;  %v1941_v60 = vpop.f32.mrb[49].mxu0 }
 0x1b7   : > { %v1942_v61 = vadd.f32 %v1941_v60, %v1940_v57  ;;  %v2053_v62 = vpop.f32.mrb[49].mxu1  ;;  %v1943_v63 = vpop.f32.mrb[50].mxu0  ;;  %v430_v57 = vld [vmem:[#allocation2 + $0xf0] sm:$0xff] }
 0x1b8   : > { %1449 = vst [vmem:[#allocation2 + $0xb8] sm:$0xff] %v1417_v58  ;;  %v2054_v0 = vadd.f32 %v2053_v62, %v2052_v59  ;;  %v2055_v1 = vpop.f32.mrb[50].mxu1  ;;  %v1944_v2 = vpop.f32.mrb[51].mxu0  ;;  %v431_v62 = vld [vmem:[#allocation2 + $0xf8] sm:$0xff] }
 0x1b9   : > { %v1945_v4 = vadd.f32 %v1944_v2, %v1943_v63  ;;  %v2056_v5 = vpop.f32.mrb[51].mxu1  ;;  %v1462_v2 = vld [vmem:[#allocation2] sm:$0xff] (!%p1848_p2) }
 0x1ba   : > { %v1364_v6 = vadd.f32 %v2054_v0, %v1942_v61  ;;  %v2057_v7 = vadd.f32 %v2056_v5, %v2055_v1  ;;  %1494 = vst [vmem:[%s2547_s12] sm:$0xff] (!%p1848_p2), %v1462_v2  ;;  %v1563_v5 = vmul.f32 (!%p1848_p2), %v1462_v2, %v1462_v2 }
 0x1bc   : > { %v1418_v9 = vadd.f32 %v1364_v6, %v424_v3  ;;  %v1367_v10 = vadd.f32 %v2057_v7, %v1945_v4  ;;  %v1463_v3 = vld [vmem:[#allocation2 + $0x8] sm:$0xff] (!%p1848_p2)  ;;  %v1464_v4 = vld [vmem:[#allocation2 + $0x10] sm:$0xff] (!%p1848_p2) }
 0x1bd   : > { %v1946_v11 = vpop.f32.mrb[52].mxu0  ;;  %1495 = vst [vmem:[%s2547_s12 + $0x8] sm:$0xff] (!%p1848_p2), %v1463_v3  ;;  %v1526_v6 = vadd.f32 (!%p1848_p2), %v1463_v3, %v1462_v2  ;;  %v1564_v7 = vmul.f32 (!%p1848_p2), %v1463_v3, %v1463_v3  ;;  %1496 = vst [vmem:[%s2547_s12 + $0x10] sm:$0xff] (!%p1848_p2), %v1464_v4 }
 0x1be   : > { %1450 = vst [vmem:[#allocation2 + $0xc0] sm:$0xff] %v1418_v9  ;;  %v1419_v12 = vadd.f32 %v1367_v10, %v425_v8  ;;  %v2058_v13 = vpop.f32.mrb[52].mxu1  ;;  %v1947_v14 = vpop.f32.mrb[53].mxu0  ;;  %v1565_v8 = vmul.f32 (!%p1848_p2), %v1464_v4, %v1464_v4  ;;  %v1465_v9 = vld [vmem:[#allocation2 + $0x18] sm:$0xff] (!%p1848_p2)  ;;  %v1466_v10 = vld [vmem:[#allocation2 + $0x20] sm:$0xff] (!%p1848_p2) }
 0x1bf   : > { %v1948_v15 = vadd.f32 %v1947_v14, %v1946_v11  ;;  %v2059_v16 = vpop.f32.mrb[53].mxu1  ;;  %v1949_v17 = vpop.f32.mrb[54].mxu0  ;;  %v1467_v11 = vld [vmem:[#allocation2 + $0x28] sm:$0xff] (!%p1848_p2)  ;;  %1497 = vst [vmem:[%s2547_s12 + $0x18] sm:$0xff] (!%p1848_p2), %v1465_v9  ;;  %1498 = vst [vmem:[%s2547_s12 + $0x20] sm:$0xff] (!%p1848_p2), %v1466_v10  ;;  %v2662_v14 = vld [vmem:[#allocation2 + $0x40] sm:$0xff] (!%p1848_p2) }
 0x1c0   : > { %1451 = vst [vmem:[#allocation2 + $0xc8] sm:$0xff] %v1419_v12  ;;  %v2060_v18 = vadd.f32 %v2059_v16, %v2058_v13  ;;  %v2061_v19 = vpop.f32.mrb[54].mxu1  ;;  %v1950_v20 = vpop.f32.mrb[55].mxu0  ;;  %1499 = vst [vmem:[%s2547_s12 + $0x28] sm:$0xff] (!%p1848_p2), %v1467_v11  ;;  %v2658_v12 = vld [vmem:[#allocation2 + $0x30] sm:$0xff] (!%p1848_p2)  ;;  %v2660_v13 = vld [vmem:[#allocation2 + $0x38] sm:$0xff] (!%p1848_p2)  ;;  %v1527_v16 = vadd.f32 (!%p1848_p2), %v1526_v6, %v1464_v4 }
 0x1c1   : > { %v1951_v22 = vadd.f32 %v1950_v20, %v1949_v17  ;;  %v2062_v23 = vpop.f32.mrb[55].mxu1  ;;  %v1566_v17 = vmul.f32 (!%p1848_p2), %v1465_v9, %v1465_v9  ;;  %1500 = vst [vmem:[%s2547_s12 + $0x30] sm:$0xff] (!%p1848_p2), %v2658_v12  ;;  %1501 = vst [vmem:[%s2547_s12 + $0x38] sm:$0xff] (!%p1848_p2), %v2660_v13  ;;  %v2674_v20 = vld [vmem:[#allocation2 + $0x58] sm:$0xff] (!%p1848_p2) }
 0x1c2   : > { %v1372_v24 = vadd.f32 %v2060_v18, %v1948_v15  ;;  %v2063_v25 = vadd.f32 %v2062_v23, %v2061_v19  ;;  %v1595_v15 = vadd.f32 (!%p1848_p2), %v1564_v7, %v1563_v5  ;;  %1502 = vst [vmem:[%s2547_s12 + $0x40] sm:$0xff] (!%p1848_p2), %v2662_v14  ;;  %v2670_v18 = vld [vmem:[#allocation2 + $0x48] sm:$0xff] (!%p1848_p2)  ;;  %v2672_v19 = vld [vmem:[#allocation2 + $0x50] sm:$0xff] (!%p1848_p2)  ;;  %1505 = vst [vmem:[%s2547_s12 + $0x58] sm:$0xff] (!%p1848_p2), %v2674_v20 }
 0x1c3   : > { %1503 = vst [vmem:[%s2547_s12 + $0x48] sm:$0xff] (!%p1848_p2), %v2670_v18  ;;  %1504 = vst [vmem:[%s2547_s12 + $0x50] sm:$0xff] (!%p1848_p2), %v2672_v19  ;;  %v2686_v23 = vld [vmem:[#allocation2 + $0x70] sm:$0xff] (!%p1848_p2) }
 0x1c4   : > { %v1420_v27 = vadd.f32 %v1372_v24, %v426_v21  ;;  %v1375_v28 = vadd.f32 %v2063_v25, %v1951_v22  ;;  %v2682_v21 = vld [vmem:[#allocation2 + $0x60] sm:$0xff] (!%p1848_p2)  ;;  %v2684_v22 = vld [vmem:[#allocation2 + $0x68] sm:$0xff] (!%p1848_p2)  ;;  %v1596_v24 = vadd.f32 (!%p1848_p2), %v1595_v15, %v1565_v8  ;;  %v1528_v25 = vadd.f32 (!%p1848_p2), %v1527_v16, %v1465_v9  ;;  %1508 = vst [vmem:[%s2547_s12 + $0x70] sm:$0xff] (!%p1848_p2), %v2686_v23 }
 0x1c5   : > { %v1952_v29 = vpop.f32.mrb[56].mxu0  ;;  %1506 = vst [vmem:[%s2547_s12 + $0x60] sm:$0xff] (!%p1848_p2), %v2682_v21  ;;  %1507 = vst [vmem:[%s2547_s12 + $0x68] sm:$0xff] (!%p1848_p2), %v2684_v22  ;;  %v1575_v3 = vmul.f32 (!%p1848_p2), %v2682_v21, %v2682_v21  ;;  %v1576_v6 = vmul.f32 (!%p1848_p2), %v2684_v22, %v2684_v22  ;;  %v1577_v9 = vmul.f32 (!%p1848_p2), %v2686_v23, %v2686_v23 }
 0x1c6   : > { %1452 = vst [vmem:[#allocation2 + $0xd0] sm:$0xff] %v1420_v27  ;;  %v1421_v30 = vadd.f32 %v1375_v28, %v427_v26  ;;  %v2064_v31 = vpop.f32.mrb[56].mxu1  ;;  %v1953_v32 = vpop.f32.mrb[57].mxu0  ;;  %v1567_v26 = vmul.f32 (!%p1848_p2), %v1466_v10, %v1466_v10  ;;  %v2694_v27 = vld [vmem:[#allocation2 + $0x78] sm:$0xff] (!%p1848_p2)  ;;  %v2696_v28 = vld [vmem:[#allocation2 + $0x80] sm:$0xff] (!%p1848_p2) }
 0x1c7   : > { %v1954_v33 = vadd.f32 %v1953_v32, %v1952_v29  ;;  %v2065_v34 = vpop.f32.mrb[57].mxu1  ;;  %v1955_v35 = vpop.f32.mrb[58].mxu0  ;;  %v2698_v29 = vld [vmem:[#allocation2 + $0x88] sm:$0xff] (!%p1848_p2)  ;;  %1509 = vst [vmem:[%s2547_s12 + $0x78] sm:$0xff] (!%p1848_p2), %v2694_v27  ;;  %1510 = vst [vmem:[%s2547_s12 + $0x80] sm:$0xff] (!%p1848_p2), %v2696_v28  ;;  %v2710_v32 = vld [vmem:[#allocation2 + $0xa0] sm:$0xff] (!%p1848_p2)  ;;  %v1579_v15 = vmul.f32 (!%p1848_p2), %v2696_v28, %v2696_v28 }
 0x1c8   : > { %1453 = vst [vmem:[#allocation2 + $0xd8] sm:$0xff] %v1421_v30  ;;  %v2066_v36 = vadd.f32 %v2065_v34, %v2064_v31  ;;  %v2067_v37 = vpop.f32.mrb[58].mxu1  ;;  %v1956_v38 = vpop.f32.mrb[59].mxu0  ;;  %1511 = vst [vmem:[%s2547_s12 + $0x88] sm:$0xff] (!%p1848_p2), %v2698_v29  ;;  %v2706_v30 = vld [vmem:[#allocation2 + $0x90] sm:$0xff] (!%p1848_p2)  ;;  %v2708_v31 = vld [vmem:[#allocation2 + $0x98] sm:$0xff] (!%p1848_p2)  ;;  %v1529_v34 = vadd.f32 (!%p1848_p2), %v1528_v25, %v1466_v10 }
 0x1c9   : > { %v1957_v40 = vadd.f32 %v1956_v38, %v1955_v35  ;;  %v2068_v41 = vpop.f32.mrb[59].mxu1  ;;  %v1568_v35 = vmul.f32 (!%p1848_p2), %v1467_v11, %v1467_v11  ;;  %1512 = vst [vmem:[%s2547_s12 + $0x90] sm:$0xff] (!%p1848_p2), %v2706_v30  ;;  %1513 = vst [vmem:[%s2547_s12 + $0x98] sm:$0xff] (!%p1848_p2), %v2708_v31  ;;  %v2722_v38 = vld [vmem:[#allocation2 + $0xb8] sm:$0xff] (!%p1848_p2) }
 0x1ca   : > { %v1380_v42 = vadd.f32 %v2066_v36, %v1954_v33  ;;  %v2069_v43 = vadd.f32 %v2068_v41, %v2067_v37  ;;  %v1597_v33 = vadd.f32 (!%p1848_p2), %v1596_v24, %v1566_v17  ;;  %1514 = vst [vmem:[%s2547_s12 + $0xa0] sm:$0xff] (!%p1848_p2), %v2710_v32  ;;  %v2718_v36 = vld [vmem:[#allocation2 + $0xa8] sm:$0xff] (!%p1848_p2)  ;;  %v2720_v37 = vld [vmem:[#allocation2 + $0xb0] sm:$0xff] (!%p1848_p2)  ;;  %1517 = vst [vmem:[%s2547_s12 + $0xb8] sm:$0xff] (!%p1848_p2), %v2722_v38 }
 0x1cb   : > { %1515 = vst [vmem:[%s2547_s12 + $0xa8] sm:$0xff] (!%p1848_p2), %v2718_v36  ;;  %1516 = vst [vmem:[%s2547_s12 + $0xb0] sm:$0xff] (!%p1848_p2), %v2720_v37  ;;  %v1582_v24 = vmul.f32 (!%p1848_p2), %v2708_v31, %v2708_v31 }
 0x1cc   : > { %v1422_v45 = vadd.f32 %v1380_v42, %v428_v39  ;;  %v1383_v46 = vadd.f32 %v2069_v43, %v1957_v40  ;;  %v2730_v39 = vld [vmem:[#allocation2 + $0xc0] sm:$0xff] (!%p1848_p2)  ;;  %v2732_v40 = vld [vmem:[#allocation2 + $0xc8] sm:$0xff] (!%p1848_p2)  ;;  %v1598_v42 = vadd.f32 (!%p1848_p2), %v1597_v33, %v1567_v26  ;;  %v1530_v43 = vadd.f32 (!%p1848_p2), %v1529_v34, %v1467_v11 }
 0x1cd   : > { %v1958_v47 = vpop.f32.mrb[60].mxu0  ;;  %v2734_v41 = vld [vmem:[#allocation2 + $0xd0] sm:$0xff] (!%p1848_p2)  ;;  %1518 = vst [vmem:[%s2547_s12 + $0xc0] sm:$0xff] (!%p1848_p2), %v2730_v39  ;;  %1519 = vst [vmem:[%s2547_s12 + $0xc8] sm:$0xff] (!%p1848_p2), %v2732_v40 }
 0x1ce   : > { %1454 = vst [vmem:[#allocation2 + $0xe0] sm:$0xff] %v1422_v45  ;;  %v1423_v48 = vadd.f32 %v1383_v46, %v429_v44  ;;  %v2070_v49 = vpop.f32.mrb[60].mxu1  ;;  %v1959_v50 = vpop.f32.mrb[61].mxu0  ;;  %v1569_v44 = vmul.f32 (!%p1848_p2), %v2658_v12, %v2658_v12  ;;  %1520 = vst [vmem:[%s2547_s12 + $0xd0] sm:$0xff] (!%p1848_p2), %v2734_v41 }
 0x1cf   : > { %v1960_v51 = vadd.f32 %v1959_v50, %v1958_v47  ;;  %v2071_v52 = vpop.f32.mrb[61].mxu1  ;;  %v1961_v53 = vpop.f32.mrb[62].mxu0  ;;  %v2744_v45 = vld [vmem:[#allocation2 + $0xd8] sm:$0xff] (!%p1848_p2)  ;;  %v1599_v50 = vadd.f32 (!%p1848_p2), %v1598_v42, %v1568_v35 }
 0x1d0   : > { %1455 = vst [vmem:[#allocation2 + $0xe8] sm:$0xff] %v1423_v48  ;;  %v2072_v54 = vadd.f32 %v2071_v52, %v2070_v49  ;;  %v2073_v55 = vpop.f32.mrb[62].mxu1  ;;  %v1962_v56 = vpop.f32.mrb[63].mxu0  ;;  %1521 = vst [vmem:[%s2547_s12 + $0xd8] sm:$0xff] (!%p1848_p2), %v2744_v45  ;;  %v1570_v52 = vmul.f32 (!%p1848_p2), %v2660_v13, %v2660_v13 }
 0x1d1   : > { %v1963_v58 = vadd.f32 %v1962_v56, %v1961_v53  ;;  %v2074_v59 = vpop.f32.mrb[63].mxu1  ;;  %v1600_v53 = vadd.f32 (!%p1848_p2), %v1599_v50, %v1569_v44 }
 0x1d2   : > { %v1388_v60 = vadd.f32 %v2072_v54, %v1960_v51  ;;  %v2075_v61 = vadd.f32 %v2074_v59, %v2073_v55  ;;  %1461 = sbr.rel (%p1848_p2) target bundleno = 534 (0x216), region = 63  ;;  %v1531_v51 = vadd.f32 (!%p1848_p2), %v1530_v43, %v2658_v12  ;;  %v1571_v55 = vmul.f32 (!%p1848_p2), %v2662_v14, %v2662_v14 }
 0x1d3   : > { %v1601_v56 = vadd.f32 (!%p1848_p2), %v1600_v53, %v1570_v52  ;;  %v1578_v12 = vmul.f32 (!%p1848_p2), %v2694_v27, %v2694_v27 }
 0x1d4   : > { %v1424_v63 = vadd.f32 %v1388_v60, %v430_v57  ;;  %v1391_v0 = vadd.f32 %v2075_v61, %v1963_v58  ;;  %v1532_v54 = vadd.f32 (!%p1848_p2), %v1531_v51, %v2660_v13  ;;  %v1572_v58 = vmul.f32 (!%p1848_p2), %v2670_v18, %v2670_v18 }
 0x1d5   : > { %v2746_v46 = vld [vmem:[#allocation2 + $0xe0] sm:$0xff] (!%p1848_p2)  ;;  %v1602_v59 = vadd.f32 (!%p1848_p2), %v1601_v56, %v1571_v55  ;;  %v1573_v61 = vmul.f32 (!%p1848_p2), %v2672_v19, %v2672_v19 }
 0x1d6   : > { %1456 = vst [vmem:[#allocation2 + $0xf0] sm:$0xff] %v1424_v63  ;;  %v1425_v1 = vadd.f32 %v1391_v0, %v431_v62  ;;  %1522 = vst [vmem:[%s2547_s12 + $0xe0] sm:$0xff] (!%p1848_p2), %v2746_v46  ;;  %v1533_v57 = vadd.f32 (!%p1848_p2), %v1532_v54, %v2662_v14  ;;  %v1574_v0 = vmul.f32 (!%p1848_p2), %v2674_v20, %v2674_v20 }
 0x1d7   : > { %v2748_v47 = vld [vmem:[#allocation2 + $0xe8] sm:$0xff] (!%p1848_p2)  ;;  %v1603_v62 = vadd.f32 (!%p1848_p2), %v1602_v59, %v1572_v58 }
 0x1d8   : > { %1457 = vst [vmem:[#allocation2 + $0xf8] sm:$0xff] %v1425_v1  ;;  %1523 = vst [vmem:[%s2547_s12 + $0xe8] sm:$0xff] (!%p1848_p2), %v2748_v47  ;;  %v1534_v60 = vadd.f32 (!%p1848_p2), %v1533_v57, %v2670_v18  ;;  %v1580_v18 = vmul.f32 (!%p1848_p2), %v2698_v29, %v2698_v29 }
 0x1d9   : > { %v1604_v1 = vadd.f32 %v1603_v62, %v1573_v61 }
 0x1da   : > { %v1535_v63 = vadd.f32 %v1534_v60, %v2672_v19 }
 0x1db   : > { %v1605_v4 = vadd.f32 %v1604_v1, %v1574_v0 }
 0x1dc   : > { %v1536_v2 = vadd.f32 %v1535_v63, %v2674_v20 }
 0x1dd   : > { %v2756_v48 = vld [vmem:[#allocation2 + $0xf0] sm:$0xff]  ;;  %v1606_v7 = vadd.f32 %v1605_v4, %v1575_v3 }
 0x1de   : > { %1524 = vst [vmem:[%s2547_s12 + $0xf0] sm:$0xff] %v2756_v48  ;;  %v1537_v5 = vadd.f32 %v1536_v2, %v2682_v21  ;;  %v1581_v21 = vmul.f32 %v2706_v30, %v2706_v30 }
 0x1df   : > { %v2758_v49 = vld [vmem:[#allocation2 + $0xf8] sm:$0xff]  ;;  %v1607_v10 = vadd.f32 %v1606_v7, %v1576_v6  ;;  %v1632_v6 = vlaneseq }
 0x1e0   : > { %1525 = vst [vmem:[%s2547_s12 + $0xf8] sm:$0xff] %v2758_v49  ;;  %v1538_v8 = vadd.f32 %v1537_v5, %v2684_v22 }
 0x1e1   : > { %v1608_v13 = vadd.f32 %v1607_v10, %v1577_v9  ;;  %v1633_v10 = vshrl.u32 %v1632_v6, 7 }
 0x1e2   : > { %v1539_v11 = vadd.f32 %v1538_v8, %v2686_v23 }
 0x1e3   : > { %v1609_v16 = vadd.f32 %v1608_v13, %v1578_v12  ;;  %vm1635_vm0 = vcmp.eq.s32.totalorder %v1633_v10, 1  ;;  %vm1634_vm1 = vcmp.eq.s32.totalorder %v1633_v10, 0 }
 0x1e4   : > { %v1540_v14 = vadd.f32 %v1539_v11, %v2694_v27  ;;  %v1583_v27 = vmul.f32 %v2710_v32, %v2710_v32 }
 0x1e5   : > { %v1610_v19 = vadd.f32 %v1609_v16, %v1579_v15 }
 0x1e6   : > { %v1541_v17 = vadd.f32 %v1540_v14, %v2696_v28 }
 0x1e7   : > { %v1611_v22 = vadd.f32 %v1610_v19, %v1580_v18 }
 0x1e8   : > { %v1542_v20 = vadd.f32 %v1541_v17, %v2698_v29  ;;  %v1584_v29 = vmul.f32 %v2718_v36, %v2718_v36 }
 0x1e9   : > { %v1612_v25 = vadd.f32 %v1611_v22, %v1581_v21 }
 0x1ea   : > { %v1543_v23 = vadd.f32 %v1542_v20, %v2706_v30  ;;  %v1585_v30 = vmul.f32 %v2720_v37, %v2720_v37 }
 0x1eb   : > { %v1613_v28 = vadd.f32 %v1612_v25, %v1582_v24 }
 0x1ec   : > { %v1544_v26 = vadd.f32 %v1543_v23, %v2708_v31  ;;  %v1586_v31 = vmul.f32 %v2722_v38, %v2722_v38 }
 0x1ed   : > { %v1614_v34 = vadd.f32 %v1613_v28, %v1583_v27 }
 0x1ee   : > { %v1545_v33 = vadd.f32 %v1544_v26, %v2710_v32  ;;  %v1587_v32 = vmul.f32 %v2730_v39, %v2730_v39 }
 0x1ef   : > { %v1615_v42 = vadd.f32 %v1614_v34, %v1584_v29 }
 0x1f0   : > { %v1546_v35 = vadd.f32 %v1545_v33, %v2718_v36  ;;  %v1588_v36 = vmul.f32 %v2732_v40, %v2732_v40 }
 0x1f1   : > { %v1616_v44 = vadd.f32 %v1615_v42, %v1585_v30 }
 0x1f2   : > { %v1547_v43 = vadd.f32 %v1546_v35, %v2720_v37  ;;  %v1589_v37 = vmul.f32 %v2734_v41, %v2734_v41 }
 0x1f3   : > { %v1617_v51 = vadd.f32 %v1616_v44, %v1586_v31 }
 0x1f4   : > { %v1548_v50 = vadd.f32 %v1547_v43, %v2722_v38  ;;  %v1590_v38 = vmul.f32 %v2744_v45, %v2744_v45 }
 0x1f5   : > { %v1618_v53 = vadd.f32 %v1617_v51, %v1587_v32 }
 0x1f6   : > { %v1549_v52 = vadd.f32 %v1548_v50, %v2730_v39  ;;  %v1591_v39 = vmul.f32 %v2746_v46, %v2746_v46 }
 0x1f7   : > { %v1619_v55 = vadd.f32 %v1618_v53, %v1588_v36 }
 0x1f8   : > { %v1550_v54 = vadd.f32 %v1549_v52, %v2732_v40  ;;  %v1592_v40 = vmul.f32 %v2748_v47, %v2748_v47 }
 0x1f9   : > { %v1620_v57 = vadd.f32 %v1619_v55, %v1589_v37 }
 0x1fa   : > { %v1551_v56 = vadd.f32 %v1550_v54, %v2734_v41  ;;  %v1593_v41 = vmul.f32 %v2756_v48, %v2756_v48 }
 0x1fb   : > { %v1621_v59 = vadd.f32 %v1620_v57, %v1590_v38 }
 0x1fc   : > { %v1552_v58 = vadd.f32 %v1551_v56, %v2744_v45  ;;  %v1594_v45 = vmul.f32 %v2758_v49, %v2758_v49 }
 0x1fd   : > { %v1622_v61 = vadd.f32 %v1621_v59, %v1591_v39 }
 0x1fe   : > { %v1553_v60 = vadd.f32 %v1552_v58, %v2746_v46 }
 0x1ff   : > { %v1623_v63 = vadd.f32 %v1622_v61, %v1592_v40 }
 0x200   : > { %v1554_v62 = vadd.f32 %v1553_v60, %v2748_v47 }
 0x201   : > { %v1624_v1 = vadd.f32 %v1623_v63, %v1593_v41 }
 0x202   : > { %v1555_v0 = vadd.f32 %v1554_v62, %v2756_v48 }
 0x203   : > { %v1625_v46 = vadd.f32 %v1624_v1, %v1594_v45 }
 0x204   : > { %v1556_v2 = vadd.f32 %v1555_v0, %v2758_v49  ;;  %v1638_v49 = vld [vmem:[%s2870_s3] sm:$0xff] }
 0x205   : > { %v1626_v5 = vrot.slane %v1625_v46, 4 }
 0x206   : > { %v1557_v3 = vrot.slane %v1556_v2, 4 }
 0x207   : > { %v1627_v8 = vadd.f32 %v1626_v5, %v1625_v46 }
 0x208   : > { %v1558_v4 = vadd.f32 %v1557_v3, %v1556_v2 }
 0x209   : > { %v1628_v9 = vrot.slane %v1627_v8, 2 }
 0x20a   : > { %v1559_v7 = vrot.slane %v1558_v4, 2 }
 0x20b   : > { %v1629_v12 = vadd.f32 %v1628_v9, %v1627_v8 }
 0x20c   : > { %v1560_v47 = vadd.f32 %v1559_v7, %v1558_v4 }
 0x20d   : > { %v1630_v13 = vrot.slane %v1629_v12, 1 }
 0x20e   : > { %v1561_v11 = vrot.slane %v1560_v47, 1 }
 0x20f   : > { %v1631_v14 = vadd.f32 %v1630_v13, %v1629_v12 }
 0x210   : > { %v1562_v48 = vadd.f32 %v1561_v11, %v1560_v47 }
 0x211   : > { %v1636_v15 = vsel %vm1635_vm0, %v1631_v14, 0.0 }
 0x212   : > { %v1637_v16 = vsel %vm1634_vm1, %v1562_v48, %v1636_v15 }
 0x213   : > { %v1639_v17 = vadd.f32 %v1638_v49, %v1637_v16 }
 0x215   : > { %1640 = vst [vmem:[%s2870_s3] sm:$0xff] %v1639_v17 }
 0x216 PF: > { %s14_s18 = sadd.s32 1, %s2316_s18   ;;  %s2871_s12 = smov %s2296_s13 }
 0x217   : > { %p11_p3 = scmp.ge.s32.totalorder %s14_s18, 10   ;;  %s2872_s13 = smov %s2391_s25 }
 0x218   : > { %s2873_s14 = smov %s2308_s16  ;;  %s2874_s15 = smov %s2312_s17 }
 0x219   : > { %s2875_s16 = smov %s2878_s19  ;;  %s2876_s17 = smov %s2882_s20 }
 0x21a   :  { %13 = sbr.rel (!%p11_p3) target bundleno = 4 (0x4), region = 109 }

// kernel: discriminator_forward.12
= control target key start
LH: loop header
LB: loop body
LE: loop exit
PB: predicated region body
PF: predicated region fallthrough
CT: control target
= control target key end

     0   :  { %s517_s12 = smov 0   ;;  %s679_s0 = inlined_call_operand.vmem [shape: f32[512,128], index: 0, kind: input, shape index: {}]   ;;  %s680_s1 = inlined_call_operand.vmem [shape: f32[1,128], index: 1, kind: input, shape index: {}]   ;;  %s681_s2 = inlined_call_operand.vmem [shape: f32[1,128], index: 2, kind: input, shape index: {}]   ;;  %s682_s3 = inlined_call_operand.vmem [shape: f32[512,128], index: 3, kind: output, shape index: {}]  }
   0x1 LB: > { %s468_s13 = sadd.s32 4294967295, %s495_s12   ;;  %p472_p0 = scmp.ge.s32.totalorder %s495_s12, 1  ;;  %s495_s12 = sphi %s517_s12, %s13_s12  }
   0x2   : > { %p138_p1 = scmp.lt.s32.totalorder %s495_s12, 3 }
   0x4   : > { %p139_p2 = pnand %p472_p0, %p138_p1 }
   0x5   : > { %s473_s14 = sshll.u32 (!%p139_p2), %s468_s13, 5  ;;  %v531_v0 = vld [vmem:[%s680_s1] ss:$0 sm:$0xff] (!%p139_p2) }
   0x6   : > { %142 = sbr.rel (%p139_p2) target bundleno = 62 (0x3e), region = 32  ;;  %p163_p3 = scmp.lt.s32.totalorder (!%p139_p2), %s473_s14, 63  ;;  %v541_v1 = vld [vmem:[%s681_s2] ss:$0 sm:$0xff] (!%p139_p2) }
   0xd   : > { %s684_s14 = smov (!%p163_p3, %s473_s14), 63 }
   0xe   : > { %s474_s15 = sshll.u32 %s684_s14, 3 }
   0xf   : > { %s536_s20 = scalar_lea.vmem %s679_s0, %s474_s15  ;;  %s569_s25 = scalar_lea.vmem %s682_s3, %s474_s15 }
  0x10   : > { %v174_v2 = vld [vmem:[%s536_s20] sm:$0xff]  ;;  %v175_v3 = vld [vmem:[%s536_s20 + $0x8] sm:$0xff]  ;;  %v176_v4 = vld [vmem:[%s536_s20 + $0x10] sm:$0xff] }
  0x11   : > { %v213_v5 = vmul.f32 %v531_v0, %v174_v2  ;;  %v214_v6 = vmul.f32 %v531_v0, %v175_v3  ;;  %v215_v7 = vmul.f32 %v531_v0, %v176_v4  ;;  %v177_v8 = vld [vmem:[%s536_s20 + $0x18] sm:$0xff]  ;;  %v178_v9 = vld [vmem:[%s536_s20 + $0x20] sm:$0xff]  ;;  %v179_v10 = vld [vmem:[%s536_s20 + $0x28] sm:$0xff] }
  0x12   : > { %v216_v11 = vmul.f32 %v531_v0, %v177_v8  ;;  %v217_v12 = vmul.f32 %v531_v0, %v178_v9  ;;  %v218_v13 = vmul.f32 %v531_v0, %v179_v10  ;;  %v180_v14 = vld [vmem:[%s536_s20 + $0x30] sm:$0xff]  ;;  %v181_v15 = vld [vmem:[%s536_s20 + $0x38] sm:$0xff]  ;;  %v182_v24 = vld [vmem:[%s536_s20 + $0x40] sm:$0xff] }
  0x13   : > { %v252_v16 = vadd.f32 %v541_v1, %v213_v5  ;;  %v253_v17 = vadd.f32 %v541_v1, %v214_v6  ;;  %v254_v18 = vadd.f32 %v541_v1, %v215_v7  ;;  %v219_v19 = vmul.f32 %v531_v0, %v180_v14  ;;  %v183_v32 = vld [vmem:[%s536_s20 + $0x48] sm:$0xff]  ;;  %v184_v33 = vld [vmem:[%s536_s20 + $0x50] sm:$0xff]  ;;  %v185_v34 = vld [vmem:[%s536_s20 + $0x58] sm:$0xff] }
  0x14   : > { %v255_v20 = vadd.f32 %v541_v1, %v216_v11  ;;  %v256_v21 = vadd.f32 %v541_v1, %v217_v12  ;;  %v257_v22 = vadd.f32 %v541_v1, %v218_v13  ;;  %v220_v23 = vmul.f32 %v531_v0, %v181_v15  ;;  %v186_v46 = vld [vmem:[%s536_s20 + $0x60] sm:$0xff]  ;;  %v187_v47 = vld [vmem:[%s536_s20 + $0x68] sm:$0xff]  ;;  %v188_v58 = vld [vmem:[%s536_s20 + $0x70] sm:$0xff] }
  0x15   : > { %vm284_vm0 = vcmp.ge.f32.partialorder %v252_v16, 0.0  ;;  %v316_v25 = vmul.f32 0.2, %v252_v16  ;;  %vm285_vm1 = vcmp.ge.f32.partialorder %v253_v17, 0.0  ;;  %v317_v26 = vmul.f32 0.2, %v253_v17 }
  0x16   : > { %vm286_vm2 = vcmp.ge.f32.partialorder %v254_v18, 0.0  ;;  %v318_v27 = vmul.f32 0.2, %v254_v18  ;;  %vm287_vm3 = vcmp.ge.f32.partialorder %v255_v20, 0.0  ;;  %v319_v28 = vmul.f32 0.2, %v255_v20 }
  0x17   : > { %v348_v29 = vsel %vm284_vm0, %v252_v16, %v316_v25  ;;  %v349_v30 = vsel %vm285_vm1, %v253_v17, %v317_v26  ;;  %vm288_vm4 = vcmp.ge.f32.partialorder %v256_v21, 0.0  ;;  %v320_v31 = vmul.f32 0.2, %v256_v21  ;;  %v189_v59 = vld [vmem:[%s536_s20 + $0x78] sm:$0xff]  ;;  %v190_v6 = vld [vmem:[%s536_s20 + $0x80] sm:$0xff]  ;;  %v191_v7 = vld [vmem:[%s536_s20 + $0x88] sm:$0xff] }
  0x18   : > { %380 = vst [vmem:[%s569_s25] sm:$0xff] %v348_v29  ;;  %381 = vst [vmem:[%s569_s25 + $0x8] sm:$0xff] %v349_v30  ;;  %v350_v35 = vsel %vm286_vm2, %v254_v18, %v318_v27  ;;  %v351_v36 = vsel %vm287_vm3, %v255_v20, %v319_v28  ;;  %vm289_vm5 = vcmp.ge.f32.partialorder %v257_v22, 0.0  ;;  %v321_v37 = vmul.f32 0.2, %v257_v22  ;;  %v192_v12 = vld [vmem:[%s536_s20 + $0x90] sm:$0xff]  ;;  %v193_v13 = vld [vmem:[%s536_s20 + $0x98] sm:$0xff] }
  0x19   : > { %382 = vst [vmem:[%s569_s25 + $0x10] sm:$0xff] %v350_v35  ;;  %383 = vst [vmem:[%s569_s25 + $0x18] sm:$0xff] %v351_v36  ;;  %v352_v38 = vsel %vm288_vm4, %v256_v21, %v320_v31  ;;  %v258_v39 = vadd.f32 %v541_v1, %v219_v19  ;;  %v259_v40 = vadd.f32 %v541_v1, %v220_v23  ;;  %v195_v25 = vld [vmem:[%s536_s20 + $0xa8] sm:$0xff]  ;;  %v196_v36 = vld [vmem:[%s536_s20 + $0xb0] sm:$0xff] }
  0x1a   : > { %v221_v41 = vmul.f32 %v531_v0, %v182_v24  ;;  %384 = vst [vmem:[%s569_s25 + $0x20] sm:$0xff] %v352_v38  ;;  %v353_v42 = vsel %vm289_vm5, %v257_v22, %v321_v37  ;;  %v222_v43 = vmul.f32 %v531_v0, %v183_v32  ;;  %v223_v44 = vmul.f32 %v531_v0, %v184_v33  ;;  %v194_v24 = vld [vmem:[%s536_s20 + $0xa0] sm:$0xff]  ;;  %v197_v37 = vld [vmem:[%s536_s20 + $0xb8] sm:$0xff] }
  0x1b   : > { %v224_v45 = vmul.f32 %v531_v0, %v185_v34  ;;  %385 = vst [vmem:[%s569_s25 + $0x28] sm:$0xff] %v353_v42  ;;  %vm290_vm6 = vcmp.ge.f32.partialorder %v258_v39, 0.0  ;;  %v322_v48 = vmul.f32 0.2, %v258_v39  ;;  %vm291_vm7 = vcmp.ge.f32.partialorder %v259_v40, 0.0 }
  0x1c   : > { %v323_v49 = vmul.f32 0.2, %v259_v40  ;;  %v260_v50 = vadd.f32 %v541_v1, %v221_v41  ;;  %v261_v51 = vadd.f32 %v541_v1, %v222_v43  ;;  %v262_v52 = vadd.f32 %v541_v1, %v223_v44 }
  0x1d   : > { %v263_v53 = vadd.f32 %v541_v1, %v224_v45  ;;  %v354_v54 = vsel %vm290_vm6, %v258_v39, %v322_v48  ;;  %v225_v56 = vmul.f32 %v531_v0, %v186_v46  ;;  %v226_v57 = vmul.f32 %v531_v0, %v187_v47  ;;  %v198_v46 = vld [vmem:[%s536_s20 + $0xc0] sm:$0xff]  ;;  %v199_v47 = vld [vmem:[%s536_s20 + $0xc8] sm:$0xff] }
  0x1e   : > { %v355_v55 = vsel %vm291_vm7, %v259_v40, %v323_v49  ;;  %386 = vst [vmem:[%s569_s25 + $0x30] sm:$0xff] %v354_v54  ;;  %vm292_vm8 = vcmp.ge.f32.partialorder %v260_v50, 0.0  ;;  %v324_v60 = vmul.f32 0.2, %v260_v50  ;;  %vm293_vm9 = vcmp.ge.f32.partialorder %v261_v51, 0.0 }
  0x1f   : > { %387 = vst [vmem:[%s569_s25 + $0x38] sm:$0xff] %v355_v55  ;;  %v325_v61 = vmul.f32 0.2, %v261_v51  ;;  %vm294_vm10 = vcmp.ge.f32.partialorder %v262_v52, 0.0  ;;  %v326_v62 = vmul.f32 0.2, %v262_v52  ;;  %v264_v4 = vadd.f32 %v541_v1, %v225_v56 }
  0x20   : > { %vm295_vm11 = vcmp.ge.f32.partialorder %v263_v53, 0.0  ;;  %v327_v63 = vmul.f32 0.2, %v263_v53  ;;  %v356_v2 = vsel %vm292_vm8, %v260_v50, %v324_v60  ;;  %v265_v5 = vadd.f32 %v541_v1, %v226_v57 }
  0x21   : > { %v357_v3 = vsel %vm293_vm9, %v261_v51, %v325_v61  ;;  %388 = vst [vmem:[%s569_s25 + $0x40] sm:$0xff] %v356_v2  ;;  %v358_v8 = vsel %vm294_vm10, %v262_v52, %v326_v62  ;;  %v227_v10 = vmul.f32 %v531_v0, %v188_v58  ;;  %v228_v11 = vmul.f32 %v531_v0, %v189_v59  ;;  %v200_v52 = vld [vmem:[%s536_s20 + $0xd0] sm:$0xff]  ;;  %v202_v2 = vld [vmem:[%s536_s20 + $0xe0] sm:$0xff] }
  0x22   : > { %389 = vst [vmem:[%s569_s25 + $0x48] sm:$0xff] %v357_v3  ;;  %v359_v9 = vsel %vm295_vm11, %v263_v53, %v327_v63  ;;  %390 = vst [vmem:[%s569_s25 + $0x50] sm:$0xff] %v358_v8  ;;  %vm296_vm12 = vcmp.ge.f32.partialorder %v264_v4, 0.0  ;;  %v328_v14 = vmul.f32 0.2, %v264_v4  ;;  %vm297_vm13 = vcmp.ge.f32.partialorder %v265_v5, 0.0 }
  0x23   : > { %391 = vst [vmem:[%s569_s25 + $0x58] sm:$0xff] %v359_v9  ;;  %v329_v15 = vmul.f32 0.2, %v265_v5  ;;  %v266_v16 = vadd.f32 %v541_v1, %v227_v10  ;;  %v267_v17 = vadd.f32 %v541_v1, %v228_v11  ;;  %v229_v18 = vmul.f32 %v531_v0, %v190_v6  ;;  %v201_v53 = vld [vmem:[%s536_s20 + $0xd8] sm:$0xff]  ;;  %v203_v3 = vld [vmem:[%s536_s20 + $0xe8] sm:$0xff] }
  0x24   : > { %v230_v19 = vmul.f32 %v531_v0, %v191_v7  ;;  %v360_v20 = vsel %vm296_vm12, %v264_v4, %v328_v14  ;;  %v231_v22 = vmul.f32 %v531_v0, %v192_v12  ;;  %v232_v23 = vmul.f32 %v531_v0, %v193_v13  ;;  %v204_v14 = vld [vmem:[%s536_s20 + $0xf0] sm:$0xff] }
  0x25   : > { %v361_v21 = vsel %vm297_vm13, %v265_v5, %v329_v15  ;;  %392 = vst [vmem:[%s569_s25 + $0x60] sm:$0xff] %v360_v20  ;;  %vm298_vm14 = vcmp.ge.f32.partialorder %v266_v16, 0.0  ;;  %v330_v26 = vmul.f32 0.2, %v266_v16  ;;  %vm299_vm15 = vcmp.ge.f32.partialorder %v267_v17, 0.0  ;;  %v205_v15 = vld [vmem:[%s536_s20 + $0xf8] sm:$0xff] }
  0x26   : > { %393 = vst [vmem:[%s569_s25 + $0x68] sm:$0xff] %v361_v21  ;;  %v331_v27 = vmul.f32 0.2, %v267_v17  ;;  %v268_v28 = vadd.f32 %v541_v1, %v229_v18  ;;  %v269_v29 = vadd.f32 %v541_v1, %v230_v19  ;;  %v270_v30 = vadd.f32 %v541_v1, %v231_v22 }
  0x27   : > { %v271_v31 = vadd.f32 %v541_v1, %v232_v23  ;;  %v362_v32 = vsel %vm298_vm14, %v266_v16, %v330_v26  ;;  %v233_v34 = vmul.f32 %v531_v0, %v194_v24  ;;  %v234_v35 = vmul.f32 %v531_v0, %v195_v25 }
  0x28   : > { %v363_v33 = vsel %vm299_vm15, %v267_v17, %v331_v27  ;;  %394 = vst [vmem:[%s569_s25 + $0x70] sm:$0xff] %v362_v32  ;;  %vm300_vm0 = vcmp.ge.f32.partialorder %v268_v28, 0.0  ;;  %v332_v38 = vmul.f32 0.2, %v268_v28  ;;  %vm301_vm1 = vcmp.ge.f32.partialorder %v269_v29, 0.0 }
  0x29   : > { %395 = vst [vmem:[%s569_s25 + $0x78] sm:$0xff] %v363_v33  ;;  %v333_v39 = vmul.f32 0.2, %v269_v29  ;;  %vm302_vm2 = vcmp.ge.f32.partialorder %v270_v30, 0.0  ;;  %v334_v40 = vmul.f32 0.2, %v270_v30  ;;  %v272_v44 = vadd.f32 %v541_v1, %v233_v34 }
  0x2a   : > { %vm303_vm3 = vcmp.ge.f32.partialorder %v271_v31, 0.0  ;;  %v335_v41 = vmul.f32 0.2, %v271_v31  ;;  %v364_v42 = vsel %vm300_vm0, %v268_v28, %v332_v38  ;;  %v273_v45 = vadd.f32 %v541_v1, %v234_v35 }
  0x2b   : > { %v365_v43 = vsel %vm301_vm1, %v269_v29, %v333_v39  ;;  %396 = vst [vmem:[%s569_s25 + $0x80] sm:$0xff] %v364_v42  ;;  %v366_v48 = vsel %vm302_vm2, %v270_v30, %v334_v40  ;;  %v235_v50 = vmul.f32 %v531_v0, %v196_v36  ;;  %v236_v51 = vmul.f32 %v531_v0, %v197_v37 }
  0x2c   : > { %397 = vst [vmem:[%s569_s25 + $0x88] sm:$0xff] %v365_v43  ;;  %v367_v49 = vsel %vm303_vm3, %v271_v31, %v335_v41  ;;  %398 = vst [vmem:[%s569_s25 + $0x90] sm:$0xff] %v366_v48  ;;  %vm304_vm4 = vcmp.ge.f32.partialorder %v272_v44, 0.0  ;;  %v336_v54 = vmul.f32 0.2, %v272_v44  ;;  %vm305_vm5 = vcmp.ge.f32.partialorder %v273_v45, 0.0 }
  0x2d   : > { %399 = vst [vmem:[%s569_s25 + $0x98] sm:$0xff] %v367_v49  ;;  %v337_v55 = vmul.f32 0.2, %v273_v45  ;;  %v274_v56 = vadd.f32 %v541_v1, %v235_v50  ;;  %v275_v57 = vadd.f32 %v541_v1, %v236_v51  ;;  %v237_v58 = vmul.f32 %v531_v0, %v198_v46 }
  0x2e   : > { %v238_v59 = vmul.f32 %v531_v0, %v199_v47  ;;  %v368_v60 = vsel %vm304_vm4, %v272_v44, %v336_v54  ;;  %v239_v62 = vmul.f32 %v531_v0, %v200_v52  ;;  %v240_v63 = vmul.f32 %v531_v0, %v201_v53 }
  0x2f   : > { %v369_v61 = vsel %vm305_vm5, %v273_v45, %v337_v55  ;;  %400 = vst [vmem:[%s569_s25 + $0xa0] sm:$0xff] %v368_v60  ;;  %vm306_vm6 = vcmp.ge.f32.partialorder %v274_v56, 0.0  ;;  %v338_v4 = vmul.f32 0.2, %v274_v56  ;;  %vm307_vm7 = vcmp.ge.f32.partialorder %v275_v57, 0.0 }
  0x30   : > { %401 = vst [vmem:[%s569_s25 + $0xa8] sm:$0xff] %v369_v61  ;;  %v339_v5 = vmul.f32 0.2, %v275_v57  ;;  %v276_v6 = vadd.f32 %v541_v1, %v237_v58  ;;  %v277_v7 = vadd.f32 %v541_v1, %v238_v59  ;;  %v278_v8 = vadd.f32 %v541_v1, %v239_v62 }
  0x31   : > { %v279_v9 = vadd.f32 %v541_v1, %v240_v63  ;;  %v370_v10 = vsel %vm306_vm6, %v274_v56, %v338_v4  ;;  %v241_v12 = vmul.f32 %v531_v0, %v202_v2  ;;  %v242_v13 = vmul.f32 %v531_v0, %v203_v3 }
  0x32   : > { %v371_v11 = vsel %vm307_vm7, %v275_v57, %v339_v5  ;;  %402 = vst [vmem:[%s569_s25 + $0xb0] sm:$0xff] %v370_v10  ;;  %vm308_vm8 = vcmp.ge.f32.partialorder %v276_v6, 0.0  ;;  %v340_v16 = vmul.f32 0.2, %v276_v6  ;;  %vm309_vm9 = vcmp.ge.f32.partialorder %v277_v7, 0.0 }
  0x33   : > { %403 = vst [vmem:[%s569_s25 + $0xb8] sm:$0xff] %v371_v11  ;;  %v341_v17 = vmul.f32 0.2, %v277_v7  ;;  %vm310_vm10 = vcmp.ge.f32.partialorder %v278_v8, 0.0  ;;  %v342_v18 = vmul.f32 0.2, %v278_v8  ;;  %v280_v22 = vadd.f32 %v541_v1, %v241_v12 }
  0x34   : > { %vm311_vm11 = vcmp.ge.f32.partialorder %v279_v9, 0.0  ;;  %v343_v19 = vmul.f32 0.2, %v279_v9  ;;  %v372_v20 = vsel %vm308_vm8, %v276_v6, %v340_v16  ;;  %v281_v23 = vadd.f32 %v541_v1, %v242_v13 }
  0x35   : > { %v373_v21 = vsel %vm309_vm9, %v277_v7, %v341_v17  ;;  %404 = vst [vmem:[%s569_s25 + $0xc0] sm:$0xff] %v372_v20  ;;  %v374_v24 = vsel %vm310_vm10, %v278_v8, %v342_v18  ;;  %v243_v26 = vmul.f32 %v531_v0, %v204_v14  ;;  %v244_v27 = vmul.f32 %v531_v0, %v205_v15 }
  0x36   : > { %405 = vst [vmem:[%s569_s25 + $0xc8] sm:$0xff] %v373_v21  ;;  %v375_v25 = vsel %vm311_vm11, %v279_v9, %v343_v19  ;;  %406 = vst [vmem:[%s569_s25 + $0xd0] sm:$0xff] %v374_v24  ;;  %vm312_vm12 = vcmp.ge.f32.partialorder %v280_v22, 0.0  ;;  %v344_v28 = vmul.f32 0.2, %v280_v22  ;;  %vm313_vm13 = vcmp.ge.f32.partialorder %v281_v23, 0.0 }
  0x37   : > { %407 = vst [vmem:[%s569_s25 + $0xd8] sm:$0xff] %v375_v25  ;;  %v345_v29 = vmul.f32 0.2, %v281_v23  ;;  %v282_v30 = vadd.f32 %v541_v1, %v243_v26  ;;  %v283_v31 = vadd.f32 %v541_v1, %v244_v27 }
  0x38   : > { %v376_v32 = vsel %vm312_vm12, %v280_v22, %v344_v28 }
  0x39   : > { %v377_v33 = vsel %vm313_vm13, %v281_v23, %v345_v29  ;;  %408 = vst [vmem:[%s569_s25 + $0xe0] sm:$0xff] %v376_v32  ;;  %vm314_vm14 = vcmp.ge.f32.partialorder %v282_v30, 0.0  ;;  %v346_v34 = vmul.f32 0.2, %v282_v30  ;;  %vm315_vm15 = vcmp.ge.f32.partialorder %v283_v31, 0.0 }
  0x3a   : > { %409 = vst [vmem:[%s569_s25 + $0xe8] sm:$0xff] %v377_v33  ;;  %v347_v0 = vmul.f32 0.2, %v283_v31 }
  0x3b   : > { %v378_v35 = vsel %vm314_vm14, %v282_v30, %v346_v34 }
  0x3c   : > { %v379_v36 = vsel %vm315_vm15, %v283_v31, %v347_v0  ;;  %410 = vst [vmem:[%s569_s25 + $0xf0] sm:$0xff] %v378_v35 }
  0x3d   : > { %411 = vst [vmem:[%s569_s25 + $0xf8] sm:$0xff] %v379_v36 }
  0x3e PF: > { %s13_s12 = sadd.s32 1, %s495_s12  }
  0x3f   : > { %p10_p4 = scmp.ge.s32.totalorder %s13_s12, 4  }
  0x41   :  { %12 = sbr.rel (!%p10_p4) target bundleno = 1 (0x1), region = 62 }

// kernel: discriminator_forward.14
= control target key start
LH: loop header
LB: loop body
LE: loop exit
PB: predicated region body
PF: predicated region fallthrough
CT: control target
= control target key end

     0   :  { %s305_s0 = inlined_call_operand.vmem [shape: f32[128,128], index: 0, kind: input, shape index: {}]   ;;  %s306_s1 = inlined_call_operand.vmem [shape: f32[1,128], index: 1, kind: input, shape index: {}]   ;;  %s307_s2 = inlined_call_operand.vmem [shape: f32[1,128], index: 2, kind: input, shape index: {}]   ;;  %s308_s3 = inlined_call_operand.vmem [shape: f32[128,128], index: 3, kind: output, shape index: {}]  }
   0x1   :  { %v14_v0 = vld [vmem:[%s305_s0] sm:$0xff]  ;;  %v15_v4 = vld [vmem:[%s305_s0 + $0x8] sm:$0xff]  ;;  %v16_v5 = vld [vmem:[%s305_s0 + $0x10] sm:$0xff] }
   0x2   :  { %v172_v1 = vld [vmem:[%s306_s1] ss:$0 sm:$0xff]  ;;  %v17_v6 = vld [vmem:[%s305_s0 + $0x18] sm:$0xff]  ;;  %v19_v11 = vld [vmem:[%s305_s0 + $0x28] sm:$0xff] }
   0x3   :  { %v177_v2 = vld [vmem:[%s307_s2] ss:$0 sm:$0xff]  ;;  %v37_v3 = vmul.f32 %v172_v1, %v14_v0  ;;  %v38_v7 = vmul.f32 %v172_v1, %v15_v4  ;;  %v39_v8 = vmul.f32 %v172_v1, %v16_v5  ;;  %v40_v9 = vmul.f32 %v172_v1, %v17_v6  ;;  %v20_v12 = vld [vmem:[%s305_s0 + $0x30] sm:$0xff]  ;;  %v21_v17 = vld [vmem:[%s305_s0 + $0x38] sm:$0xff] }
   0x4   :  { %v18_v10 = vld [vmem:[%s305_s0 + $0x20] sm:$0xff]  ;;  %v42_v15 = vmul.f32 %v172_v1, %v19_v11  ;;  %v43_v16 = vmul.f32 %v172_v1, %v20_v12  ;;  %v44_v21 = vmul.f32 %v172_v1, %v21_v17  ;;  %v23_v30 = vld [vmem:[%s305_s0 + $0x48] sm:$0xff]  ;;  %v24_v31 = vld [vmem:[%s305_s0 + $0x50] sm:$0xff] }
   0x5   :  { %v60_v13 = vadd.f32 %v177_v2, %v37_v3  ;;  %v41_v14 = vmul.f32 %v172_v1, %v18_v10  ;;  %v61_v18 = vadd.f32 %v177_v2, %v38_v7  ;;  %v62_v19 = vadd.f32 %v177_v2, %v39_v8  ;;  %v22_v25 = vld [vmem:[%s305_s0 + $0x40] sm:$0xff]  ;;  %v25_v43 = vld [vmem:[%s305_s0 + $0x58] sm:$0xff]  ;;  %v27_v45 = vld [vmem:[%s305_s0 + $0x68] sm:$0xff] }
   0x6   :  { %v63_v20 = vadd.f32 %v177_v2, %v40_v9  ;;  %v65_v24 = vadd.f32 %v177_v2, %v42_v15  ;;  %v66_v37 = vadd.f32 %v177_v2, %v43_v16  ;;  %v67_v38 = vadd.f32 %v177_v2, %v44_v21  ;;  %v26_v44 = vld [vmem:[%s305_s0 + $0x60] sm:$0xff]  ;;  %v28_v56 = vld [vmem:[%s305_s0 + $0x70] sm:$0xff]  ;;  %v29_v4 = vld [vmem:[%s305_s0 + $0x78] sm:$0xff] }
   0x7   :  { %vm76_vm0 = vcmp.ge.f32.partialorder %v60_v13, 0.0  ;;  %v92_v22 = vmul.f32 0.2, %v60_v13  ;;  %v64_v23 = vadd.f32 %v177_v2, %v41_v14  ;;  %vm77_vm1 = vcmp.ge.f32.partialorder %v61_v18, 0.0 }
   0x8   :  { %v93_v26 = vmul.f32 0.2, %v61_v18  ;;  %vm78_vm2 = vcmp.ge.f32.partialorder %v62_v19, 0.0  ;;  %v94_v27 = vmul.f32 0.2, %v62_v19  ;;  %vm79_vm3 = vcmp.ge.f32.partialorder %v63_v20, 0.0 }
   0x9   :  { %v108_v28 = vsel %vm76_vm0, %v60_v13, %v92_v22  ;;  %v95_v29 = vmul.f32 0.2, %v63_v20  ;;  %vm80_vm4 = vcmp.ge.f32.partialorder %v64_v23, 0.0  ;;  %v96_v34 = vmul.f32 0.2, %v64_v23 }
   0xa   :  { %124 = vst [vmem:[%s308_s3] sm:$0xff] %v108_v28  ;;  %v109_v32 = vsel %vm77_vm1, %v61_v18, %v93_v26  ;;  %v110_v33 = vsel %vm78_vm2, %v62_v19, %v94_v27  ;;  %vm81_vm5 = vcmp.ge.f32.partialorder %v65_v24, 0.0  ;;  %v97_v36 = vmul.f32 0.2, %v65_v24 }
   0xb   :  { %125 = vst [vmem:[%s308_s3 + $0x8] sm:$0xff] %v109_v32  ;;  %126 = vst [vmem:[%s308_s3 + $0x10] sm:$0xff] %v110_v33  ;;  %v111_v35 = vsel %vm79_vm3, %v63_v20, %v95_v29  ;;  %v112_v39 = vsel %vm80_vm4, %v64_v23, %v96_v34  ;;  %v45_v40 = vmul.f32 %v172_v1, %v22_v25  ;;  %vm82_vm6 = vcmp.ge.f32.partialorder %v66_v37, 0.0 }
   0xc   :  { %127 = vst [vmem:[%s308_s3 + $0x18] sm:$0xff] %v111_v35  ;;  %v46_v41 = vmul.f32 %v172_v1, %v23_v30  ;;  %v47_v42 = vmul.f32 %v172_v1, %v24_v31  ;;  %128 = vst [vmem:[%s308_s3 + $0x20] sm:$0xff] %v112_v39  ;;  %v113_v46 = vsel %vm81_vm5, %v65_v24, %v97_v36  ;;  %v98_v47 = vmul.f32 0.2, %v66_v37 }
   0xd   :  { %vm83_vm7 = vcmp.ge.f32.partialorder %v67_v38, 0.0  ;;  %129 = vst [vmem:[%s308_s3 + $0x28] sm:$0xff] %v113_v46  ;;  %v99_v48 = vmul.f32 0.2, %v67_v38  ;;  %v68_v49 = vadd.f32 %v177_v2, %v45_v40  ;;  %v48_v53 = vmul.f32 %v172_v1, %v25_v43 }
   0xe   :  { %v69_v50 = vadd.f32 %v177_v2, %v46_v41  ;;  %v70_v51 = vadd.f32 %v177_v2, %v47_v42  ;;  %v114_v52 = vsel %vm82_vm6, %v66_v37, %v98_v47  ;;  %v49_v54 = vmul.f32 %v172_v1, %v26_v44 }
   0xf   :  { %v50_v55 = vmul.f32 %v172_v1, %v27_v45  ;;  %130 = vst [vmem:[%s308_s3 + $0x30] sm:$0xff] %v114_v52  ;;  %v115_v57 = vsel %vm83_vm7, %v67_v38, %v99_v48  ;;  %vm84_vm8 = vcmp.ge.f32.partialorder %v68_v49, 0.0  ;;  %v100_v58 = vmul.f32 0.2, %v68_v49 }
  0x10   :  { %vm85_vm9 = vcmp.ge.f32.partialorder %v69_v50, 0.0  ;;  %131 = vst [vmem:[%s308_s3 + $0x38] sm:$0xff] %v115_v57  ;;  %v101_v59 = vmul.f32 0.2, %v69_v50  ;;  %vm86_vm10 = vcmp.ge.f32.partialorder %v70_v51, 0.0  ;;  %v71_v61 = vadd.f32 %v177_v2, %v48_v53 }
  0x11   :  { %v102_v60 = vmul.f32 0.2, %v70_v51  ;;  %v116_v62 = vsel %vm84_vm8, %v68_v49, %v100_v58  ;;  %v72_v63 = vadd.f32 %v177_v2, %v49_v54  ;;  %v73_v0 = vadd.f32 %v177_v2, %v50_v55 }
  0x12   :  { %v51_v3 = vmul.f32 %v172_v1, %v28_v56  ;;  %132 = vst [vmem:[%s308_s3 + $0x40] sm:$0xff] %v116_v62  ;;  %v117_v5 = vsel %vm85_vm9, %v69_v50, %v101_v59  ;;  %vm87_vm11 = vcmp.ge.f32.partialorder %v71_v61, 0.0  ;;  %v103_v7 = vmul.f32 0.2, %v71_v61 }
  0x13   :  { %v118_v6 = vsel %vm86_vm10, %v70_v51, %v102_v60  ;;  %133 = vst [vmem:[%s308_s3 + $0x48] sm:$0xff] %v117_v5  ;;  %vm88_vm12 = vcmp.ge.f32.partialorder %v72_v63, 0.0  ;;  %v104_v8 = vmul.f32 0.2, %v72_v63  ;;  %vm89_vm13 = vcmp.ge.f32.partialorder %v73_v0, 0.0 }
  0x14   :  { %134 = vst [vmem:[%s308_s3 + $0x50] sm:$0xff] %v118_v6  ;;  %v105_v9 = vmul.f32 0.2, %v73_v0  ;;  %v119_v10 = vsel %vm87_vm11, %v71_v61, %v103_v7  ;;  %v74_v11 = vadd.f32 %v177_v2, %v51_v3  ;;  %v52_v12 = vmul.f32 %v172_v1, %v29_v4 }
  0x15   :  { %135 = vst [vmem:[%s308_s3 + $0x58] sm:$0xff] %v119_v10  ;;  %v120_v13 = vsel %vm88_vm12, %v72_v63, %v104_v8 }
  0x16   :  { %v121_v14 = vsel %vm89_vm13, %v73_v0, %v105_v9  ;;  %136 = vst [vmem:[%s308_s3 + $0x60] sm:$0xff] %v120_v13  ;;  %vm90_vm14 = vcmp.ge.f32.partialorder %v74_v11, 0.0  ;;  %v106_v15 = vmul.f32 0.2, %v74_v11  ;;  %v75_v16 = vadd.f32 %v177_v2, %v52_v12 }
  0x17   :  { %137 = vst [vmem:[%s308_s3 + $0x68] sm:$0xff] %v121_v14 }
  0x18   :  { %v122_v17 = vsel %vm90_vm14, %v74_v11, %v106_v15  ;;  %vm91_vm15 = vcmp.ge.f32.partialorder %v75_v16, 0.0  ;;  %v107_v1 = vmul.f32 0.2, %v75_v16 }
  0x19   :  { %138 = vst [vmem:[%s308_s3 + $0x70] sm:$0xff] %v122_v17 }
  0x1a   :  { %v123_v18 = vsel %vm91_vm15, %v75_v16, %v107_v1 }
  0x1b   :  { %139 = vst [vmem:[%s308_s3 + $0x78] sm:$0xff] %v123_v18 }

// kernel: discriminator_forward.13
= control target key start
LH: loop header
LB: loop body
LE: loop exit
PB: predicated region body
PF: predicated region fallthrough
CT: control target
= control target key end

     0   :  { %s1597_s12 = smov 0   ;;  %s1599_s13 = smov 0   ;;  %s1858_s0 = inlined_call_operand.vmem [shape: bf16[128,2048], index: 0, kind: input, shape index: {}]   ;;  %s1859_s1 = inlined_call_operand.vmem [shape: bf16[2048,128], index: 1, kind: input, shape index: {}]   ;;  %s1860_s2 = inlined_call_operand.vmem [shape: f32[128,128], index: 2, kind: output, shape index: {0}]   ;;  %s1861_s3 = inlined_call_operand.vmem [shape: f32[8,128], index: 3, kind: output, shape index: {1}]  }
   0x1   :  { %s1601_s14 = smov 0   ;;  %s1603_s15 = smov 0  }
   0x2   :  { %s1605_s16 = smov 0  }
   0x3 LB: > { %s23_s17 = sadd.s32 1, %s1569_s15  ;;  %p42_p1 = scmp.ne.s32.totalorder %s1561_s13, %s1557_s12  ;;  %s1573_s16 = sphi %s1605_s16, %s14_s16   ;;  %s1569_s15 = sphi %s1603_s15, %s1865_s15   ;;  %s1565_s14 = sphi %s1601_s14, %s1864_s14   ;;  %s1561_s13 = sphi %s1599_s13, %s1863_s13   ;;  %s1557_s12 = sphi %s1597_s12, %s1862_s12  }
   0x4   : > { %p24_p0 = scmp.ge.s32.totalorder %s23_s17, 4  ;;  %p43_p2 = scmp.eq.s32.totalorder %s1573_s16, 0 }
   0x5   : > { %s35_s19 = sadd.s32 1, %s1561_s13  ;;  %p1204_p5 = scmp.ge.s32.totalorder %s1573_s16, 4 }
   0x6   : > { %s1867_s17 = smov (%p24_p0, %s23_s17), 0  ;;  %p44_p3 = por %p43_p2, %p42_p1 }
   0x7   : > { %s31_s18 = ssub.s32 %s1569_s15, %s1867_s17  ;;  %141 = sbr.rel (%p1204_p5) target bundleno = 34 (0x22), region = 16 }
   0x8   : > { %p33_p4 = scmp.eq.s32.totalorder %s31_s18, 0 }
   0xa   : > { %s1632_s20 = scalar_select %p33_p4, %s1561_s13, %s35_s19  }
   0xe   : > { %144 = sbr.rel (!%p44_p3) target bundleno = 34 (0x22), region = 20  ;;  %s146_s21 = sand.u32 (%p44_p3), 1, %s1561_s13  }
   0xf   : > { %s1283_s22 = sshll.u32 (%p44_p3), %s1569_s15, 4  ;;  %s1205_s23 = sshll.u32 (%p44_p3), %s146_s21, 8 }
  0x10   : > { %s1640_s26 = scalar_lea.vmem (%p44_p3), %s1858_s0, %s1283_s22  ;;  %s1645_s27 = scalar_lea.vmem (%p44_p3), [#allocation3], %s1205_s23 }
  0x11   : > { %v167_v0 = vld [vmem:[%s1640_s26] sm:$0xff] (%p44_p3)  ;;  %v169_v1 = vld [vmem:[%s1640_s26 + $0x8] sm:$0xff] (%p44_p3) }
  0x12   : > { %v171_v2 = vld [vmem:[%s1640_s26 + $0x40] sm:$0xff] (%p44_p3)  ;;  %168 = vst [vmem:[%s1645_s27] sm:$0xff] (%p44_p3), %v167_v0  ;;  %170 = vst [vmem:[%s1645_s27 + $0x8] sm:$0xff] (%p44_p3), %v169_v1  ;;  %v173_v3 = vld [vmem:[%s1640_s26 + $0x48] sm:$0xff] (%p44_p3) }
  0x13   : > { %172 = vst [vmem:[%s1645_s27 + $0x10] sm:$0xff] (%p44_p3), %v171_v2  ;;  %v175_v4 = vld [vmem:[%s1640_s26 + $0x80] sm:$0xff] (%p44_p3)  ;;  %v177_v5 = vld [vmem:[%s1640_s26 + $0x88] sm:$0xff] (%p44_p3)  ;;  %174 = vst [vmem:[%s1645_s27 + $0x18] sm:$0xff] (%p44_p3), %v173_v3 }
  0x14   : > { %176 = vst [vmem:[%s1645_s27 + $0x20] sm:$0xff] (%p44_p3), %v175_v4  ;;  %178 = vst [vmem:[%s1645_s27 + $0x28] sm:$0xff] (%p44_p3), %v177_v5  ;;  %v179_v6 = vld [vmem:[%s1640_s26 + $0xc0] sm:$0xff] (%p44_p3)  ;;  %v181_v7 = vld [vmem:[%s1640_s26 + $0xc8] sm:$0xff] (%p44_p3) }
  0x15   : > { %v183_v8 = vld [vmem:[%s1640_s26 + $0x100] sm:$0xff]  ;;  %180 = vst [vmem:[%s1645_s27 + $0x30] sm:$0xff] %v179_v6  ;;  %182 = vst [vmem:[%s1645_s27 + $0x38] sm:$0xff] %v181_v7  ;;  %v185_v9 = vld [vmem:[%s1640_s26 + $0x108] sm:$0xff] }
  0x16   : > { %184 = vst [vmem:[%s1645_s27 + $0x40] sm:$0xff] %v183_v8  ;;  %v187_v10 = vld [vmem:[%s1640_s26 + $0x140] sm:$0xff]  ;;  %v189_v11 = vld [vmem:[%s1640_s26 + $0x148] sm:$0xff]  ;;  %186 = vst [vmem:[%s1645_s27 + $0x48] sm:$0xff] %v185_v9 }
  0x17   : > { %188 = vst [vmem:[%s1645_s27 + $0x50] sm:$0xff] %v187_v10  ;;  %190 = vst [vmem:[%s1645_s27 + $0x58] sm:$0xff] %v189_v11  ;;  %v191_v12 = vld [vmem:[%s1640_s26 + $0x180] sm:$0xff]  ;;  %v193_v13 = vld [vmem:[%s1640_s26 + $0x188] sm:$0xff] }
  0x18   : > { %v195_v14 = vld [vmem:[%s1640_s26 + $0x1c0] sm:$0xff]  ;;  %192 = vst [vmem:[%s1645_s27 + $0x60] sm:$0xff] %v191_v12  ;;  %194 = vst [vmem:[%s1645_s27 + $0x68] sm:$0xff] %v193_v13  ;;  %v197_v15 = vld [vmem:[%s1640_s26 + $0x1c8] sm:$0xff] }
  0x19   : > { %196 = vst [vmem:[%s1645_s27 + $0x70] sm:$0xff] %v195_v14  ;;  %v199_v16 = vld [vmem:[%s1640_s26 + $0x200] sm:$0xff]  ;;  %v201_v17 = vld [vmem:[%s1640_s26 + $0x208] sm:$0xff]  ;;  %198 = vst [vmem:[%s1645_s27 + $0x78] sm:$0xff] %v197_v15 }
  0x1a   : > { %200 = vst [vmem:[%s1645_s27 + $0x80] sm:$0xff] %v199_v16  ;;  %202 = vst [vmem:[%s1645_s27 + $0x88] sm:$0xff] %v201_v17  ;;  %v203_v18 = vld [vmem:[%s1640_s26 + $0x240] sm:$0xff]  ;;  %v205_v19 = vld [vmem:[%s1640_s26 + $0x248] sm:$0xff] }
  0x1b   : > { %v207_v20 = vld [vmem:[%s1640_s26 + $0x280] sm:$0xff]  ;;  %204 = vst [vmem:[%s1645_s27 + $0x90] sm:$0xff] %v203_v18  ;;  %206 = vst [vmem:[%s1645_s27 + $0x98] sm:$0xff] %v205_v19  ;;  %v209_v21 = vld [vmem:[%s1640_s26 + $0x288] sm:$0xff] }
  0x1c   : > { %208 = vst [vmem:[%s1645_s27 + $0xa0] sm:$0xff] %v207_v20  ;;  %v211_v22 = vld [vmem:[%s1640_s26 + $0x2c0] sm:$0xff]  ;;  %v213_v23 = vld [vmem:[%s1640_s26 + $0x2c8] sm:$0xff]  ;;  %210 = vst [vmem:[%s1645_s27 + $0xa8] sm:$0xff] %v209_v21 }
  0x1d   : > { %212 = vst [vmem:[%s1645_s27 + $0xb0] sm:$0xff] %v211_v22  ;;  %214 = vst [vmem:[%s1645_s27 + $0xb8] sm:$0xff] %v213_v23  ;;  %v215_v24 = vld [vmem:[%s1640_s26 + $0x300] sm:$0xff]  ;;  %v217_v25 = vld [vmem:[%s1640_s26 + $0x308] sm:$0xff] }
  0x1e   : > { %v219_v26 = vld [vmem:[%s1640_s26 + $0x340] sm:$0xff]  ;;  %216 = vst [vmem:[%s1645_s27 + $0xc0] sm:$0xff] %v215_v24  ;;  %218 = vst [vmem:[%s1645_s27 + $0xc8] sm:$0xff] %v217_v25  ;;  %v221_v27 = vld [vmem:[%s1640_s26 + $0x348] sm:$0xff] }
  0x1f   : > { %220 = vst [vmem:[%s1645_s27 + $0xd0] sm:$0xff] %v219_v26  ;;  %v223_v28 = vld [vmem:[%s1640_s26 + $0x380] sm:$0xff]  ;;  %v225_v29 = vld [vmem:[%s1640_s26 + $0x388] sm:$0xff]  ;;  %222 = vst [vmem:[%s1645_s27 + $0xd8] sm:$0xff] %v221_v27 }
  0x20   : > { %224 = vst [vmem:[%s1645_s27 + $0xe0] sm:$0xff] %v223_v28  ;;  %226 = vst [vmem:[%s1645_s27 + $0xe8] sm:$0xff] %v225_v29  ;;  %v227_v30 = vld [vmem:[%s1640_s26 + $0x3c0] sm:$0xff]  ;;  %v229_v31 = vld [vmem:[%s1640_s26 + $0x3c8] sm:$0xff] }
  0x21   : > { %228 = vst [vmem:[%s1645_s27 + $0xf0] sm:$0xff] %v227_v30  ;;  %230 = vst [vmem:[%s1645_s27 + $0xf8] sm:$0xff] %v229_v31 }
  0x22 PF: > { %p1208_p6 = scmp.ge.s32.totalorder %s1573_s16, 1  ;;  %p244_p7 = scmp.lt.s32.totalorder %s1573_s16, 5 }
  0x24   : > { %p245_p8 = pnand %p1208_p6, %p244_p7 }
  0x25   : > { %s251_s28 = sand.u32 (!%p245_p8), 1, %s1557_s12   ;;  %s1210_s29 = sshll.u32 (!%p245_p8), %s1565_s14, 6 }
  0x26   : > { %248 = sbr.rel (%p245_p8) target bundleno = 403 (0x193), region = 47  ;;  %s1209_s30 = sshll.u32 (!%p245_p8), %s251_s28, 8 }
  0x27   : > { %p282_p9 = scmp.lt.s32.totalorder (!%p245_p8), %s1210_s29, 255  ;;  %p295_p10 = scmp.eq.s32.totalorder (!%p245_p8), %s1565_s14, 0 }
  0x28   : > { %s1718_s8 = scalar_lea.vmem (!%p245_p8), [#allocation3], %s1209_s30 }
  0x2d   : > { %s1869_s29 = smov (!%p282_p9, %s1210_s29), 255  ;;  %299 = sbr.rel (!%p295_p10) target bundleno = 52 (0x34), region = 55 }
  0x2e   : > { %s1211_s4 = sshll.u32 %s1869_s29, 2  ;;  %v1575_v32 = vmov (%p295_p10), 0.0  }
  0x2f   : > { %s1716_s7 = scalar_lea.vmem %s1859_s1, %s1211_s4  ;;  %300 = vst [vmem:[%s1861_s3] sm:$0xff] (%p295_p10), %v1575_v32 }
  0x34 PF: > { %p1213_p11 = scmp.ne.s32.totalorder %s1565_s14, 0 }
  0x35   : > { %v1576_v33 = vmov (!%p1213_p11), 0.0  }
  0x36   : > { %303 = sbr.rel (%p1213_p11) target bundleno = 62 (0x3e), region = 59  ;;  %304 = vst [vmem:[#allocation2] sm:$0xff] (!%p1213_p11), %v1576_v33  ;;  %305 = vst [vmem:[#allocation2 + $0x8] sm:$0xff] (!%p1213_p11), %v1576_v33 }
  0x37   : > { %306 = vst [vmem:[#allocation2 + $0x10] sm:$0xff] (!%p1213_p11), %v1576_v33  ;;  %307 = vst [vmem:[#allocation2 + $0x18] sm:$0xff] (!%p1213_p11), %v1576_v33 }
  0x38   : > { %308 = vst [vmem:[#allocation2 + $0x20] sm:$0xff] (!%p1213_p11), %v1576_v33  ;;  %309 = vst [vmem:[#allocation2 + $0x28] sm:$0xff] (!%p1213_p11), %v1576_v33 }
  0x39   : > { %310 = vst [vmem:[#allocation2 + $0x30] sm:$0xff] (!%p1213_p11), %v1576_v33  ;;  %311 = vst [vmem:[#allocation2 + $0x38] sm:$0xff] (!%p1213_p11), %v1576_v33 }
  0x3a   : > { %312 = vst [vmem:[#allocation2 + $0x40] sm:$0xff] (!%p1213_p11), %v1576_v33  ;;  %313 = vst [vmem:[#allocation2 + $0x48] sm:$0xff] (!%p1213_p11), %v1576_v33 }
  0x3b   : > { %314 = vst [vmem:[#allocation2 + $0x50] sm:$0xff] (!%p1213_p11), %v1576_v33  ;;  %315 = vst [vmem:[#allocation2 + $0x58] sm:$0xff] (!%p1213_p11), %v1576_v33 }
  0x3c   : > { %316 = vst [vmem:[#allocation2 + $0x60] sm:$0xff] (!%p1213_p11), %v1576_v33  ;;  %317 = vst [vmem:[#allocation2 + $0x68] sm:$0xff] (!%p1213_p11), %v1576_v33 }
  0x3d   : > { %318 = vst [vmem:[#allocation2 + $0x70] sm:$0xff] %v1576_v33  ;;  %319 = vst [vmem:[#allocation2 + $0x78] sm:$0xff] %v1576_v33 }
  0x3e PF: > { %v1455_v34 = vld [vmem:[%s1716_s7 + $0x40] sm:$0xff]   ;;  %v1459_v38 = vld [vmem:[%s1716_s7 + $0x48] sm:$0xff]   ;;  %v1463_v42 = vld [vmem:[%s1716_s7 + $0x50] sm:$0xff]   ;;  %p1278_p12 = scmp.ne.s32.totalorder %s1565_s14, 3 }
  0x3f   : > { %v1456_v35 = vld [vmem:[%s1716_s7 + $0xc0] sm:$0xff]   ;;  %1285 = vmatprep.subr.bf16.mxu0 %v1455_v34  ;;  %v1460_v39 = vld [vmem:[%s1716_s7 + $0xc8] sm:$0xff]   ;;  %v1464_v43 = vld [vmem:[%s1716_s7 + $0xd0] sm:$0xff]  }
  0x40   : > { %v1457_v36 = vld [vmem:[%s1716_s7] sm:$0xff]   ;;  %1349 = vmatprep.subr.bf16.mxu1 %v1456_v35  ;;  %v1461_v40 = vld [vmem:[%s1716_s7 + $0x8] sm:$0xff]   ;;  %v1465_v44 = vld [vmem:[%s1716_s7 + $0x10] sm:$0xff]  }
  0x41   : > { %v1458_v37 = vld [vmem:[%s1716_s7 + $0x80] sm:$0xff]   ;;  %1286 = vmatpush3.bf16.msra.mxu0 %v1457_v36  ;;  %v1462_v41 = vld [vmem:[%s1716_s7 + $0x88] sm:$0xff]   ;;  %v1466_v45 = vld [vmem:[%s1716_s7 + $0x90] sm:$0xff]  }
  0x42   : > { %1350 = vmatpush3.bf16.msra.mxu1 %v1458_v37  ;;  %1287 = vmatprep.subr.bf16.mxu0 %v1459_v38  ;;  %v1467_v46 = vld [vmem:[%s1716_s7 + $0x58] sm:$0xff]   ;;  %v1471_v50 = vld [vmem:[%s1716_s7 + $0x60] sm:$0xff]   ;;  %v1475_v54 = vld [vmem:[%s1716_s7 + $0x68] sm:$0xff]  }
  0x43   : > { %1351 = vmatprep.subr.bf16.mxu1 %v1460_v39  ;;  %v1468_v47 = vld [vmem:[%s1716_s7 + $0xd8] sm:$0xff]   ;;  %v1472_v51 = vld [vmem:[%s1716_s7 + $0xe0] sm:$0xff]   ;;  %v1476_v55 = vld [vmem:[%s1716_s7 + $0xe8] sm:$0xff]  }
  0x44   : > { %v1469_v48 = vld [vmem:[%s1716_s7 + $0x18] sm:$0xff]   ;;  %v1473_v52 = vld [vmem:[%s1716_s7 + $0x20] sm:$0xff]   ;;  %v1477_v56 = vld [vmem:[%s1716_s7 + $0x28] sm:$0xff]  }
  0x45   : > { %1288 = vmatpush3.bf16.msra.mxu0 %v1461_v40  ;;  %v1470_v49 = vld [vmem:[%s1716_s7 + $0x98] sm:$0xff]   ;;  %v1474_v53 = vld [vmem:[%s1716_s7 + $0xa0] sm:$0xff]   ;;  %v1478_v57 = vld [vmem:[%s1716_s7 + $0xa8] sm:$0xff]  }
  0x46   : > { %1352 = vmatpush3.bf16.msra.mxu1 %v1462_v41  ;;  %1289 = vmatprep.subr.bf16.mxu0 %v1463_v42  ;;  %v1479_v58 = vld [vmem:[%s1716_s7 + $0x70] sm:$0xff]   ;;  %v1483_v62 = vld [vmem:[%s1716_s7 + $0x78] sm:$0xff]  }
  0x47   : > { %1353 = vmatprep.subr.bf16.mxu1 %v1464_v43  ;;  %v1480_v59 = vld [vmem:[%s1716_s7 + $0xf0] sm:$0xff]   ;;  %v1484_v63 = vld [vmem:[%s1716_s7 + $0xf8] sm:$0xff]   ;;  %v320_v43 = vld [vmem:[#allocation2] sm:$0xff] }
  0x48   : > { %v1481_v60 = vld [vmem:[%s1716_s7 + $0x30] sm:$0xff]   ;;  %v1485_v0 = vld [vmem:[%s1716_s7 + $0x38] sm:$0xff]  }
  0x49   : > { %1290 = vmatpush3.bf16.msra.mxu0 %v1465_v44  ;;  %v1482_v61 = vld [vmem:[%s1716_s7 + $0xb0] sm:$0xff]   ;;  %v1486_v1 = vld [vmem:[%s1716_s7 + $0xb8] sm:$0xff]  }
  0x4a   : > { %1354 = vmatpush3.bf16.msra.mxu1 %v1466_v45  ;;  %1291 = vmatprep.subr.bf16.mxu0 %v1467_v46  ;;  %v1487_v2 = vld [vmem:[%s1718_s8] ss:$16 sps:$4 sm:$0xff]   ;;  %v1489_v3 = vld [vmem:[%s1718_s8 + $0x4] ss:$16 sps:$4 sm:$0xff]   ;;  %v1490_v4 = vld [vmem:[%s1718_s8 + $0x8] ss:$16 sps:$4 sm:$0xff]  }
  0x4b   : > { %1355 = vmatprep.subr.bf16.mxu1 %v1468_v47  ;;  %v1492_v5 = vld [vmem:[%s1718_s8 + $0xc] ss:$16 sps:$4 sm:$0xff]   ;;  %816 = vmatprep.mubr.bf16.mxu0 %v1489_v3  ;;  %v1493_v6 = vld [vmem:[%s1718_s8 + $0x24] ss:$16 sps:$4 sm:$0xff]   ;;  %v1497_v8 = vld [vmem:[%s1718_s8 + $0x20] ss:$16 sps:$4 sm:$0xff]  }
  0x4c   : > { %913 = vmatprep.mubr.bf16.mxu1 %v1492_v5  ;;  %v1495_v7 = vld [vmem:[%s1718_s8 + $0x2c] ss:$16 sps:$4 sm:$0xff]   ;;  %v1498_v9 = vld [vmem:[%s1718_s8 + $0x28] ss:$16 sps:$4 sm:$0xff]   ;;  %v1499_v10 = vld [vmem:[%s1718_s8 + $0x44] ss:$16 sps:$4 sm:$0xff]  }
  0x4d   : > { %1292 = vmatpush3.bf16.msra.mxu0 %v1469_v48  ;;  %v1501_v11 = vld [vmem:[%s1718_s8 + $0x4c] ss:$16 sps:$4 sm:$0xff]   ;;  %v1503_v12 = vld [vmem:[%s1718_s8 + $0x40] ss:$16 sps:$4 sm:$0xff]   ;;  %v1504_v13 = vld [vmem:[%s1718_s8 + $0x48] ss:$16 sps:$4 sm:$0xff]  }
  0x4e   : > { %1356 = vmatpush3.bf16.msra.mxu1 %v1470_v49  ;;  %1293 = vmatprep.subr.bf16.mxu0 %v1471_v50  ;;  %v1505_v14 = vld [vmem:[%s1718_s8 + $0x64] ss:$16 sps:$4 sm:$0xff]   ;;  %v1507_v15 = vld [vmem:[%s1718_s8 + $0x6c] ss:$16 sps:$4 sm:$0xff]   ;;  %v1509_v16 = vld [vmem:[%s1718_s8 + $0x60] ss:$16 sps:$4 sm:$0xff]  }
  0x4f   : > { %1357 = vmatprep.subr.bf16.mxu1 %v1472_v51  ;;  %v1510_v17 = vld [vmem:[%s1718_s8 + $0x68] ss:$16 sps:$4 sm:$0xff]   ;;  %v1511_v18 = vld [vmem:[%s1718_s8 + $0x84] ss:$16 sps:$4 sm:$0xff]   ;;  %v1513_v19 = vld [vmem:[%s1718_s8 + $0x8c] ss:$16 sps:$4 sm:$0xff]  }
  0x50   : > { %v1515_v20 = vld [vmem:[%s1718_s8 + $0x80] ss:$16 sps:$4 sm:$0xff]   ;;  %v1516_v21 = vld [vmem:[%s1718_s8 + $0x88] ss:$16 sps:$4 sm:$0xff]   ;;  %v1517_v22 = vld [vmem:[%s1718_s8 + $0xa4] ss:$16 sps:$4 sm:$0xff]  }
  0x51   : > { %1294 = vmatpush3.bf16.msra.mxu0 %v1473_v52  ;;  %v1519_v23 = vld [vmem:[%s1718_s8 + $0xac] ss:$16 sps:$4 sm:$0xff]   ;;  %v1521_v24 = vld [vmem:[%s1718_s8 + $0xa0] ss:$16 sps:$4 sm:$0xff]   ;;  %v1522_v25 = vld [vmem:[%s1718_s8 + $0xa8] ss:$16 sps:$4 sm:$0xff]  }
  0x52   : > { %1358 = vmatpush3.bf16.msra.mxu1 %v1474_v53  ;;  %1295 = vmatprep.subr.bf16.mxu0 %v1475_v54  ;;  %v1523_v26 = vld [vmem:[%s1718_s8 + $0xc4] ss:$16 sps:$4 sm:$0xff]   ;;  %v1525_v27 = vld [vmem:[%s1718_s8 + $0xcc] ss:$16 sps:$4 sm:$0xff]   ;;  %v1527_v28 = vld [vmem:[%s1718_s8 + $0xc0] ss:$16 sps:$4 sm:$0xff]  }
  0x53   : > { %1359 = vmatprep.subr.bf16.mxu1 %v1476_v55  ;;  %v1528_v29 = vld [vmem:[%s1718_s8 + $0xc8] ss:$16 sps:$4 sm:$0xff]   ;;  %v1529_v30 = vld [vmem:[%s1718_s8 + $0xe4] ss:$16 sps:$4 sm:$0xff]   ;;  %v1531_v31 = vld [vmem:[%s1718_s8 + $0xec] ss:$16 sps:$4 sm:$0xff]  }
  0x54   : > { %v1533_v32 = vld [vmem:[%s1718_s8 + $0xe0] ss:$16 sps:$4 sm:$0xff]   ;;  %v1534_v33 = vld [vmem:[%s1718_s8 + $0xe8] ss:$16 sps:$4 sm:$0xff]  }
  0x55   : > { %1296 = vmatpush3.bf16.msra.mxu0 %v1477_v56  ;;  %v321_v48 = vld [vmem:[#allocation2 + $0x8] sm:$0xff] }
  0x56   : > { %1360 = vmatpush3.bf16.msra.mxu1 %v1478_v57  ;;  %1297 = vmatprep.subr.bf16.mxu0 %v1479_v58 }
  0x57   : > { %1361 = vmatprep.subr.bf16.mxu1 %v1480_v59 }
  0x59   : > { %1298 = vmatpush3.bf16.msra.mxu0 %v1481_v60 }
  0x5a   : > { %1362 = vmatpush3.bf16.msra.mxu1 %v1482_v61  ;;  %1299 = vmatprep.subr.bf16.mxu0 %v1483_v62  ;;  %v322_v61 = vld [vmem:[#allocation2 + $0x10] sm:$0xff] }
  0x5b   : > { %1363 = vmatprep.subr.bf16.mxu1 %v1484_v63 }
  0x5d   : > { %1300 = vmatpush3.bf16.msra.mxu0 %v1485_v0 }
  0x5e   : > { %1364 = vmatpush3.bf16.msra.mxu1 %v1486_v1 }
  0x60   : > { %817 = vmatmul.mubr.bf16.vlgmr.msra.gmra.mrb[0].mxu0 %v1487_v2  ;;  %v323_v2 = vld [vmem:[#allocation2 + $0x18] sm:$0xff] }
  0x61   : > { %914 = vmatmul.mubr.bf16.vlgmr.msra.gmra.mrb[0].mxu1 %v1490_v4  ;;  %824 = vmatprep.mubr.bf16.mxu0 %v1493_v6 }
  0x62   : > { %921 = vmatprep.mubr.bf16.mxu1 %v1495_v7 }
  0x68   : > { %825 = vmatmul.mubr.bf16.gmra.mrb[4].mxu0 %v1497_v8 }
  0x69   : > { %922 = vmatmul.mubr.bf16.gmra.mrb[4].mxu1 %v1498_v9  ;;  %832 = vmatprep.mubr.bf16.mxu0 %v1499_v10 }
  0x6a   : > { %929 = vmatprep.mubr.bf16.mxu1 %v1501_v11 }
  0x70   : > { %833 = vmatmul.mubr.bf16.gmra.mrb[8].mxu0 %v1503_v12 }
  0x71   : > { %930 = vmatmul.mubr.bf16.gmra.mrb[8].mxu1 %v1504_v13  ;;  %840 = vmatprep.mubr.bf16.mxu0 %v1505_v14 }
  0x72   : > { %937 = vmatprep.mubr.bf16.mxu1 %v1507_v15  ;;  %v324_v15 = vld [vmem:[#allocation2 + $0x20] sm:$0xff] }
  0x78   : > { %841 = vmatmul.mubr.bf16.gmra.mrb[12].mxu0 %v1509_v16 }
  0x79   : > { %938 = vmatmul.mubr.bf16.gmra.mrb[12].mxu1 %v1510_v17  ;;  %848 = vmatprep.mubr.bf16.mxu0 %v1511_v18 }
  0x7a   : > { %945 = vmatprep.mubr.bf16.mxu1 %v1513_v19 }
  0x80   : > { %849 = vmatmul.mubr.bf16.gmra.mrb[16].mxu0 %v1515_v20  ;;  %v325_v20 = vld [vmem:[#allocation2 + $0x28] sm:$0xff] }
  0x81   : > { %946 = vmatmul.mubr.bf16.gmra.mrb[16].mxu1 %v1516_v21  ;;  %856 = vmatprep.mubr.bf16.mxu0 %v1517_v22 }
  0x82   : > { %953 = vmatprep.mubr.bf16.mxu1 %v1519_v23 }
  0x88   : > { %857 = vmatmul.mubr.bf16.gmra.mrb[20].mxu0 %v1521_v24 }
  0x89   : > { %954 = vmatmul.mubr.bf16.gmra.mrb[20].mxu1 %v1522_v25  ;;  %864 = vmatprep.mubr.bf16.mxu0 %v1523_v26 }
  0x8a   : > { %961 = vmatprep.mubr.bf16.mxu1 %v1525_v27 }
  0x90   : > { %865 = vmatmul.mubr.bf16.gmra.mrb[24].mxu0 %v1527_v28 }
  0x91   : > { %962 = vmatmul.mubr.bf16.gmra.mrb[24].mxu1 %v1528_v29  ;;  %872 = vmatprep.mubr.bf16.mxu0 %v1529_v30 }
  0x92   : > { %969 = vmatprep.mubr.bf16.mxu1 %v1531_v31 }
  0x98   : > { %873 = vmatmul.mubr.bf16.gmra.mrb[28].mxu0 %v1533_v32 }
  0x99   : > { %970 = vmatmul.mubr.bf16.gmra.mrb[28].mxu1 %v1534_v33  ;;  %v326_v33 = vld [vmem:[#allocation2 + $0x30] sm:$0xff] }
 0x133   : > { %v1301_v34 = vpop.f32.mrb[0].mxu0 }
 0x134   : > { %v1365_v35 = vpop.f32.mrb[0].mxu1  ;;  %v1302_v36 = vpop.f32.mrb[1].mxu0 }
 0x135   : > { %v1303_v37 = vadd.f32 %v1302_v36, %v1301_v34  ;;  %v1366_v38 = vpop.f32.mrb[1].mxu1  ;;  %v1304_v39 = vpop.f32.mrb[2].mxu0 }
 0x136   : > { %v1367_v40 = vadd.f32 %v1366_v38, %v1365_v35  ;;  %v1368_v41 = vpop.f32.mrb[2].mxu1  ;;  %v1305_v42 = vpop.f32.mrb[3].mxu0  ;;  %v327_v38 = vld [vmem:[#allocation2 + $0x38] sm:$0xff] }
 0x137   : > { %v1306_v44 = vadd.f32 %v1305_v42, %v1304_v39  ;;  %v1369_v45 = vpop.f32.mrb[3].mxu1 }
 0x138   : > { %v916_v46 = vadd.f32 %v1367_v40, %v1303_v37  ;;  %v1370_v47 = vadd.f32 %v1369_v45, %v1368_v41 }
 0x13a   : > { %v978_v49 = vadd.f32 %v916_v46, %v320_v43  ;;  %v919_v50 = vadd.f32 %v1370_v47, %v1306_v44 }
 0x13b   : > { %v1307_v51 = vpop.f32.mrb[4].mxu0 }
 0x13c   : > { %994 = vst [vmem:[#allocation2] sm:$0xff] %v978_v49  ;;  %v979_v52 = vadd.f32 %v919_v50, %v321_v48  ;;  %v1371_v53 = vpop.f32.mrb[4].mxu1  ;;  %v1308_v54 = vpop.f32.mrb[5].mxu0 }
 0x13d   : > { %v1309_v55 = vadd.f32 %v1308_v54, %v1307_v51  ;;  %v1372_v56 = vpop.f32.mrb[5].mxu1  ;;  %v1310_v57 = vpop.f32.mrb[6].mxu0  ;;  %v328_v51 = vld [vmem:[#allocation2 + $0x40] sm:$0xff] }
 0x13e   : > { %995 = vst [vmem:[#allocation2 + $0x8] sm:$0xff] %v979_v52  ;;  %v1373_v58 = vadd.f32 %v1372_v56, %v1371_v53  ;;  %v1374_v59 = vpop.f32.mrb[6].mxu1  ;;  %v1311_v60 = vpop.f32.mrb[7].mxu0  ;;  %v329_v56 = vld [vmem:[#allocation2 + $0x48] sm:$0xff] }
 0x13f   : > { %v1312_v62 = vadd.f32 %v1311_v60, %v1310_v57  ;;  %v1375_v63 = vpop.f32.mrb[7].mxu1 }
 0x140   : > { %v924_v0 = vadd.f32 %v1373_v58, %v1309_v55  ;;  %v1376_v1 = vadd.f32 %v1375_v63, %v1374_v59 }
 0x142   : > { %v980_v3 = vadd.f32 %v924_v0, %v322_v61  ;;  %v927_v4 = vadd.f32 %v1376_v1, %v1312_v62 }
 0x143   : > { %v1313_v5 = vpop.f32.mrb[8].mxu0 }
 0x144   : > { %996 = vst [vmem:[#allocation2 + $0x10] sm:$0xff] %v980_v3  ;;  %v981_v6 = vadd.f32 %v927_v4, %v323_v2  ;;  %v1377_v7 = vpop.f32.mrb[8].mxu1  ;;  %v1314_v8 = vpop.f32.mrb[9].mxu0 }
 0x145   : > { %v1315_v9 = vadd.f32 %v1314_v8, %v1313_v5  ;;  %v1378_v10 = vpop.f32.mrb[9].mxu1  ;;  %v1316_v11 = vpop.f32.mrb[10].mxu0  ;;  %v330_v5 = vld [vmem:[#allocation2 + $0x50] sm:$0xff] }
 0x146   : > { %997 = vst [vmem:[#allocation2 + $0x18] sm:$0xff] %v981_v6  ;;  %v1379_v12 = vadd.f32 %v1378_v10, %v1377_v7  ;;  %v1380_v13 = vpop.f32.mrb[10].mxu1  ;;  %v1317_v14 = vpop.f32.mrb[11].mxu0  ;;  %v331_v10 = vld [vmem:[#allocation2 + $0x58] sm:$0xff] }
 0x147   : > { %v1318_v16 = vadd.f32 %v1317_v14, %v1316_v11  ;;  %v1381_v17 = vpop.f32.mrb[11].mxu1 }
 0x148   : > { %v932_v18 = vadd.f32 %v1379_v12, %v1315_v9  ;;  %v1382_v19 = vadd.f32 %v1381_v17, %v1380_v13 }
 0x14a   : > { %v982_v21 = vadd.f32 %v932_v18, %v324_v15  ;;  %v935_v22 = vadd.f32 %v1382_v19, %v1318_v16 }
 0x14b   : > { %v1319_v23 = vpop.f32.mrb[12].mxu0 }
 0x14c   : > { %998 = vst [vmem:[#allocation2 + $0x20] sm:$0xff] %v982_v21  ;;  %v983_v24 = vadd.f32 %v935_v22, %v325_v20  ;;  %v1383_v25 = vpop.f32.mrb[12].mxu1  ;;  %v1320_v26 = vpop.f32.mrb[13].mxu0 }
 0x14d   : > { %v1321_v27 = vadd.f32 %v1320_v26, %v1319_v23  ;;  %v1384_v28 = vpop.f32.mrb[13].mxu1  ;;  %v1322_v29 = vpop.f32.mrb[14].mxu0  ;;  %v332_v23 = vld [vmem:[#allocation2 + $0x60] sm:$0xff] }
 0x14e   : > { %999 = vst [vmem:[#allocation2 + $0x28] sm:$0xff] %v983_v24  ;;  %v1385_v30 = vadd.f32 %v1384_v28, %v1383_v25  ;;  %v1386_v31 = vpop.f32.mrb[14].mxu1  ;;  %v1323_v32 = vpop.f32.mrb[15].mxu0  ;;  %v333_v28 = vld [vmem:[#allocation2 + $0x68] sm:$0xff] }
 0x14f   : > { %v1324_v34 = vadd.f32 %v1323_v32, %v1322_v29  ;;  %v1387_v35 = vpop.f32.mrb[15].mxu1 }
 0x150   : > { %v940_v36 = vadd.f32 %v1385_v30, %v1321_v27  ;;  %v1388_v37 = vadd.f32 %v1387_v35, %v1386_v31 }
 0x152   : > { %v984_v39 = vadd.f32 %v940_v36, %v326_v33  ;;  %v943_v40 = vadd.f32 %v1388_v37, %v1324_v34 }
 0x153   : > { %v1325_v41 = vpop.f32.mrb[16].mxu0 }
 0x154   : > { %1000 = vst [vmem:[#allocation2 + $0x30] sm:$0xff] %v984_v39  ;;  %v985_v42 = vadd.f32 %v943_v40, %v327_v38  ;;  %v1389_v43 = vpop.f32.mrb[16].mxu1  ;;  %v1326_v44 = vpop.f32.mrb[17].mxu0 }
 0x155   : > { %v1327_v45 = vadd.f32 %v1326_v44, %v1325_v41  ;;  %v1390_v46 = vpop.f32.mrb[17].mxu1  ;;  %v1328_v47 = vpop.f32.mrb[18].mxu0  ;;  %v334_v41 = vld [vmem:[#allocation2 + $0x70] sm:$0xff] }
 0x156   : > { %1001 = vst [vmem:[#allocation2 + $0x38] sm:$0xff] %v985_v42  ;;  %v1391_v48 = vadd.f32 %v1390_v46, %v1389_v43  ;;  %v1392_v49 = vpop.f32.mrb[18].mxu1  ;;  %v1329_v50 = vpop.f32.mrb[19].mxu0  ;;  %v335_v46 = vld [vmem:[#allocation2 + $0x78] sm:$0xff] }
 0x157   : > { %v1330_v52 = vadd.f32 %v1329_v50, %v1328_v47  ;;  %v1393_v53 = vpop.f32.mrb[19].mxu1  ;;  %v1014_v50 = vld [vmem:[#allocation2] sm:$0xff] (!%p1278_p12) }
 0x158   : > { %v948_v54 = vadd.f32 %v1391_v48, %v1327_v45  ;;  %v1394_v55 = vadd.f32 %v1393_v53, %v1392_v49  ;;  %1030 = vst [vmem:[%s1860_s2] sm:$0xff] (!%p1278_p12), %v1014_v50  ;;  %v1067_v53 = vmul.f32 (!%p1278_p12), %v1014_v50, %v1014_v50 }
 0x15a   : > { %v986_v57 = vadd.f32 %v948_v54, %v328_v51  ;;  %v951_v58 = vadd.f32 %v1394_v55, %v1330_v52  ;;  %v1015_v51 = vld [vmem:[#allocation2 + $0x8] sm:$0xff] (!%p1278_p12)  ;;  %v1016_v52 = vld [vmem:[#allocation2 + $0x10] sm:$0xff] (!%p1278_p12) }
 0x15b   : > { %v1331_v59 = vpop.f32.mrb[20].mxu0  ;;  %1031 = vst [vmem:[%s1860_s2 + $0x8] sm:$0xff] (!%p1278_p12), %v1015_v51  ;;  %v1046_v54 = vadd.f32 (!%p1278_p12), %v1015_v51, %v1014_v50  ;;  %v1068_v55 = vmul.f32 (!%p1278_p12), %v1015_v51, %v1015_v51  ;;  %1032 = vst [vmem:[%s1860_s2 + $0x10] sm:$0xff] (!%p1278_p12), %v1016_v52  ;;  %v1104_v51 = vlaneseq (!%p1278_p12) }
 0x15c   : > { %1002 = vst [vmem:[#allocation2 + $0x40] sm:$0xff] %v986_v57  ;;  %v987_v60 = vadd.f32 %v951_v58, %v329_v56  ;;  %v1395_v61 = vpop.f32.mrb[20].mxu1  ;;  %v1332_v62 = vpop.f32.mrb[21].mxu0  ;;  %v1069_v56 = vmul.f32 (!%p1278_p12), %v1016_v52, %v1016_v52  ;;  %v1017_v57 = vld [vmem:[#allocation2 + $0x18] sm:$0xff] (!%p1278_p12)  ;;  %v1018_v58 = vld [vmem:[#allocation2 + $0x20] sm:$0xff] (!%p1278_p12) }
 0x15d   : > { %v1333_v63 = vadd.f32 %v1332_v62, %v1331_v59  ;;  %v1396_v0 = vpop.f32.mrb[21].mxu1  ;;  %v1334_v1 = vpop.f32.mrb[22].mxu0  ;;  %v1019_v59 = vld [vmem:[#allocation2 + $0x28] sm:$0xff] (!%p1278_p12)  ;;  %1033 = vst [vmem:[%s1860_s2 + $0x18] sm:$0xff] (!%p1278_p12), %v1017_v57  ;;  %1034 = vst [vmem:[%s1860_s2 + $0x20] sm:$0xff] (!%p1278_p12), %v1018_v58 }
 0x15e   : > { %1003 = vst [vmem:[#allocation2 + $0x48] sm:$0xff] %v987_v60  ;;  %v1397_v2 = vadd.f32 %v1396_v0, %v1395_v61  ;;  %v1398_v3 = vpop.f32.mrb[22].mxu1  ;;  %v1335_v4 = vpop.f32.mrb[23].mxu0  ;;  %1035 = vst [vmem:[%s1860_s2 + $0x28] sm:$0xff] (!%p1278_p12), %v1019_v59  ;;  %v1020_v60 = vld [vmem:[#allocation2 + $0x30] sm:$0xff] (!%p1278_p12)  ;;  %v1021_v61 = vld [vmem:[#allocation2 + $0x38] sm:$0xff] (!%p1278_p12)  ;;  %v1047_v0 = vadd.f32 (!%p1278_p12), %v1046_v54, %v1016_v52 }
 0x15f   : > { %v1336_v6 = vadd.f32 %v1335_v4, %v1334_v1  ;;  %v1399_v7 = vpop.f32.mrb[23].mxu1  ;;  %v1070_v1 = vmul.f32 (!%p1278_p12), %v1017_v57, %v1017_v57  ;;  %1036 = vst [vmem:[%s1860_s2 + $0x30] sm:$0xff] (!%p1278_p12), %v1020_v60  ;;  %1037 = vst [vmem:[%s1860_s2 + $0x38] sm:$0xff] (!%p1278_p12), %v1021_v61 }
 0x160   : > { %v956_v8 = vadd.f32 %v1397_v2, %v1333_v63  ;;  %v1400_v9 = vadd.f32 %v1399_v7, %v1398_v3  ;;  %v1083_v63 = vadd.f32 (!%p1278_p12), %v1068_v55, %v1067_v53 }
 0x162   : > { %v988_v11 = vadd.f32 %v956_v8, %v330_v5  ;;  %v959_v12 = vadd.f32 %v1400_v9, %v1336_v6  ;;  %v1084_v8 = vadd.f32 (!%p1278_p12), %v1083_v63, %v1069_v56  ;;  %v1048_v9 = vadd.f32 (!%p1278_p12), %v1047_v0, %v1017_v57 }
 0x163   : > { %v1337_v13 = vpop.f32.mrb[24].mxu0  ;;  %v1022_v62 = vld [vmem:[#allocation2 + $0x40] sm:$0xff] (!%p1278_p12)  ;;  %v1105_v56 = vshrl.u32 (!%p1278_p12), %v1104_v51, 7 }
 0x164   : > { %1004 = vst [vmem:[#allocation2 + $0x50] sm:$0xff] %v988_v11  ;;  %v989_v14 = vadd.f32 %v959_v12, %v331_v10  ;;  %v1401_v15 = vpop.f32.mrb[24].mxu1  ;;  %v1338_v16 = vpop.f32.mrb[25].mxu0  ;;  %1038 = vst [vmem:[%s1860_s2 + $0x40] sm:$0xff] (!%p1278_p12), %v1022_v62  ;;  %v1071_v10 = vmul.f32 (!%p1278_p12), %v1018_v58, %v1018_v58  ;;  %v1085_v12 = vadd.f32 (!%p1278_p12), %v1084_v8, %v1070_v1 }
 0x165   : > { %v1339_v17 = vadd.f32 %v1338_v16, %v1337_v13  ;;  %v1402_v18 = vpop.f32.mrb[25].mxu1  ;;  %v1340_v19 = vpop.f32.mrb[26].mxu0  ;;  %v1023_v2 = vld [vmem:[#allocation2 + $0x48] sm:$0xff] (!%p1278_p12)  ;;  %v1049_v13 = vadd.f32 (!%p1278_p12), %v1048_v9, %v1018_v58  ;;  %vm1107_vm0 = vcmp.eq.s32.totalorder (!%p1278_p12), %v1105_v56, 1  ;;  %vm1106_vm1 = vcmp.eq.s32.totalorder (!%p1278_p12), %v1105_v56, 0 }
 0x166   : > { %1005 = vst [vmem:[#allocation2 + $0x58] sm:$0xff] %v989_v14  ;;  %v1403_v20 = vadd.f32 %v1402_v18, %v1401_v15  ;;  %v1404_v21 = vpop.f32.mrb[26].mxu1  ;;  %v1341_v22 = vpop.f32.mrb[27].mxu0  ;;  %1039 = vst [vmem:[%s1860_s2 + $0x48] sm:$0xff] (!%p1278_p12), %v1023_v2  ;;  %v1072_v14 = vmul.f32 (!%p1278_p12), %v1019_v59, %v1019_v59  ;;  %v1086_v15 = vadd.f32 (!%p1278_p12), %v1085_v12, %v1071_v10 }
 0x167   : > { %v1342_v24 = vadd.f32 %v1341_v22, %v1340_v19  ;;  %v1405_v25 = vpop.f32.mrb[27].mxu1  ;;  %v1050_v16 = vadd.f32 (!%p1278_p12), %v1049_v13, %v1019_v59 }
 0x168   : > { %v964_v26 = vadd.f32 %v1403_v20, %v1339_v17  ;;  %v1406_v27 = vadd.f32 %v1405_v25, %v1404_v21  ;;  %v1073_v17 = vmul.f32 (!%p1278_p12), %v1020_v60, %v1020_v60  ;;  %v1087_v18 = vadd.f32 (!%p1278_p12), %v1086_v15, %v1072_v14 }
 0x169   : > { %v1051_v19 = vadd.f32 (!%p1278_p12), %v1050_v16, %v1020_v60  ;;  %v1074_v20 = vmul.f32 (!%p1278_p12), %v1021_v61, %v1021_v61 }
 0x16a   : > { %v990_v29 = vadd.f32 %v964_v26, %v332_v23  ;;  %v967_v30 = vadd.f32 %v1406_v27, %v1342_v24  ;;  %v1088_v21 = vadd.f32 (!%p1278_p12), %v1087_v18, %v1073_v17  ;;  %v1075_v23 = vmul.f32 (!%p1278_p12), %v1022_v62, %v1022_v62 }
 0x16b   : > { %v1343_v31 = vpop.f32.mrb[28].mxu0  ;;  %v1024_v3 = vld [vmem:[#allocation2 + $0x50] sm:$0xff] (!%p1278_p12)  ;;  %v1052_v22 = vadd.f32 (!%p1278_p12), %v1051_v19, %v1021_v61  ;;  %v1076_v26 = vmul.f32 (!%p1278_p12), %v1023_v2, %v1023_v2 }
 0x16c   : > { %1006 = vst [vmem:[#allocation2 + $0x60] sm:$0xff] %v990_v29  ;;  %v991_v32 = vadd.f32 %v967_v30, %v333_v28  ;;  %v1407_v33 = vpop.f32.mrb[28].mxu1  ;;  %v1344_v34 = vpop.f32.mrb[29].mxu0  ;;  %1040 = vst [vmem:[%s1860_s2 + $0x50] sm:$0xff] (!%p1278_p12), %v1024_v3  ;;  %v1089_v24 = vadd.f32 (!%p1278_p12), %v1088_v21, %v1074_v20  ;;  %v1077_v29 = vmul.f32 (!%p1278_p12), %v1024_v3, %v1024_v3 }
 0x16d   : > { %v1345_v35 = vadd.f32 %v1344_v34, %v1343_v31  ;;  %v1408_v36 = vpop.f32.mrb[29].mxu1  ;;  %v1346_v37 = vpop.f32.mrb[30].mxu0  ;;  %v1025_v4 = vld [vmem:[#allocation2 + $0x58] sm:$0xff] (!%p1278_p12)  ;;  %v1053_v25 = vadd.f32 (!%p1278_p12), %v1052_v22, %v1022_v62  ;;  %v1110_v62 = vld [vmem:[%s1861_s3] sm:$0xff] (!%p1278_p12) }
 0x16e   : > { %1007 = vst [vmem:[#allocation2 + $0x68] sm:$0xff] %v991_v32  ;;  %v1409_v38 = vadd.f32 %v1408_v36, %v1407_v33  ;;  %v1410_v39 = vpop.f32.mrb[30].mxu1  ;;  %v1347_v40 = vpop.f32.mrb[31].mxu0  ;;  %1041 = vst [vmem:[%s1860_s2 + $0x58] sm:$0xff] (!%p1278_p12), %v1025_v4  ;;  %v1090_v27 = vadd.f32 (!%p1278_p12), %v1089_v24, %v1075_v23  ;;  %v1078_v32 = vmul.f32 (!%p1278_p12), %v1025_v4, %v1025_v4 }
 0x16f   : > { %v1348_v42 = vadd.f32 %v1347_v40, %v1346_v37  ;;  %v1411_v43 = vpop.f32.mrb[31].mxu1  ;;  %v1054_v28 = vadd.f32 (!%p1278_p12), %v1053_v25, %v1023_v2 }
 0x170   : > { %v972_v44 = vadd.f32 %v1409_v38, %v1345_v35  ;;  %v1412_v45 = vadd.f32 %v1411_v43, %v1410_v39  ;;  %1013 = sbr.rel (%p1278_p12) target bundleno = 403 (0x193), region = 63  ;;  %v1091_v30 = vadd.f32 (!%p1278_p12), %v1090_v27, %v1076_v26 }
 0x171   : > { %v1055_v31 = vadd.f32 (!%p1278_p12), %v1054_v28, %v1024_v3 }
 0x172   : > { %v992_v47 = vadd.f32 %v972_v44, %v334_v41  ;;  %v975_v48 = vadd.f32 %v1412_v45, %v1348_v42  ;;  %v1092_v33 = vadd.f32 (!%p1278_p12), %v1091_v30, %v1077_v29 }
 0x173   : > { %v1026_v5 = vld [vmem:[#allocation2 + $0x60] sm:$0xff] (!%p1278_p12)  ;;  %v1056_v34 = vadd.f32 (!%p1278_p12), %v1055_v31, %v1025_v4 }
 0x174   : > { %1008 = vst [vmem:[#allocation2 + $0x70] sm:$0xff] %v992_v47  ;;  %v993_v49 = vadd.f32 %v975_v48, %v335_v46  ;;  %1042 = vst [vmem:[%s1860_s2 + $0x60] sm:$0xff] (!%p1278_p12), %v1026_v5  ;;  %v1079_v35 = vmul.f32 (!%p1278_p12), %v1026_v5, %v1026_v5  ;;  %v1093_v36 = vadd.f32 (!%p1278_p12), %v1092_v33, %v1078_v32 }
 0x175   : > { %v1027_v6 = vld [vmem:[#allocation2 + $0x68] sm:$0xff] (!%p1278_p12)  ;;  %v1057_v37 = vadd.f32 (!%p1278_p12), %v1056_v34, %v1026_v5 }
 0x176   : > { %1009 = vst [vmem:[#allocation2 + $0x78] sm:$0xff] %v993_v49  ;;  %1043 = vst [vmem:[%s1860_s2 + $0x68] sm:$0xff] (!%p1278_p12), %v1027_v6  ;;  %v1080_v38 = vmul.f32 (!%p1278_p12), %v1027_v6, %v1027_v6  ;;  %v1094_v39 = vadd.f32 (!%p1278_p12), %v1093_v36, %v1079_v35 }
 0x177   : > { %v1058_v40 = vadd.f32 %v1057_v37, %v1027_v6 }
 0x178   : > { %v1095_v42 = vadd.f32 %v1094_v39, %v1080_v38 }
 0x17b   : > { %v1028_v7 = vld [vmem:[#allocation2 + $0x70] sm:$0xff] }
 0x17c   : > { %1044 = vst [vmem:[%s1860_s2 + $0x70] sm:$0xff] %v1028_v7  ;;  %v1081_v41 = vmul.f32 %v1028_v7, %v1028_v7  ;;  %v1059_v43 = vadd.f32 %v1058_v40, %v1028_v7 }
 0x17d   : > { %v1029_v11 = vld [vmem:[#allocation2 + $0x78] sm:$0xff] }
 0x17e   : > { %1045 = vst [vmem:[%s1860_s2 + $0x78] sm:$0xff] %v1029_v11  ;;  %v1082_v44 = vmul.f32 %v1029_v11, %v1029_v11  ;;  %v1096_v45 = vadd.f32 %v1095_v42, %v1081_v41  ;;  %v1060_v46 = vadd.f32 %v1059_v43, %v1029_v11 }
 0x180   : > { %v1061_v47 = vrot.slane %v1060_v46, 4  ;;  %v1097_v48 = vadd.f32 %v1096_v45, %v1082_v44 }
 0x182   : > { %v1062_v49 = vadd.f32 %v1061_v47, %v1060_v46  ;;  %v1098_v50 = vrot.slane %v1097_v48, 4 }
 0x184   : > { %v1063_v52 = vrot.slane %v1062_v49, 2  ;;  %v1099_v53 = vadd.f32 %v1098_v50, %v1097_v48 }
 0x186   : > { %v1064_v54 = vadd.f32 %v1063_v52, %v1062_v49  ;;  %v1100_v55 = vrot.slane %v1099_v53, 2 }
 0x188   : > { %v1065_v57 = vrot.slane %v1064_v54, 1  ;;  %v1101_v58 = vadd.f32 %v1100_v55, %v1099_v53 }
 0x18a   : > { %v1102_v59 = vrot.slane %v1101_v58, 1  ;;  %v1066_v60 = vadd.f32 %v1065_v57, %v1064_v54 }
 0x18c   : > { %v1103_v61 = vadd.f32 %v1102_v59, %v1101_v58 }
 0x18e   : > { %v1108_v63 = vsel %vm1107_vm0, %v1103_v61, 0.0 }
 0x18f   : > { %v1109_v0 = vsel %vm1106_vm1, %v1066_v60, %v1108_v63 }
 0x190   : > { %v1111_v1 = vadd.f32 %v1110_v62, %v1109_v0 }
 0x192   : > { %1112 = vst [vmem:[%s1861_s3] sm:$0xff] %v1111_v1 }
 0x193 PF: > { %s14_s16 = sadd.s32 1, %s1573_s16   ;;  %s1862_s12 = smov %s1561_s13 }
 0x194   : > { %p11_p13 = scmp.ge.s32.totalorder %s14_s16, 6   ;;  %s1863_s13 = smov %s1632_s20 }
 0x195   : > { %s1864_s14 = smov %s1569_s15  ;;  %s1865_s15 = smov %s1867_s17 }
 0x196   :  { %13 = sbr.rel (!%p11_p13) target bundleno = 3 (0x3), region = 109 }

// kernel: discriminator_forward.15
= control target key start
LH: loop header
LB: loop body
LE: loop exit
PB: predicated region body
PF: predicated region fallthrough
CT: control target
= control target key end

     0   :  { %s1069_s12 = smov 0   ;;  %s1071_s13 = smov 0   ;;  %s1202_s0 = inlined_call_operand.vmem [shape: bf16[32,2048], index: 0, kind: input, shape index: {}]   ;;  %s1203_s1 = inlined_call_operand.vmem [shape: bf16[2048,128], index: 1, kind: input, shape index: {}]   ;;  %s1204_s2 = inlined_call_operand.vmem [shape: f32[32,128], index: 2, kind: output, shape index: {0}]   ;;  %s1205_s3 = inlined_call_operand.vmem [shape: f32[8,128], index: 3, kind: output, shape index: {1}]  }
   0x1   :  { %s1073_s14 = smov 0   ;;  %s1075_s15 = smov 0  }
   0x2   :  { %s1077_s16 = smov 0  }
   0x3 LB: > { %s23_s17 = sadd.s32 1, %s1041_s15  ;;  %p42_p1 = scmp.ne.s32.totalorder %s1033_s13, %s1029_s12  ;;  %s1045_s16 = sphi %s1077_s16, %s14_s16   ;;  %s1041_s15 = sphi %s1075_s15, %s1209_s15   ;;  %s1037_s14 = sphi %s1073_s14, %s1208_s14   ;;  %s1033_s13 = sphi %s1071_s13, %s1207_s13   ;;  %s1029_s12 = sphi %s1069_s12, %s1206_s12  }
   0x4   : > { %p24_p0 = scmp.ge.s32.totalorder %s23_s17, 4  ;;  %p43_p2 = scmp.eq.s32.totalorder %s1045_s16, 0 }
   0x5   : > { %s35_s19 = sadd.s32 1, %s1033_s13  ;;  %p808_p5 = scmp.ge.s32.totalorder %s1045_s16, 4 }
   0x6   : > { %s1211_s17 = smov (%p24_p0, %s23_s17), 0  ;;  %p44_p3 = por %p43_p2, %p42_p1 }
   0x7   : > { %s31_s18 = ssub.s32 %s1041_s15, %s1211_s17  ;;  %141 = sbr.rel (%p808_p5) target bundleno = 22 (0x16), region = 16 }
   0x8   : > { %p33_p4 = scmp.eq.s32.totalorder %s31_s18, 0 }
   0xa   : > { %s1104_s20 = scalar_select %p33_p4, %s1033_s13, %s35_s19  }
   0xe   : > { %144 = sbr.rel (!%p44_p3) target bundleno = 22 (0x16), region = 20  ;;  %s146_s21 = sand.u32 (%p44_p3), 1, %s1033_s13  }
   0xf   : > { %s863_s22 = sshll.u32 (%p44_p3), %s1041_s15, 4  ;;  %s809_s23 = sshll.u32 (%p44_p3), %s146_s21, 6 }
  0x10   : > { %s154_s26 = scalar_lea.vmem (%p44_p3), %s1202_s0, %s863_s22  ;;  %s148_s27 = scalar_lea.vmem (%p44_p3), [#allocation3], %s809_s23 }
  0x11   : > { %v167_v0 = vld [vmem:[%s154_s26] sm:$0xff] (%p44_p3)  ;;  %v169_v1 = vld [vmem:[%s154_s26 + $0x8] sm:$0xff] (%p44_p3) }
  0x12   : > { %v171_v2 = vld [vmem:[%s154_s26 + $0x40] sm:$0xff] (%p44_p3)  ;;  %168 = vst [vmem:[%s148_s27] sm:$0xff] (%p44_p3), %v167_v0  ;;  %170 = vst [vmem:[%s148_s27 + $0x8] sm:$0xff] (%p44_p3), %v169_v1  ;;  %v173_v3 = vld [vmem:[%s154_s26 + $0x48] sm:$0xff] (%p44_p3) }
  0x13   : > { %172 = vst [vmem:[%s148_s27 + $0x10] sm:$0xff] (%p44_p3), %v171_v2  ;;  %v175_v4 = vld [vmem:[%s154_s26 + $0x80] sm:$0xff] (%p44_p3)  ;;  %v177_v5 = vld [vmem:[%s154_s26 + $0x88] sm:$0xff] (%p44_p3)  ;;  %174 = vst [vmem:[%s148_s27 + $0x18] sm:$0xff] (%p44_p3), %v173_v3 }
  0x14   : > { %176 = vst [vmem:[%s148_s27 + $0x20] sm:$0xff] (%p44_p3), %v175_v4  ;;  %178 = vst [vmem:[%s148_s27 + $0x28] sm:$0xff] (%p44_p3), %v177_v5  ;;  %v179_v6 = vld [vmem:[%s154_s26 + $0xc0] sm:$0xff] (%p44_p3)  ;;  %v181_v7 = vld [vmem:[%s154_s26 + $0xc8] sm:$0xff] (%p44_p3) }
  0x15   : > { %180 = vst [vmem:[%s148_s27 + $0x30] sm:$0xff] %v179_v6  ;;  %182 = vst [vmem:[%s148_s27 + $0x38] sm:$0xff] %v181_v7 }
  0x16 PF: > { %p812_p6 = scmp.ge.s32.totalorder %s1045_s16, 1  ;;  %p196_p7 = scmp.lt.s32.totalorder %s1045_s16, 5 }
  0x18   : > { %p197_p8 = pnand %p812_p6, %p196_p7 }
  0x19   : > { %s203_s28 = sand.u32 (!%p197_p8), 1, %s1029_s12   ;;  %s814_s29 = sshll.u32 (!%p197_p8), %s1037_s14, 6 }
  0x1a   : > { %200 = sbr.rel (%p197_p8) target bundleno = 342 (0x156), region = 47  ;;  %s813_s30 = sshll.u32 (!%p197_p8), %s203_s28, 6 }
  0x1b   : > { %p234_p9 = scmp.lt.s32.totalorder (!%p197_p8), %s814_s29, 255  ;;  %p247_p10 = scmp.eq.s32.totalorder (!%p197_p8), %s1037_s14, 0 }
  0x1c   : > { %s1122_s8 = scalar_lea.vmem (!%p197_p8), [#allocation3], %s813_s30 }
  0x21   : > { %s1213_s29 = smov (!%p234_p9, %s814_s29), 255  ;;  %251 = sbr.rel (!%p247_p10) target bundleno = 40 (0x28), region = 55 }
  0x22   : > { %s815_s4 = sshll.u32 %s1213_s29, 2  ;;  %v1047_v8 = vmov (%p247_p10), 0.0  }
  0x23   : > { %s1120_s7 = scalar_lea.vmem %s1203_s1, %s815_s4  ;;  %252 = vst [vmem:[%s1205_s3] sm:$0xff] (%p247_p10), %v1047_v8 }
  0x28 PF: > { %p817_p11 = scmp.ne.s32.totalorder %s1037_s14, 0 }
  0x29   : > { %v1048_v9 = vmov (!%p817_p11), 0.0  }
  0x2a   : > { %255 = sbr.rel (%p817_p11) target bundleno = 49 (0x31), region = 59  ;;  %256 = vst [vmem:[#allocation2] sm:$0xff] (!%p817_p11), %v1048_v9  ;;  %257 = vst [vmem:[#allocation2 + $0x8] sm:$0xff] (!%p817_p11), %v1048_v9 }
  0x2b   : > { %258 = vst [vmem:[#allocation2 + $0x10] sm:$0xff] (!%p817_p11), %v1048_v9  ;;  %259 = vst [vmem:[#allocation2 + $0x18] sm:$0xff] (!%p817_p11), %v1048_v9 }
  0x31 PF: > { %v963_v10 = vld [vmem:[%s1120_s7 + $0x40] sm:$0xff]   ;;  %v967_v14 = vld [vmem:[%s1120_s7 + $0x48] sm:$0xff]   ;;  %v971_v18 = vld [vmem:[%s1120_s7 + $0x50] sm:$0xff]   ;;  %p858_p12 = scmp.ne.s32.totalorder %s1037_s14, 3 }
  0x32   : > { %v964_v11 = vld [vmem:[%s1120_s7 + $0xc0] sm:$0xff]   ;;  %865 = vmatprep.subr.bf16.mxu0 %v963_v10  ;;  %v968_v15 = vld [vmem:[%s1120_s7 + $0xc8] sm:$0xff]   ;;  %v972_v19 = vld [vmem:[%s1120_s7 + $0xd0] sm:$0xff]  }
  0x33   : > { %v965_v12 = vld [vmem:[%s1120_s7] sm:$0xff]   ;;  %893 = vmatprep.subr.bf16.mxu1 %v964_v11  ;;  %v969_v16 = vld [vmem:[%s1120_s7 + $0x8] sm:$0xff]   ;;  %v973_v20 = vld [vmem:[%s1120_s7 + $0x10] sm:$0xff]  }
  0x34   : > { %v966_v13 = vld [vmem:[%s1120_s7 + $0x80] sm:$0xff]   ;;  %866 = vmatpush3.bf16.msra.mxu0 %v965_v12  ;;  %v970_v17 = vld [vmem:[%s1120_s7 + $0x88] sm:$0xff]   ;;  %v974_v21 = vld [vmem:[%s1120_s7 + $0x90] sm:$0xff]  }
  0x35   : > { %894 = vmatpush3.bf16.msra.mxu1 %v966_v13  ;;  %867 = vmatprep.subr.bf16.mxu0 %v967_v14  ;;  %v975_v22 = vld [vmem:[%s1120_s7 + $0x58] sm:$0xff]   ;;  %v979_v26 = vld [vmem:[%s1120_s7 + $0x60] sm:$0xff]   ;;  %v983_v30 = vld [vmem:[%s1120_s7 + $0x68] sm:$0xff]  }
  0x36   : > { %895 = vmatprep.subr.bf16.mxu1 %v968_v15  ;;  %v976_v23 = vld [vmem:[%s1120_s7 + $0xd8] sm:$0xff]   ;;  %v980_v27 = vld [vmem:[%s1120_s7 + $0xe0] sm:$0xff]   ;;  %v984_v31 = vld [vmem:[%s1120_s7 + $0xe8] sm:$0xff]  }
  0x37   : > { %v977_v24 = vld [vmem:[%s1120_s7 + $0x18] sm:$0xff]   ;;  %v981_v28 = vld [vmem:[%s1120_s7 + $0x20] sm:$0xff]   ;;  %v985_v32 = vld [vmem:[%s1120_s7 + $0x28] sm:$0xff]  }
  0x38   : > { %868 = vmatpush3.bf16.msra.mxu0 %v969_v16  ;;  %v978_v25 = vld [vmem:[%s1120_s7 + $0x98] sm:$0xff]   ;;  %v982_v29 = vld [vmem:[%s1120_s7 + $0xa0] sm:$0xff]   ;;  %v986_v33 = vld [vmem:[%s1120_s7 + $0xa8] sm:$0xff]  }
  0x39   : > { %896 = vmatpush3.bf16.msra.mxu1 %v970_v17  ;;  %869 = vmatprep.subr.bf16.mxu0 %v971_v18  ;;  %v987_v34 = vld [vmem:[%s1120_s7 + $0x70] sm:$0xff]   ;;  %v991_v38 = vld [vmem:[%s1120_s7 + $0x78] sm:$0xff]   ;;  %v260_v59 = vld [vmem:[#allocation2] sm:$0xff] }
  0x3a   : > { %897 = vmatprep.subr.bf16.mxu1 %v972_v19  ;;  %v988_v35 = vld [vmem:[%s1120_s7 + $0xf0] sm:$0xff]   ;;  %v992_v39 = vld [vmem:[%s1120_s7 + $0xf8] sm:$0xff]   ;;  %v261_v0 = vld [vmem:[#allocation2 + $0x8] sm:$0xff] }
  0x3b   : > { %v989_v36 = vld [vmem:[%s1120_s7 + $0x30] sm:$0xff]   ;;  %v993_v40 = vld [vmem:[%s1120_s7 + $0x38] sm:$0xff]  }
  0x3c   : > { %870 = vmatpush3.bf16.msra.mxu0 %v973_v20  ;;  %v990_v37 = vld [vmem:[%s1120_s7 + $0xb0] sm:$0xff]   ;;  %v994_v41 = vld [vmem:[%s1120_s7 + $0xb8] sm:$0xff]  }
  0x3d   : > { %898 = vmatpush3.bf16.msra.mxu1 %v974_v21  ;;  %871 = vmatprep.subr.bf16.mxu0 %v975_v22  ;;  %v995_v42 = vld [vmem:[%s1122_s8] ss:$16 sps:$4 sm:$0xff]   ;;  %v997_v43 = vld [vmem:[%s1122_s8 + $0x4] ss:$16 sps:$4 sm:$0xff]   ;;  %v998_v44 = vld [vmem:[%s1122_s8 + $0x8] ss:$16 sps:$4 sm:$0xff]  }
  0x3e   : > { %899 = vmatprep.subr.bf16.mxu1 %v976_v23  ;;  %v1000_v45 = vld [vmem:[%s1122_s8 + $0xc] ss:$16 sps:$4 sm:$0xff]   ;;  %600 = vmatprep.mubr.bf16.mxu0 %v997_v43  ;;  %v1001_v46 = vld [vmem:[%s1122_s8 + $0x24] ss:$16 sps:$4 sm:$0xff]   ;;  %v1005_v48 = vld [vmem:[%s1122_s8 + $0x20] ss:$16 sps:$4 sm:$0xff]  }
  0x3f   : > { %649 = vmatprep.mubr.bf16.mxu1 %v1000_v45  ;;  %v1003_v47 = vld [vmem:[%s1122_s8 + $0x2c] ss:$16 sps:$4 sm:$0xff]   ;;  %v1006_v49 = vld [vmem:[%s1122_s8 + $0x28] ss:$16 sps:$4 sm:$0xff]   ;;  %v262_v13 = vld [vmem:[#allocation2 + $0x10] sm:$0xff] }
  0x40   : > { %872 = vmatpush3.bf16.msra.mxu0 %v977_v24  ;;  %v263_v18 = vld [vmem:[#allocation2 + $0x18] sm:$0xff] }
  0x41   : > { %900 = vmatpush3.bf16.msra.mxu1 %v978_v25  ;;  %873 = vmatprep.subr.bf16.mxu0 %v979_v26 }
  0x42   : > { %901 = vmatprep.subr.bf16.mxu1 %v980_v27 }
  0x44   : > { %874 = vmatpush3.bf16.msra.mxu0 %v981_v28 }
  0x45   : > { %902 = vmatpush3.bf16.msra.mxu1 %v982_v29  ;;  %875 = vmatprep.subr.bf16.mxu0 %v983_v30 }
  0x46   : > { %903 = vmatprep.subr.bf16.mxu1 %v984_v31 }
  0x48   : > { %876 = vmatpush3.bf16.msra.mxu0 %v985_v32 }
  0x49   : > { %904 = vmatpush3.bf16.msra.mxu1 %v986_v33  ;;  %877 = vmatprep.subr.bf16.mxu0 %v987_v34 }
  0x4a   : > { %905 = vmatprep.subr.bf16.mxu1 %v988_v35 }
  0x4c   : > { %878 = vmatpush3.bf16.msra.mxu0 %v989_v36 }
  0x4d   : > { %906 = vmatpush3.bf16.msra.mxu1 %v990_v37  ;;  %879 = vmatprep.subr.bf16.mxu0 %v991_v38 }
  0x4e   : > { %907 = vmatprep.subr.bf16.mxu1 %v992_v39  ;;  %v708_v39 = vlaneseq (!%p858_p12) }
  0x50   : > { %880 = vmatpush3.bf16.msra.mxu0 %v993_v40 }
  0x51   : > { %908 = vmatpush3.bf16.msra.mxu1 %v994_v41 }
  0x53   : > { %601 = vmatmul.mubr.bf16.vlgmr.msra.gmra.mrb[0].mxu0 %v995_v42 }
  0x54   : > { %650 = vmatmul.mubr.bf16.vlgmr.msra.gmra.mrb[0].mxu1 %v998_v44  ;;  %608 = vmatprep.mubr.bf16.mxu0 %v1001_v46  ;;  %v709_v44 = vshrl.u32 (!%p858_p12), %v708_v39, 7 }
  0x55   : > { %657 = vmatprep.mubr.bf16.mxu1 %v1003_v47 }
  0x56   : > { %vm711_vm0 = vcmp.eq.s32.totalorder (!%p858_p12), %v709_v44, 1  ;;  %vm710_vm1 = vcmp.eq.s32.totalorder (!%p858_p12), %v709_v44, 0 }
  0x5b   : > { %609 = vmatmul.mubr.bf16.gmra.mrb[4].mxu0 %v1005_v48 }
  0x5c   : > { %658 = vmatmul.mubr.bf16.gmra.mrb[4].mxu1 %v1006_v49 }
 0x126   : > { %v881_v50 = vpop.f32.mrb[0].mxu0 }
 0x127   : > { %v909_v51 = vpop.f32.mrb[0].mxu1  ;;  %v882_v52 = vpop.f32.mrb[1].mxu0 }
 0x128   : > { %v883_v53 = vadd.f32 %v882_v52, %v881_v50  ;;  %v910_v54 = vpop.f32.mrb[1].mxu1  ;;  %v884_v55 = vpop.f32.mrb[2].mxu0  ;;  %v714_v50 = vld [vmem:[%s1205_s3] sm:$0xff] (!%p858_p12) }
 0x129   : > { %v911_v56 = vadd.f32 %v910_v54, %v909_v51  ;;  %v912_v57 = vpop.f32.mrb[2].mxu1  ;;  %v885_v58 = vpop.f32.mrb[3].mxu0 }
 0x12a   : > { %v886_v60 = vadd.f32 %v885_v58, %v884_v55  ;;  %v913_v61 = vpop.f32.mrb[3].mxu1 }
 0x12b   : > { %v652_v62 = vadd.f32 %v911_v56, %v883_v53  ;;  %v914_v63 = vadd.f32 %v913_v61, %v912_v57 }
 0x12d   : > { %v666_v1 = vadd.f32 %v652_v62, %v260_v59  ;;  %v655_v2 = vadd.f32 %v914_v63, %v886_v60 }
 0x12e   : > { %v887_v3 = vpop.f32.mrb[4].mxu0 }
 0x12f   : > { %670 = vst [vmem:[#allocation2] sm:$0xff] %v666_v1  ;;  %v667_v4 = vadd.f32 %v655_v2, %v261_v0  ;;  %v915_v5 = vpop.f32.mrb[4].mxu1  ;;  %v888_v6 = vpop.f32.mrb[5].mxu0 }
 0x130   : > { %v889_v7 = vadd.f32 %v888_v6, %v887_v3  ;;  %v916_v8 = vpop.f32.mrb[5].mxu1  ;;  %v890_v9 = vpop.f32.mrb[6].mxu0 }
 0x131   : > { %671 = vst [vmem:[#allocation2 + $0x8] sm:$0xff] %v667_v4  ;;  %v917_v10 = vadd.f32 %v916_v8, %v915_v5  ;;  %v918_v11 = vpop.f32.mrb[6].mxu1  ;;  %v891_v12 = vpop.f32.mrb[7].mxu0 }
 0x132   : > { %v892_v14 = vadd.f32 %v891_v12, %v890_v9  ;;  %v919_v15 = vpop.f32.mrb[7].mxu1 }
 0x133   : > { %v660_v16 = vadd.f32 %v917_v10, %v889_v7  ;;  %v920_v17 = vadd.f32 %v919_v15, %v918_v11  ;;  %677 = sbr.rel (%p858_p12) target bundleno = 342 (0x156), region = 63 }
 0x135   : > { %v668_v19 = vadd.f32 %v660_v16, %v262_v13  ;;  %v663_v20 = vadd.f32 %v920_v17, %v892_v14 }
 0x136   : > { %v678_v22 = vld [vmem:[#allocation2] sm:$0xff] (!%p858_p12) }
 0x137   : > { %672 = vst [vmem:[#allocation2 + $0x10] sm:$0xff] %v668_v19  ;;  %v669_v21 = vadd.f32 %v663_v20, %v263_v18  ;;  %682 = vst [vmem:[%s1204_s2] sm:$0xff] (!%p858_p12), %v678_v22  ;;  %v695_v25 = vmul.f32 (!%p858_p12), %v678_v22, %v678_v22 }
 0x138   : > { %v679_v23 = vld [vmem:[#allocation2 + $0x8] sm:$0xff] (!%p858_p12) }
 0x139   : > { %673 = vst [vmem:[#allocation2 + $0x18] sm:$0xff] %v669_v21  ;;  %683 = vst [vmem:[%s1204_s2 + $0x8] sm:$0xff] (!%p858_p12), %v679_v23  ;;  %v686_v26 = vadd.f32 (!%p858_p12), %v679_v23, %v678_v22  ;;  %v696_v27 = vmul.f32 (!%p858_p12), %v679_v23, %v679_v23 }
 0x13b   : > { %v699_v30 = vadd.f32 %v696_v27, %v695_v25 }
 0x13e   : > { %v680_v24 = vld [vmem:[#allocation2 + $0x10] sm:$0xff] }
 0x13f   : > { %684 = vst [vmem:[%s1204_s2 + $0x10] sm:$0xff] %v680_v24  ;;  %v697_v28 = vmul.f32 %v680_v24, %v680_v24  ;;  %v687_v31 = vadd.f32 %v686_v26, %v680_v24 }
 0x140   : > { %v681_v29 = vld [vmem:[#allocation2 + $0x18] sm:$0xff] }
 0x141   : > { %685 = vst [vmem:[%s1204_s2 + $0x18] sm:$0xff] %v681_v29  ;;  %v698_v32 = vmul.f32 %v681_v29, %v681_v29  ;;  %v700_v33 = vadd.f32 %v699_v30, %v697_v28  ;;  %v688_v34 = vadd.f32 %v687_v31, %v681_v29 }
 0x143   : > { %v689_v35 = vrot.slane %v688_v34, 4  ;;  %v701_v36 = vadd.f32 %v700_v33, %v698_v32 }
 0x145   : > { %v690_v37 = vadd.f32 %v689_v35, %v688_v34  ;;  %v702_v38 = vrot.slane %v701_v36, 4 }
 0x147   : > { %v691_v40 = vrot.slane %v690_v37, 2  ;;  %v703_v41 = vadd.f32 %v702_v38, %v701_v36 }
 0x149   : > { %v692_v42 = vadd.f32 %v691_v40, %v690_v37  ;;  %v704_v43 = vrot.slane %v703_v41, 2 }
 0x14b   : > { %v693_v45 = vrot.slane %v692_v42, 1  ;;  %v705_v46 = vadd.f32 %v704_v43, %v703_v41 }
 0x14d   : > { %v706_v47 = vrot.slane %v705_v46, 1  ;;  %v694_v48 = vadd.f32 %v693_v45, %v692_v42 }
 0x14f   : > { %v707_v49 = vadd.f32 %v706_v47, %v705_v46 }
 0x151   : > { %v712_v51 = vsel %vm711_vm0, %v707_v49, 0.0 }
 0x152   : > { %v713_v52 = vsel %vm710_vm1, %v694_v48, %v712_v51 }
 0x153   : > { %v715_v53 = vadd.f32 %v714_v50, %v713_v52 }
 0x155   : > { %716 = vst [vmem:[%s1205_s3] sm:$0xff] %v715_v53 }
 0x156 PF: > { %s14_s16 = sadd.s32 1, %s1045_s16   ;;  %s1206_s12 = smov %s1033_s13 }
 0x157   : > { %p11_p13 = scmp.ge.s32.totalorder %s14_s16, 6   ;;  %s1207_s13 = smov %s1104_s20 }
 0x158   : > { %s1208_s14 = smov %s1041_s15  ;;  %s1209_s15 = smov %s1211_s17 }
 0x159   :  { %13 = sbr.rel (!%p11_p13) target bundleno = 3 (0x3), region = 109 }

// kernel: discriminator_forward.16
= control target key start
LH: loop header
LB: loop body
LE: loop exit
PB: predicated region body
PF: predicated region fallthrough
CT: control target
= control target key end

     0   :  { %s112_s0 = inlined_call_operand.vmem [shape: f32[32,128], index: 0, kind: input, shape index: {}]   ;;  %s113_s1 = inlined_call_operand.vmem [shape: f32[1,128], index: 1, kind: input, shape index: {}]   ;;  %s114_s2 = inlined_call_operand.vmem [shape: f32[1,128], index: 2, kind: input, shape index: {}]   ;;  %s115_s3 = inlined_call_operand.vmem [shape: f32[32,128], index: 3, kind: output, shape index: {}]  }
   0x1   :  { %v14_v0 = vld [vmem:[%s112_s0] sm:$0xff]  ;;  %v15_v4 = vld [vmem:[%s112_s0 + $0x8] sm:$0xff]  ;;  %v16_v5 = vld [vmem:[%s112_s0 + $0x10] sm:$0xff] }
   0x2   :  { %v60_v1 = vld [vmem:[%s113_s1] ss:$0 sm:$0xff]  ;;  %v17_v6 = vld [vmem:[%s112_s0 + $0x18] sm:$0xff] }
   0x3   :  { %v61_v2 = vld [vmem:[%s114_s2] ss:$0 sm:$0xff]  ;;  %v25_v3 = vmul.f32 %v60_v1, %v14_v0  ;;  %v26_v7 = vmul.f32 %v60_v1, %v15_v4  ;;  %v27_v8 = vmul.f32 %v60_v1, %v16_v5  ;;  %v28_v9 = vmul.f32 %v60_v1, %v17_v6 }
   0x5   :  { %v36_v10 = vadd.f32 %v61_v2, %v25_v3  ;;  %v37_v11 = vadd.f32 %v61_v2, %v26_v7  ;;  %v38_v12 = vadd.f32 %v61_v2, %v27_v8  ;;  %v39_v13 = vadd.f32 %v61_v2, %v28_v9 }
   0x7   :  { %vm40_vm0 = vcmp.ge.f32.partialorder %v36_v10, 0.0  ;;  %v44_v14 = vmul.f32 0.2, %v36_v10  ;;  %vm41_vm1 = vcmp.ge.f32.partialorder %v37_v11, 0.0  ;;  %v45_v15 = vmul.f32 0.2, %v37_v11 }
   0x8   :  { %vm42_vm2 = vcmp.ge.f32.partialorder %v38_v12, 0.0  ;;  %v46_v16 = vmul.f32 0.2, %v38_v12  ;;  %vm43_vm3 = vcmp.ge.f32.partialorder %v39_v13, 0.0  ;;  %v47_v18 = vmul.f32 0.2, %v39_v13 }
   0x9   :  { %v48_v17 = vsel %vm40_vm0, %v36_v10, %v44_v14  ;;  %v49_v19 = vsel %vm41_vm1, %v37_v11, %v45_v15 }
   0xa   :  { %52 = vst [vmem:[%s115_s3] sm:$0xff] %v48_v17  ;;  %v50_v20 = vsel %vm42_vm2, %v38_v12, %v46_v16  ;;  %53 = vst [vmem:[%s115_s3 + $0x8] sm:$0xff] %v49_v19  ;;  %v51_v21 = vsel %vm43_vm3, %v39_v13, %v47_v18 }
   0xb   :  { %54 = vst [vmem:[%s115_s3 + $0x10] sm:$0xff] %v50_v20  ;;  %55 = vst [vmem:[%s115_s3 + $0x18] sm:$0xff] %v51_v21 }

// kernel: discriminator_forward.17
= control target key start
LH: loop header
LB: loop body
LE: loop exit
PB: predicated region body
PF: predicated region fallthrough
CT: control target
= control target key end

     0   :  { %s871_s12 = smov 0   ;;  %s873_s13 = smov 0   ;;  %s954_s0 = inlined_call_operand.vmem [shape: bf16[8,2048], index: 0, kind: input, shape index: {}]   ;;  %s955_s1 = inlined_call_operand.vmem [shape: bf16[2048,128], index: 1, kind: input, shape index: {}]   ;;  %s956_s2 = inlined_call_operand.vmem [shape: f32[1,128], index: 2, kind: input, shape index: {}]   ;;  %s957_s3 = inlined_call_operand.vmem [shape: f32[8,128], index: 3, kind: output, shape index: {}]  }
   0x1   :  { %s875_s14 = smov 0  }
   0x2 LB: > { %s22_s15 = sadd.s32 1, %s844_s13  ;;  %p674_p0 = scmp.ge.s32.totalorder %s848_s14, 1  ;;  %s848_s14 = sphi %s875_s14, %s13_s14   ;;  %s844_s13 = sphi %s873_s13, %s959_s13   ;;  %s840_s12 = sphi %s871_s12, %s958_s12  }
   0x3   : > { %p23_p1 = scmp.ge.s32.totalorder %s22_s15, 4  ;;  %p167_p2 = scmp.lt.s32.totalorder %s848_s14, 5 }
   0x5   : > { %s961_s15 = smov (%p23_p1, %s22_s15), 0  ;;  %p168_p3 = pnand %p674_p0, %p167_p2 }
   0x6   : > { %s675_s16 = sshll.u32 (!%p168_p3), %s840_s12, 2  ;;  %s677_s17 = sshll.u32 (!%p168_p3), %s840_s12, 6 }
   0x7   : > { %171 = sbr.rel (%p168_p3) target bundleno = 289 (0x121), region = 32  ;;  %p202_p4 = scmp.lt.s32.totalorder (!%p168_p3), %s675_s16, 15 }
   0x8   : > { %p210_p5 = scmp.lt.s32.totalorder (!%p168_p3), %s677_s17, 255  ;;  %p679_p6 = scmp.ne.s32.totalorder (!%p168_p3), %s840_s12, 0 }
   0xe   : > { %s963_s16 = smov (!%p202_p4, %s675_s16), 15  ;;  %s965_s17 = smov (!%p210_p5, %s677_s17), 255 }
   0xf   : > { %s676_s18 = sshll.u32 %s963_s16, 2  ;;  %s678_s22 = sshll.u32 %s965_s17, 2  ;;  %v850_v0 = vmov (!%p679_p6), 0.0  }
  0x10   : > { %s896_s21 = scalar_lea.vmem %s954_s0, %s676_s18  ;;  %s901_s25 = scalar_lea.vmem %s955_s1, %s678_s22  ;;  %224 = vst [vmem:[#allocation2] sm:$0xff] (!%p679_p6), %v850_v0 }
  0x11   : > { %223 = sbr.rel (%p679_p6) target bundleno = 24 (0x18), region = 36 }
  0x18 PF: > { %v790_v1 = vld [vmem:[%s901_s25 + $0x40] sm:$0xff]   ;;  %v794_v5 = vld [vmem:[%s901_s25 + $0x48] sm:$0xff]   ;;  %v798_v9 = vld [vmem:[%s901_s25 + $0x50] sm:$0xff]   ;;  %p716_p7 = scmp.ne.s32.totalorder %s840_s12, 3 }
  0x19   : > { %v791_v2 = vld [vmem:[%s901_s25 + $0xc0] sm:$0xff]   ;;  %721 = vmatprep.subr.bf16.mxu0 %v790_v1  ;;  %v795_v6 = vld [vmem:[%s901_s25 + $0xc8] sm:$0xff]   ;;  %v799_v10 = vld [vmem:[%s901_s25 + $0xd0] sm:$0xff]  }
  0x1a   : > { %v792_v3 = vld [vmem:[%s901_s25] sm:$0xff]   ;;  %743 = vmatprep.subr.bf16.mxu1 %v791_v2  ;;  %v796_v7 = vld [vmem:[%s901_s25 + $0x8] sm:$0xff]   ;;  %v800_v11 = vld [vmem:[%s901_s25 + $0x10] sm:$0xff]  }
  0x1b   : > { %v793_v4 = vld [vmem:[%s901_s25 + $0x80] sm:$0xff]   ;;  %722 = vmatpush3.bf16.msra.mxu0 %v792_v3  ;;  %v797_v8 = vld [vmem:[%s901_s25 + $0x88] sm:$0xff]   ;;  %v801_v12 = vld [vmem:[%s901_s25 + $0x90] sm:$0xff]  }
  0x1c   : > { %744 = vmatpush3.bf16.msra.mxu1 %v793_v4  ;;  %723 = vmatprep.subr.bf16.mxu0 %v794_v5  ;;  %v802_v13 = vld [vmem:[%s901_s25 + $0x58] sm:$0xff]   ;;  %v806_v17 = vld [vmem:[%s901_s25 + $0x60] sm:$0xff]   ;;  %v810_v21 = vld [vmem:[%s901_s25 + $0x68] sm:$0xff]  }
  0x1d   : > { %745 = vmatprep.subr.bf16.mxu1 %v795_v6  ;;  %v803_v14 = vld [vmem:[%s901_s25 + $0xd8] sm:$0xff]   ;;  %v807_v18 = vld [vmem:[%s901_s25 + $0xe0] sm:$0xff]   ;;  %v811_v22 = vld [vmem:[%s901_s25 + $0xe8] sm:$0xff]  }
  0x1e   : > { %v804_v15 = vld [vmem:[%s901_s25 + $0x18] sm:$0xff]   ;;  %v808_v19 = vld [vmem:[%s901_s25 + $0x20] sm:$0xff]   ;;  %v812_v23 = vld [vmem:[%s901_s25 + $0x28] sm:$0xff]  }
  0x1f   : > { %724 = vmatpush3.bf16.msra.mxu0 %v796_v7  ;;  %v805_v16 = vld [vmem:[%s901_s25 + $0x98] sm:$0xff]   ;;  %v809_v20 = vld [vmem:[%s901_s25 + $0xa0] sm:$0xff]   ;;  %v813_v24 = vld [vmem:[%s901_s25 + $0xa8] sm:$0xff]  }
  0x20   : > { %746 = vmatpush3.bf16.msra.mxu1 %v797_v8  ;;  %725 = vmatprep.subr.bf16.mxu0 %v798_v9  ;;  %v814_v25 = vld [vmem:[%s901_s25 + $0x70] sm:$0xff]   ;;  %v818_v29 = vld [vmem:[%s901_s25 + $0x78] sm:$0xff]   ;;  %v226_v33 = vld [vmem:[%s896_s21] sm:$0xff] }
  0x21   : > { %747 = vmatprep.subr.bf16.mxu1 %v799_v10  ;;  %v815_v26 = vld [vmem:[%s901_s25 + $0xf0] sm:$0xff]   ;;  %v819_v30 = vld [vmem:[%s901_s25 + $0xf8] sm:$0xff]   ;;  %v227_v34 = vld [vmem:[%s896_s21 + $0x8] sm:$0xff]  ;;  %v680_v35 = vcombine.low %v226_v33, %v226_v33  ;;  %v681_v36 = vcombine.high %v226_v33, %v226_v33 }
  0x22   : > { %v816_v27 = vld [vmem:[%s901_s25 + $0x30] sm:$0xff]   ;;  %v820_v31 = vld [vmem:[%s901_s25 + $0x38] sm:$0xff]   ;;  %v682_v37 = vcombine.low %v227_v34, %v227_v34  ;;  %v683_v38 = vcombine.high %v227_v34, %v227_v34  ;;  %v225_v47 = vld [vmem:[#allocation2] sm:$0xff] }
  0x23   : > { %726 = vmatpush3.bf16.msra.mxu0 %v800_v11  ;;  %v817_v28 = vld [vmem:[%s901_s25 + $0xb0] sm:$0xff]   ;;  %v821_v32 = vld [vmem:[%s901_s25 + $0xb8] sm:$0xff]   ;;  %530 = vmatprep.mubr.bf16.mxu0 %v681_v36  ;;  %v717_v53 = vld [vmem:[%s956_s2] ss:$0 sm:$0xff] (!%p716_p7) }
  0x24   : > { %748 = vmatpush3.bf16.msra.mxu1 %v801_v12  ;;  %727 = vmatprep.subr.bf16.mxu0 %v802_v13 }
  0x25   : > { %749 = vmatprep.subr.bf16.mxu1 %v803_v14  ;;  %570 = vmatprep.mubr.bf16.mxu1 %v683_v38 }
  0x27   : > { %728 = vmatpush3.bf16.msra.mxu0 %v804_v15 }
  0x28   : > { %750 = vmatpush3.bf16.msra.mxu1 %v805_v16  ;;  %729 = vmatprep.subr.bf16.mxu0 %v806_v17 }
  0x29   : > { %751 = vmatprep.subr.bf16.mxu1 %v807_v18 }
  0x2b   : > { %730 = vmatpush3.bf16.msra.mxu0 %v808_v19 }
  0x2c   : > { %752 = vmatpush3.bf16.msra.mxu1 %v809_v20  ;;  %731 = vmatprep.subr.bf16.mxu0 %v810_v21 }
  0x2d   : > { %753 = vmatprep.subr.bf16.mxu1 %v811_v22 }
  0x2f   : > { %732 = vmatpush3.bf16.msra.mxu0 %v812_v23 }
  0x30   : > { %754 = vmatpush3.bf16.msra.mxu1 %v813_v24  ;;  %733 = vmatprep.subr.bf16.mxu0 %v814_v25 }
  0x31   : > { %755 = vmatprep.subr.bf16.mxu1 %v815_v26 }
  0x33   : > { %734 = vmatpush3.bf16.msra.mxu0 %v816_v27 }
  0x34   : > { %756 = vmatpush3.bf16.msra.mxu1 %v817_v28  ;;  %735 = vmatprep.subr.bf16.mxu0 %v818_v29 }
  0x35   : > { %757 = vmatprep.subr.bf16.mxu1 %v819_v30 }
  0x37   : > { %736 = vmatpush3.bf16.msra.mxu0 %v820_v31 }
  0x38   : > { %758 = vmatpush3.bf16.msra.mxu1 %v821_v32 }
  0x3a   : > { %531 = vmatmul.mubr.bf16.vlgmr.msra.gmra.mrb[0].mxu0 %v680_v35 }
  0x3b   : > { %571 = vmatmul.mubr.bf16.vlgmr.msra.gmra.mrb[0].mxu1 %v682_v37 }
 0x10d   : > { %v737_v39 = vpop.f32.mrb[0].mxu0 }
 0x10e   : > { %v759_v40 = vpop.f32.mrb[0].mxu1  ;;  %v738_v41 = vpop.f32.mrb[1].mxu0 }
 0x10f   : > { %v760_v42 = vpop.f32.mrb[1].mxu1  ;;  %v739_v43 = vadd.f32 %v738_v41, %v737_v39  ;;  %v740_v45 = vpop.f32.mrb[2].mxu0 }
 0x110   : > { %v761_v44 = vadd.f32 %v760_v42, %v759_v40  ;;  %v762_v46 = vpop.f32.mrb[2].mxu1  ;;  %v741_v48 = vpop.f32.mrb[3].mxu0  ;;  %583 = sbr.rel (%p716_p7) target bundleno = 289 (0x121), region = 40 }
 0x111   : > { %v763_v49 = vpop.f32.mrb[3].mxu1 }
 0x112   : > { %v573_v50 = vadd.f32 %v761_v44, %v739_v43 }
 0x114   : > { %v578_v51 = vadd.f32 %v573_v50, %v225_v47 }
 0x116   : > { %579 = vst [vmem:[#allocation2] sm:$0xff] %v578_v51 }
 0x11d   : > { %v584_v52 = vld [vmem:[#allocation2] sm:$0xff] }
 0x11e   : > { %v592_v54 = vadd.f32 %v717_v53, %v584_v52 }
 0x120   : > { %593 = vst [vmem:[%s957_s3] sm:$0xff] %v592_v54 }
 0x121 PF: > { %s13_s14 = sadd.s32 1, %s848_s14   ;;  %s958_s12 = smov %s844_s13 }
 0x122   : > { %p10_p8 = scmp.ge.s32.totalorder %s13_s14, 6   ;;  %s959_s13 = smov %s961_s15 }
 0x124   :  { %12 = sbr.rel (!%p10_p8) target bundleno = 2 (0x2), region = 73 }

</bundles_post_ra>
